<compile_context>
chip_gen: v7x
topology: tpu7x:2x2x1
jax: 0.10.0
libtpu: 0.0.40
codegen_flags: <defaults>
</compile_context>

<pallas_src>
import jax
import jax.numpy as jnp
from jax.experimental import pallas as pl
from jax.experimental.pallas import tpu as pltpu


def _round_up(x, m):
    return ((x + m - 1) // m) * m


def _cdiv(a, b):
    return -(-a // b)


def _mlp_kernel(x_ref, w1_ref, b1_ref, w2_ref, b2_ref, w3_ref, b3_ref, o_ref):
    # x tile is already bf16 (cast in the wrapper).
    x = x_ref[...]

    h1 = jnp.dot(x, w1_ref[...], preferred_element_type=jnp.float32) + b1_ref[...]
    h1 = jnp.maximum(h1, 0.0)

    h2 = jnp.dot(h1.astype(jnp.bfloat16), w2_ref[...],
                 preferred_element_type=jnp.float32) + b2_ref[...]
    h2 = jnp.maximum(h2, 0.0)

    # Layer 3 (512 -> 1): VPU multiply + XLU lane reduction; w3_ref is a
    # (1, 512) row.  (An N=1 MXU matmul would waste a full MXU pass.)
    col = jnp.sum(h2 * w3_ref[...].astype(jnp.float32), axis=-1, keepdims=True)
    col = col + b3_ref[...]                                    # (TM, 1) f32

    # Lane-dense epilogue: relayout the (TM, 1) column into the (1, 1, TM)
    # output row (one small XLU relayout) so stores are unmasked full-lane vst
    # instead of TM/8 masked partial stores.
    o_ref[...] = col.reshape(o_ref.shape).astype(o_ref.dtype)


def _choose_tile(n, tm):
    """Pick a batch-tile height (multiple of 256) that
       * tiles the batch tightly (minimal zero-row MXU work), and
       * yields >= 2 grid steps whenever n >= 512 so the 'parallel' batch axis
         can shard across both v7x TensorCores."""
    n = max(int(n), 1)
    tm_eff = _round_up(_cdiv(n, max(_cdiv(n, tm), 1)), 256)
    if n >= 512:
        tm_eff = min(tm_eff, _round_up(_cdiv(n, 2), 256))
    return tm_eff


def baseline_mlp_forward(x, params, *, tm=2048):
    """x: any shape whose elements reshape to (-1, input_dim) (== torch .view)."""
    w1, b1, w2, b2, w3_row, b3 = params
    input_dim, hidden = w1.shape

    # bf16 x in the wrapper: halves the per-step x DMA / VMEM tile and removes
    # a per-tile VPU cast (matmuls still accumulate in f32).
    x2d = x.reshape(-1, input_dim).astype(jnp.bfloat16)
    n = x2d.shape[0]

    tm_eff = _choose_tile(n, tm)
    n_pad = _round_up(n, tm_eff)
    if n_pad != n:
        x2d = jnp.pad(x2d, ((0, n_pad - n), (0, 0)))
    num_tiles = n_pad // tm_eff

    out = pl.pallas_call(
        _mlp_kernel,
        # Lane-dense output slab: one (1, TM) row per grid step.
        out_shape=jax.ShapeDtypeStruct((num_tiles, 1, tm_eff), jnp.float32),
        grid_spec=pltpu.PrefetchScalarGridSpec(
            num_scalar_prefetch=0,
            grid=(num_tiles,),
            in_specs=[
                # x tile marches over the batch dimension.
                pl.BlockSpec((tm_eff, input_dim), lambda i: (i, 0)),
                # Weights / biases: constant block index -> DMA'd once, resident.
                pl.BlockSpec((input_dim, hidden), lambda i: (0, 0)),  # w1 (bf16)
                pl.BlockSpec((1, hidden), lambda i: (0, 0)),          # b1 (f32)
                pl.BlockSpec((hidden, hidden), lambda i: (0, 0)),     # w2 (bf16)
                pl.BlockSpec((1, hidden), lambda i: (0, 0)),          # b2 (f32)
                pl.BlockSpec((1, hidden), lambda i: (0, 0)),          # w3 row (bf16)
                pl.BlockSpec((1, 1), lambda i: (0, 0)),               # b3 (f32)
            ],
            out_specs=pl.BlockSpec((1, 1, tm_eff), lambda i: (i, 0, 0)),
        ),
        compiler_params=pltpu.CompilerParams(
            dimension_semantics=("parallel",),
        ),
    )(x2d, w1, b1, w2, b2, w3_row, b3)

    # (num_tiles, 1, tm_eff) -> (n, 1), dropping padded rows.
    return out.reshape(n_pad, 1)[:n]


def init_params(key, input_dim, hidden=512):
    """Deterministic init mimicking nn.Linear's kaiming-uniform fan_in scheme.

    Weights stored bf16 (MXU inputs); biases stay f32.  w3 is stored as a
    (1, hidden) row for the VPU reduction in the kernel."""
    def linear_init(k, fan_in, fan_out):
        k_w, k_b = jax.random.split(k)
        bound = 1.0 / jnp.sqrt(fan_in)
        w = jax.random.uniform(k_w, (fan_in, fan_out), jnp.float32, -bound, bound)
        b = jax.random.uniform(k_b, (1, fan_out), jnp.float32, -bound, bound)
        return w, b

    k1, k2, k3 = jax.random.split(key, 3)
    w1, b1 = linear_init(k1, input_dim, hidden)
    w2, b2 = linear_init(k2, hidden, hidden)
    w3, b3 = linear_init(k3, hidden, 1)

    return (
        w1.astype(jnp.bfloat16), b1,
        w2.astype(jnp.bfloat16), b2,
        w3.T.astype(jnp.bfloat16),   # (1, hidden) row
        b3,                          # (1, 1)
    )


def _reference(x, params):
    """Pure-JAX reference mirroring the kernel's bf16-matmul / f32-accum math."""
    w1, b1, w2, b2, w3_row, b3 = params
    input_dim = w1.shape[0]
    xb = x.reshape(-1, input_dim).astype(jnp.bfloat16)
    h1 = jnp.maximum(jnp.dot(xb, w1, preferred_element_type=jnp.float32) + b1, 0.0)
    h2 = jnp.maximum(
        jnp.dot(h1.astype(jnp.bfloat16), w2, preferred_element_type=jnp.float32) + b2,
        0.0,
    )
    return jnp.sum(h2 * w3_row.astype(jnp.float32), axis=-1, keepdims=True) + b3


if __name__ == "__main__":
    input_dim = 32
    key = jax.random.PRNGKey(0)
    k_params, k_x1, k_x2 = jax.random.split(key, 3)

    params = init_params(k_params, input_dim)

    # Small case matching torch's x.view(-1, input_dim): (2, 4, 32) -> (8, 32).
    x_small = jax.random.normal(k_x1, (2, 4, input_dim), dtype=jnp.float32)
    out_small = jax.block_until_ready(baseline_mlp_forward(x_small, params))
    ref_small = _reference(x_small, params)
    assert out_small.shape == (8, 1), out_small.shape
    assert jnp.allclose(out_small, ref_small, atol=1e-2, rtol=1e-2), (
        float(jnp.max(jnp.abs(out_small - ref_small))))

    # Multi-tile case: exercises batch padding, the >=2-tile megacore split and
    # the lane-dense output reassembly.
    x_multi = jax.random.normal(k_x2, (600, input_dim), dtype=jnp.float32)
    out_multi = jax.block_until_ready(baseline_mlp_forward(x_multi, params))
    ref_multi = _reference(x_multi, params)
    assert out_multi.shape == (600, 1), out_multi.shape
    assert jnp.allclose(out_multi, ref_multi, atol=1e-2, rtol=1e-2), (
        float(jnp.max(jnp.abs(out_multi - ref_multi))))

    print("KERNEL_OK")
</pallas_src>

<mosaic_0001>
module attributes {stable_mosaic.version = 11 : i64} {
  func.func @_mlp_kernel(%arg0: i32, %arg1: memref<256x32xbf16, #tpu.memory_space<vmem>>, %arg2: memref<32x512xbf16, #tpu.memory_space<vmem>>, %arg3: memref<1x512xf32, #tpu.memory_space<vmem>>, %arg4: memref<512x512xbf16, #tpu.memory_space<vmem>>, %arg5: memref<1x512xf32, #tpu.memory_space<vmem>>, %arg6: memref<1x512xbf16, #tpu.memory_space<vmem>>, %arg7: memref<1x1xf32, #tpu.memory_space<vmem>>, %arg8: memref<1x1x256xf32, #tpu.memory_space<vmem>>) attributes {dimension_semantics = [#tpu.dimension_semantics<parallel>], iteration_bounds = array<i64: 1>, scalar_prefetch = 0 : i64, scratch_operands = 0 : i64, tpu.core_type = #tpu.core_type<tc>, window_params = [{transform_indices = @transform_0, window_bounds = array<i64: 256, 32>}, {pipeline_mode = #tpu.pipeline_mode<synchronous>, transform_indices = @transform_1, window_bounds = array<i64: 32, 512>}, {pipeline_mode = #tpu.pipeline_mode<synchronous>, transform_indices = @transform_2, window_bounds = array<i64: 1, 512>}, {pipeline_mode = #tpu.pipeline_mode<synchronous>, transform_indices = @transform_3, window_bounds = array<i64: 512, 512>}, {pipeline_mode = #tpu.pipeline_mode<synchronous>, transform_indices = @transform_4, window_bounds = array<i64: 1, 512>}, {pipeline_mode = #tpu.pipeline_mode<synchronous>, transform_indices = @transform_5, window_bounds = array<i64: 1, 512>}, {pipeline_mode = #tpu.pipeline_mode<synchronous>, transform_indices = @transform_6, window_bounds = array<i64: 1, 1>}, {transform_indices = @transform_7, window_bounds = array<i64: 1, 1, 256>}]} {
    %c0 = arith.constant 0 : index
    %c0_0 = arith.constant 0 : index
    %0 = vector.load %arg1[%c0, %c0_0] : memref<256x32xbf16, #tpu.memory_space<vmem>>, vector<256x32xbf16>
    %c0_1 = arith.constant 0 : index
    %c0_2 = arith.constant 0 : index
    %1 = vector.load %arg2[%c0_1, %c0_2] : memref<32x512xbf16, #tpu.memory_space<vmem>>, vector<32x512xbf16>
    %cst = arith.constant dense<0.000000e+00> : vector<256x512xf32>
    %2 = tpu.matmul %0, %1, %cst {dimension_numbers = #tpu.dot_dimension_numbers<[1], [0], [0], [1], [0, 0, 1, 1], [], []>} : vector<256x32xbf16>, vector<32x512xbf16>, vector<256x512xf32> -> vector<256x512xf32>
    %c0_3 = arith.constant 0 : index
    %c0_4 = arith.constant 0 : index
    %3 = vector.load %arg3[%c0_3, %c0_4] : memref<1x512xf32, #tpu.memory_space<vmem>>, vector<1x512xf32>
    %4 = vector.broadcast %3 : vector<1x512xf32> to vector<256x512xf32>
    %5 = arith.addf %2, %4 : vector<256x512xf32>
    %cst_5 = arith.constant 0.000000e+00 : f32
    %6 = vector.broadcast %cst_5 : f32 to vector<256x512xf32>
    %7 = arith.maximumf %5, %6 : vector<256x512xf32>
    %8 = arith.truncf %7 : vector<256x512xf32> to vector<256x512xbf16>
    %c0_6 = arith.constant 0 : index
    %c0_7 = arith.constant 0 : index
    %9 = vector.load %arg4[%c0_6, %c0_7] : memref<512x512xbf16, #tpu.memory_space<vmem>>, vector<512x512xbf16>
    %cst_8 = arith.constant dense<0.000000e+00> : vector<256x512xf32>
    %10 = tpu.matmul %8, %9, %cst_8 {dimension_numbers = #tpu.dot_dimension_numbers<[1], [0], [0], [1], [0, 0, 1, 1], [], []>} : vector<256x512xbf16>, vector<512x512xbf16>, vector<256x512xf32> -> vector<256x512xf32>
    %c0_9 = arith.constant 0 : index
    %c0_10 = arith.constant 0 : index
    %11 = vector.load %arg5[%c0_9, %c0_10] : memref<1x512xf32, #tpu.memory_space<vmem>>, vector<1x512xf32>
    %12 = vector.broadcast %11 : vector<1x512xf32> to vector<256x512xf32>
    %13 = arith.addf %10, %12 : vector<256x512xf32>
    %cst_11 = arith.constant 0.000000e+00 : f32
    %14 = vector.broadcast %cst_11 : f32 to vector<256x512xf32>
    %15 = arith.maximumf %13, %14 : vector<256x512xf32>
    %c0_12 = arith.constant 0 : index
    %c0_13 = arith.constant 0 : index
    %16 = vector.load %arg6[%c0_12, %c0_13] : memref<1x512xbf16, #tpu.memory_space<vmem>>, vector<1x512xbf16>
    %17 = arith.extf %16 : vector<1x512xbf16> to vector<1x512xf32>
    %18 = vector.broadcast %17 : vector<1x512xf32> to vector<256x512xf32>
    %19 = arith.mulf %15, %18 : vector<256x512xf32>
    %cst_14 = arith.constant dense<0.000000e+00> : vector<256xf32>
    %20 = vector.multi_reduction <add>, %19, %cst_14 [1] : vector<256x512xf32> to vector<256xf32>
    %21 = vector.shape_cast %20 : vector<256xf32> to vector<256x1xf32>
    %c0_15 = arith.constant 0 : index
    %c0_16 = arith.constant 0 : index
    %22 = vector.load %arg7[%c0_15, %c0_16] : memref<1x1xf32, #tpu.memory_space<vmem>>, vector<1x1xf32>
    %23 = vector.broadcast %22 : vector<1x1xf32> to vector<256x1xf32>
    %24 = arith.addf %21, %23 : vector<256x1xf32>
    %25 = vector.shape_cast %24 : vector<256x1xf32> to vector<1x1x256xf32>
    %c0_17 = arith.constant 0 : index
    %c0_18 = arith.constant 0 : index
    %c0_19 = arith.constant 0 : index
    %26 = vector.load %arg8[%c0_17, %c0_18, %c0_19] : memref<1x1x256xf32, #tpu.memory_space<vmem>>, vector<1x1x256xf32>
    tpu.vector_store %arg8[%c0_17, %c0_18, %c0_19], %25 {strides = array<i32>} : memref<1x1x256xf32, #tpu.memory_space<vmem>>, vector<1x1x256xf32>,
    return
  }
  func.func @transform_0(%arg0: i32) -> (i32, i32) {
    %c0_i32 = arith.constant 0 : i32
    %c0_i32_0 = arith.constant 0 : i32
    return %arg0, %c0_i32 : i32, i32
  }
  func.func @transform_1(%arg0: i32) -> (i32, i32) {
    %c0_i32 = arith.constant 0 : i32
    %c0_i32_0 = arith.constant 0 : i32
    %c0_i32_1 = arith.constant 0 : i32
    return %c0_i32, %c0_i32_0 : i32, i32
  }
  func.func @transform_2(%arg0: i32) -> (i32, i32) {
    %c0_i32 = arith.constant 0 : i32
    %c0_i32_0 = arith.constant 0 : i32
    %c0_i32_1 = arith.constant 0 : i32
    return %c0_i32, %c0_i32_0 : i32, i32
  }
  func.func @transform_3(%arg0: i32) -> (i32, i32) {
    %c0_i32 = arith.constant 0 : i32
    %c0_i32_0 = arith.constant 0 : i32
    %c0_i32_1 = arith.constant 0 : i32
    return %c0_i32, %c0_i32_0 : i32, i32
  }
  func.func @transform_4(%arg0: i32) -> (i32, i32) {
    %c0_i32 = arith.constant 0 : i32
    %c0_i32_0 = arith.constant 0 : i32
    %c0_i32_1 = arith.constant 0 : i32
    return %c0_i32, %c0_i32_0 : i32, i32
  }
  func.func @transform_5(%arg0: i32) -> (i32, i32) {
    %c0_i32 = arith.constant 0 : i32
    %c0_i32_0 = arith.constant 0 : i32
    %c0_i32_1 = arith.constant 0 : i32
    return %c0_i32, %c0_i32_0 : i32, i32
  }
  func.func @transform_6(%arg0: i32) -> (i32, i32) {
    %c0_i32 = arith.constant 0 : i32
    %c0_i32_0 = arith.constant 0 : i32
    %c0_i32_1 = arith.constant 0 : i32
    return %c0_i32, %c0_i32_0 : i32, i32
  }
  func.func @transform_7(%arg0: i32) -> (i32, i32, i32) {
    %c0_i32 = arith.constant 0 : i32
    %c0_i32_0 = arith.constant 0 : i32
    %c0_i32_1 = arith.constant 0 : i32
    return %arg0, %c0_i32, %c0_i32_0 : i32, i32, i32
  }
}

</mosaic_0001>

<bundles_post_ra>
// kernel: tpu_custom_call.1
= control target key start
LH: loop header
LB: loop body
LE: loop exit
PB: predicated region body
PF: predicated region fallthrough
CT: control target
= control target key end

     0   :  { %s9008_s0 = inlined_call_operand.vmem [shape: bf16[256,32], index: 0, kind: input, shape index: {}]   ;;  %s9009_s1 = inlined_call_operand.vmem [shape: bf16[32,512], index: 1, kind: input, shape index: {}]   ;;  %s9010_s2 = inlined_call_operand.vmem [shape: f32[1,512], index: 2, kind: input, shape index: {}]   ;;  %s9011_s3 = inlined_call_operand.hbm [shape: bf16[512,512], index: 3, kind: input, shape index: {}]   ;;  %s9012_s4 = inlined_call_operand.vmem [shape: f32[1,512], index: 4, kind: input, shape index: {}]   ;;  %s9013_s5 = inlined_call_operand.vmem [shape: bf16[1,512], index: 5, kind: input, shape index: {}]   ;;  %s9014_s6 = inlined_call_operand.<no memory space> [shape: f32[1,1], index: 6, kind: input, shape index: {}]   ;;  %s9015_s7 = inlined_call_operand.hbm [shape: f32[1,1,256], index: 7, kind: output, shape index: {}]  }
   0x1   :  { %v12_v0 = vstv %s9014_s6 }
   0x2   :  { %13 = vst [vmem:[#allocation2] sm:$0x1] %v12_v0 }
   0x3   :  { %14 = vsyncpa [#allocation4], 0 }
   0x4   :  { %15 = vsyncpa [#allocation5], 0  ;;  %s7181_s26 = smov [#allocation3]   ;;  %s7133_s30 = scalar_lea.hbm %s9011_s3, 16384 }
   0x5   :  { %s27_s27 = sshll.u32 %s7181_s26, 4  ;;  %p7134_p0 = scmp.ne.s32.totalorder %s9011_s3, %s7133_s30  ;;  %s28_s27 = int_to_ptr.vmem [resolvable:$true] %s27_s27 }
   0x6   :  { %p7137_p1 = scmp.lt.u32.totalorder %s7133_s30, %s9011_s3 }
   0x8   :  { %p7139_p2 = pnand %p7137_p1, %p7134_p0 }
   0xa   :  { %7142 = shalt.err (!%p7139_p2)
}
   0xb   :  { %s7143_s6 = scalar_lea.vmem %s28_s27, 16384  ;;  %p7148_p4 = scmp.lt.s32.totalorder %s28_s27, %s28_s27 }
   0xc   :  { %p7144_p3 = scmp.ne.s32.totalorder %s28_s27, %s7143_s6  ;;  %p7149_p5 = scmp.lt.s32.totalorder %s7143_s6, %s7143_s6 }
   0xe   :  { %p7150_p6 = por %p7149_p5, %p7148_p4 }
  0x10   :  { %p7151_p7 = pnand %p7150_p6, %p7144_p3 }
  0x12   :  { %7154 = shalt.err (!%p7151_p7)
}
  0x13   :  { %s7182_s12 = smov 256   ;;  %s7183_s13 = smov 16  }
  0x14   :  { %33 = dma.hbm_to_vmem [thread:$0]  %s9011_s3, 16384, %s28_s27, [#allocation4], %s7182_s12, %s7182_s12, %s7183_s13  }
  0x15   :  { %7177 = dma.done.wait [#allocation4], 16384  }
  0x16   :  { %7178 = vsyncadd [#allocation4], 4294950912  ;;  %v7184_v1 = vmov 0   ;;  %v6912_v2 = vld [vmem:[%s9009_s1 + $0x4] ss:$16 sps:$4 sm:$0xff]   ;;  %vm226_vm0 = vcmask 261120  }
  0x17   :  { %307 = vmatprep.mubr.bf16.mxu0 %v7184_v1  ;;  %500 = vmatprep.mubr.bf16.mxu1 %v7184_v1  ;;  %v6914_v3 = vld [vmem:[%s9009_s1] ss:$16 sps:$4 sm:$0xff]   ;;  %v6915_v4 = vld [vmem:[%s9009_s1 + $0x24] ss:$16 sps:$4 sm:$0xff]   ;;  %v6919_v7 = vld [vmem:[%s9008_s0 + $0x8] sm:$0xff]   ;;  %vm6184_vm1 = vcmask 130112  }
  0x18   :  { %6910 = vset.pattern.permute.xlu0 %v7184_v1  ;;  %6911 = vset.pattern.permute.xlu1 %v7184_v1  ;;  %v6917_v5 = vld [vmem:[%s9009_s1 + $0x20] ss:$16 sps:$4 sm:$0xff]   ;;  %v6929_v8 = vld [vmem:[%s9009_s1 + $0xc] ss:$16 sps:$4 sm:$0xff]   ;;  %v6931_v9 = vld [vmem:[%s9009_s1 + $0x8] ss:$16 sps:$4 sm:$0xff]  }
  0x19   :  { %275 = vmatprep.subr.bf16.mxu0 %v6912_v2  ;;  %v6918_v6 = vld [vmem:[%s9008_s0] sm:$0xff]   ;;  %468 = vmatprep.subr.bf16.mxu1 %v6929_v8  ;;  %v6933_v10 = vld [vmem:[%s9009_s1 + $0x2c] ss:$16 sps:$4 sm:$0xff]   ;;  %v6935_v11 = vld [vmem:[%s9009_s1 + $0x28] ss:$16 sps:$4 sm:$0xff]   ;;  %vm6191_vm2 = vcmask 195712  }
  0x1a   :  { %276 = vmatpush1.bf16.msra.mxu0 %v6914_v3  ;;  %469 = vmatpush1.bf16.msra.mxu1 %v6931_v9  ;;  %v6936_v12 = vld [vmem:[#allocation3] ss:$16 sps:$4 sm:$0xff]   ;;  %v6938_v13 = vld [vmem:[#allocation3 + $0x4] ss:$16 sps:$4 sm:$0xff]   ;;  %v6942_v15 = vld [vmem:[#allocation3 + $0xc] ss:$16 sps:$4 sm:$0xff]  }
  0x1b   :  { %277 = vmatprep.subr.bf16.mxu0 %v6915_v4  ;;  %470 = vmatprep.subr.bf16.mxu1 %v6933_v10  ;;  %v6920_v14 = vld [vmem:[%s9008_s0 + $0x10] sm:$0xff]   ;;  %v6940_v16 = vld [vmem:[#allocation3 + $0x8] ss:$16 sps:$4 sm:$0xff]   ;;  %v6922_v35 = vld [vmem:[%s9008_s0 + $0x20] sm:$0xff]   ;;  %vm6198_vm3 = vcmask 261312   ;;  %vm6205_vm4 = vcmask 326912  }
  0x1c   :  { %v6945_v17 = vld [vmem:[#allocation3 + $0x24] ss:$16 sps:$4 sm:$0xff]   ;;  %v6943_v18 = vld [vmem:[#allocation3 + $0x20] ss:$16 sps:$4 sm:$0xff]   ;;  %v6949_v19 = vld [vmem:[#allocation3 + $0x2c] ss:$16 sps:$4 sm:$0xff]  }
  0x1d   :  { %v6947_v20 = vld [vmem:[#allocation3 + $0x28] ss:$16 sps:$4 sm:$0xff]   ;;  %v6952_v21 = vld [vmem:[#allocation3 + $0x44] ss:$16 sps:$4 sm:$0xff]   ;;  %v6950_v22 = vld [vmem:[#allocation3 + $0x40] ss:$16 sps:$4 sm:$0xff]  }
  0x1e   :  { %278 = vmatpush1.bf16.msra.mxu0 %v6917_v5  ;;  %471 = vmatpush1.bf16.msra.mxu1 %v6935_v11  ;;  %v6956_v23 = vld [vmem:[#allocation3 + $0x4c] ss:$16 sps:$4 sm:$0xff]   ;;  %v6954_v24 = vld [vmem:[#allocation3 + $0x48] ss:$16 sps:$4 sm:$0xff]   ;;  %v6959_v25 = vld [vmem:[#allocation3 + $0x64] ss:$16 sps:$4 sm:$0xff]  }
  0x1f   :  { %1643 = vmatprep.subr.bf16.mxu0 %v6938_v13  ;;  %2029 = vmatprep.subr.bf16.mxu1 %v6942_v15  ;;  %v6921_v26 = vld [vmem:[%s9008_s0 + $0x18] sm:$0xff]   ;;  %v6957_v27 = vld [vmem:[#allocation3 + $0x60] ss:$16 sps:$4 sm:$0xff]   ;;  %v6923_v44 = vld [vmem:[%s9008_s0 + $0x28] sm:$0xff]   ;;  %vm6212_vm5 = vcmask 392512   ;;  %vm6219_vm6 = vcmask 458112  }
  0x20   :  { %v6963_v28 = vld [vmem:[#allocation3 + $0x6c] ss:$16 sps:$4 sm:$0xff]   ;;  %v6961_v29 = vld [vmem:[#allocation3 + $0x68] ss:$16 sps:$4 sm:$0xff]   ;;  %v6966_v30 = vld [vmem:[#allocation3 + $0x84] ss:$16 sps:$4 sm:$0xff]  }
  0x21   :  { %6423 = vmatmul.mubr.msk.bf16.vlgmr.msra.gmra.mrb[0].mxu0 %vm226_vm0, %v6918_v6  ;;  %6439 = vmatmul.mubr.msk.bf16.vlgmr.msra.gmra.mrb[0].mxu1 %vm226_vm0, %v6918_v6  ;;  %v6969_v31 = vld [vmem:[#allocation3 + $0x8c] ss:$16 sps:$4 sm:$0xff]   ;;  %v6964_v32 = vld [vmem:[#allocation3 + $0x80] ss:$16 sps:$4 sm:$0xff]   ;;  %v6972_v33 = vld [vmem:[#allocation3 + $0xa4] ss:$16 sps:$4 sm:$0xff]  }
  0x22   :  { %317 = vmatprep.mubr.bf16.mxu0 %v7184_v1  ;;  %1644 = vmatpush1.bf16.msra.mxu0 %v6936_v12  ;;  %v6967_v34 = vld [vmem:[#allocation3 + $0x88] ss:$16 sps:$4 sm:$0xff]   ;;  %v6975_v36 = vld [vmem:[#allocation3 + $0xac] ss:$16 sps:$4 sm:$0xff]   ;;  %v6970_v37 = vld [vmem:[#allocation3 + $0xa0] ss:$16 sps:$4 sm:$0xff]  }
  0x23   :  { %1645 = vmatprep.subr.bf16.mxu0 %v6945_v17  ;;  %2030 = vmatpush1.bf16.msra.mxu1 %v6940_v16  ;;  %v6978_v38 = vld [vmem:[#allocation3 + $0xc4] ss:$16 sps:$4 sm:$0xff]   ;;  %v6973_v39 = vld [vmem:[#allocation3 + $0xa8] ss:$16 sps:$4 sm:$0xff]   ;;  %v6981_v40 = vld [vmem:[#allocation3 + $0xcc] ss:$16 sps:$4 sm:$0xff]  }
  0x24   :  { %510 = vmatprep.mubr.bf16.mxu1 %v7184_v1  ;;  %2031 = vmatprep.subr.bf16.mxu1 %v6949_v19  ;;  %v6976_v41 = vld [vmem:[#allocation3 + $0xc0] ss:$16 sps:$4 sm:$0xff]   ;;  %v6984_v42 = vld [vmem:[#allocation3 + $0xe4] ss:$16 sps:$4 sm:$0xff]   ;;  %v6979_v43 = vld [vmem:[#allocation3 + $0xc8] ss:$16 sps:$4 sm:$0xff]  }
  0x25   :  { %v6987_v45 = vld [vmem:[#allocation3 + $0xec] ss:$16 sps:$4 sm:$0xff]   ;;  %v6982_v46 = vld [vmem:[#allocation3 + $0xe0] ss:$16 sps:$4 sm:$0xff]   ;;  %v6990_v47 = vld [vmem:[#allocation3 + $0x104] ss:$16 sps:$4 sm:$0xff]  }
  0x26   :  { %1646 = vmatpush1.bf16.msra.mxu0 %v6943_v18  ;;  %v6985_v48 = vld [vmem:[#allocation3 + $0xe8] ss:$16 sps:$4 sm:$0xff]   ;;  %v6993_v49 = vld [vmem:[#allocation3 + $0x10c] ss:$16 sps:$4 sm:$0xff]   ;;  %v6988_v50 = vld [vmem:[#allocation3 + $0x100] ss:$16 sps:$4 sm:$0xff]  }
  0x27   :  { %1647 = vmatprep.subr.bf16.mxu0 %v6952_v21  ;;  %2032 = vmatpush1.bf16.msra.mxu1 %v6947_v20  ;;  %v6996_v51 = vld [vmem:[#allocation3 + $0x124] ss:$16 sps:$4 sm:$0xff]   ;;  %v6991_v52 = vld [vmem:[#allocation3 + $0x108] ss:$16 sps:$4 sm:$0xff]   ;;  %v6999_v54 = vld [vmem:[#allocation3 + $0x12c] ss:$16 sps:$4 sm:$0xff]  }
  0x28   :  { %2033 = vmatprep.subr.bf16.mxu1 %v6956_v23  ;;  %v6924_v53 = vld [vmem:[%s9008_s0 + $0x30] sm:$0xff]   ;;  %v6997_v57 = vld [vmem:[#allocation3 + $0x128] ss:$16 sps:$4 sm:$0xff]   ;;  %v6926_v8 = vld [vmem:[%s9008_s0 + $0x40] sm:$0xff]   ;;  %vm6226_vm7 = vcmask 523712   ;;  %vm6233_vm8 = vcmask 589312  }
  0x29   :  { %6424 = vmatmul.mubr.msk.bf16.gmra.mrb[4].mxu0 %vm226_vm0, %v6919_v7  ;;  %6440 = vmatmul.mubr.msk.bf16.gmra.mrb[4].mxu1 %vm226_vm0, %v6919_v7  ;;  %v6994_v55 = vld [vmem:[#allocation3 + $0x120] ss:$16 sps:$4 sm:$0xff]   ;;  %v7002_v56 = vld [vmem:[#allocation3 + $0x144] ss:$16 sps:$4 sm:$0xff]   ;;  %v7005_v58 = vld [vmem:[#allocation3 + $0x14c] ss:$16 sps:$4 sm:$0xff]  }
  0x2a   :  { %327 = vmatprep.mubr.bf16.mxu0 %v7184_v1  ;;  %1648 = vmatpush1.bf16.msra.mxu0 %v6950_v22  ;;  %v7000_v59 = vld [vmem:[#allocation3 + $0x140] ss:$16 sps:$4 sm:$0xff]   ;;  %v7003_v60 = vld [vmem:[#allocation3 + $0x148] ss:$16 sps:$4 sm:$0xff]   ;;  %v7008_v62 = vld [vmem:[#allocation3 + $0x164] ss:$16 sps:$4 sm:$0xff]  }
  0x2b   :  { %1649 = vmatprep.subr.bf16.mxu0 %v6959_v25  ;;  %520 = vmatprep.mubr.bf16.mxu1 %v7184_v1  ;;  %v6925_v61 = vld [vmem:[%s9008_s0 + $0x38] sm:$0xff]   ;;  %v7006_v63 = vld [vmem:[#allocation3 + $0x160] ss:$16 sps:$4 sm:$0xff]   ;;  %v6927_v16 = vld [vmem:[%s9008_s0 + $0x48] sm:$0xff]   ;;  %vm6240_vm9 = vcmask 654912   ;;  %vm6247_vm10 = vcmask 720512  }
  0x2c   :  { %2034 = vmatpush1.bf16.msra.mxu1 %v6954_v24  ;;  %v7011_v0 = vld [vmem:[#allocation3 + $0x16c] ss:$16 sps:$4 sm:$0xff]   ;;  %v7014_v2 = vld [vmem:[#allocation3 + $0x184] ss:$16 sps:$4 sm:$0xff]   ;;  %v7009_v3 = vld [vmem:[#allocation3 + $0x168] ss:$16 sps:$4 sm:$0xff]  }
  0x2d   :  { %2035 = vmatprep.subr.bf16.mxu1 %v6963_v28  ;;  %v7017_v4 = vld [vmem:[#allocation3 + $0x18c] ss:$16 sps:$4 sm:$0xff]   ;;  %v7012_v5 = vld [vmem:[#allocation3 + $0x180] ss:$16 sps:$4 sm:$0xff]   ;;  %v7020_v6 = vld [vmem:[#allocation3 + $0x1a4] ss:$16 sps:$4 sm:$0xff]  }
  0x2e   :  { %1650 = vmatpush1.bf16.msra.mxu0 %v6957_v27  ;;  %v7015_v7 = vld [vmem:[#allocation3 + $0x188] ss:$16 sps:$4 sm:$0xff]   ;;  %v7023_v9 = vld [vmem:[#allocation3 + $0x1ac] ss:$16 sps:$4 sm:$0xff]   ;;  %v7018_v10 = vld [vmem:[#allocation3 + $0x1a0] ss:$16 sps:$4 sm:$0xff]  }
  0x2f   :  { %1651 = vmatprep.subr.bf16.mxu0 %v6966_v30  ;;  %v7026_v11 = vld [vmem:[#allocation3 + $0x1c4] ss:$16 sps:$4 sm:$0xff]   ;;  %v7021_v12 = vld [vmem:[#allocation3 + $0x1a8] ss:$16 sps:$4 sm:$0xff]   ;;  %v7029_v13 = vld [vmem:[#allocation3 + $0x1cc] ss:$16 sps:$4 sm:$0xff]  }
  0x30   :  { %2036 = vmatpush1.bf16.msra.mxu1 %v6961_v29  ;;  %v7027_v15 = vld [vmem:[#allocation3 + $0x1c8] ss:$16 sps:$4 sm:$0xff]   ;;  %v6928_v17 = vld [vmem:[%s9008_s0 + $0x50] sm:$0xff]   ;;  %v6939_v23 = vld [vmem:[%s9008_s0 + $0x60] sm:$0xff]   ;;  %v86_v29 = vlaneseq  ;;  %vm6254_vm11 = vcmask 786112   ;;  %vm6261_vm12 = vcmask 851712  }
  0x31   :  { %6425 = vmatmul.mubr.msk.bf16.gmra.mrb[8].mxu0 %vm226_vm0, %v6920_v14  ;;  %2037 = vmatprep.subr.bf16.mxu1 %v6969_v31  ;;  %v6932_v18 = vld [vmem:[%s9008_s0 + $0x58] sm:$0xff]   ;;  %v7030_v21 = vld [vmem:[#allocation3 + $0x1e0] ss:$16 sps:$4 sm:$0xff]   ;;  %vm6268_vm13 = vcmask 917312   ;;  %vm6275_vm14 = vcmask 982912   ;;  %vm6282_vm15 = vcmask 1048512  }
  0x32   :  { %337 = vmatprep.mubr.bf16.mxu0 %v7184_v1  ;;  %1652 = vmatpush1.bf16.msra.mxu0 %v6964_v32  ;;  %v7032_v19 = vld [vmem:[#allocation3 + $0x1e4] ss:$16 sps:$4 sm:$0xff]   ;;  %v7035_v20 = vld [vmem:[#allocation3 + $0x1ec] ss:$16 sps:$4 sm:$0xff]   ;;  %v7033_v22 = vld [vmem:[#allocation3 + $0x1e8] ss:$16 sps:$4 sm:$0xff]  }
  0x33   :  { %6441 = vmatmul.mubr.msk.bf16.gmra.mrb[8].mxu1 %vm226_vm0, %v6920_v14  ;;  %1653 = vmatprep.subr.bf16.mxu0 %v6972_v33  ;;  %v7024_v14 = vld [vmem:[#allocation3 + $0x1c0] ss:$16 sps:$4 sm:$0xff]   ;;  %v7038_v24 = vld [vmem:[#allocation3 + $0x204] ss:$16 sps:$4 sm:$0xff]   ;;  %v7041_v25 = vld [vmem:[#allocation3 + $0x20c] ss:$16 sps:$4 sm:$0xff]  }
  0x34   :  { %530 = vmatprep.mubr.bf16.mxu1 %v7184_v1  ;;  %2038 = vmatpush1.bf16.msra.mxu1 %v6967_v34  ;;  %v6953_v27 = vld [vmem:[%s9008_s0 + $0x70] sm:$0xff]   ;;  %v6960_v28 = vld [vmem:[%s9008_s0 + $0x78] sm:$0xff]   ;;  %v7381_v30 = vshrl.u32 %v86_v29, 7  ;;  %v84_v32 = vld [vmem:[%s9010_s2] sm:$0xf] }
  0x35   :  { %2039 = vmatprep.subr.bf16.mxu1 %v6975_v36 }
  0x36   :  { %1654 = vmatpush1.bf16.msra.mxu0 %v6970_v37  ;;  %v7384_v31 = vsub.s32 0, %v7381_v30  ;;  %v92_v33 = vsub.s32 1, %v7381_v30 }
  0x37   :  { %1655 = vmatprep.subr.bf16.mxu0 %v6978_v38 }
  0x38   :  { %2040 = vmatpush1.bf16.msra.mxu1 %v6973_v39  ;;  %v7391_v34 = vrot.slane %v84_v32, %v7384_v31 }
  0x39   :  { %6426 = vmatmul.mubr.msk.bf16.gmra.mrb[12].mxu0 %vm226_vm0, %v6921_v26  ;;  %2041 = vmatprep.subr.bf16.mxu1 %v6981_v40 }
  0x3a   :  { %347 = vmatprep.mubr.bf16.mxu0 %v7184_v1  ;;  %1656 = vmatpush1.bf16.msra.mxu0 %v6976_v41 }
  0x3b   :  { %6442 = vmatmul.mubr.msk.bf16.gmra.mrb[12].mxu1 %vm226_vm0, %v6921_v26  ;;  %1657 = vmatprep.subr.bf16.mxu0 %v6984_v42  ;;  %v6946_v26 = vld [vmem:[%s9008_s0 + $0x68] sm:$0xff]  }
  0x3c   :  { %540 = vmatprep.mubr.bf16.mxu1 %v7184_v1  ;;  %2042 = vmatpush1.bf16.msra.mxu1 %v6979_v43 }
  0x3d   :  { %2043 = vmatprep.subr.bf16.mxu1 %v6987_v45 }
  0x3e   :  { %1658 = vmatpush1.bf16.msra.mxu0 %v6982_v46 }
  0x3f   :  { %1659 = vmatprep.subr.bf16.mxu0 %v6990_v47 }
  0x40   :  { %2044 = vmatpush1.bf16.msra.mxu1 %v6985_v48  ;;  %v7402_v48 = vsub.s32 2, %v7381_v30 }
  0x41   :  { %6427 = vmatmul.mubr.msk.bf16.gmra.mrb[16].mxu0 %vm226_vm0, %v6922_v35  ;;  %2045 = vmatprep.subr.bf16.mxu1 %v6993_v49 }
  0x42   :  { %357 = vmatprep.mubr.bf16.mxu0 %v7184_v1  ;;  %1660 = vmatpush1.bf16.msra.mxu0 %v6988_v50 }
  0x43   :  { %6443 = vmatmul.mubr.msk.bf16.gmra.mrb[16].mxu1 %vm226_vm0, %v6922_v35  ;;  %1661 = vmatprep.subr.bf16.mxu0 %v6996_v51  ;;  %v7036_v51 = vld [vmem:[#allocation3 + $0x200] ss:$16 sps:$4 sm:$0xff]  }
  0x44   :  { %550 = vmatprep.mubr.bf16.mxu1 %v7184_v1  ;;  %2046 = vmatpush1.bf16.msra.mxu1 %v6991_v52  ;;  %v7039_v52 = vld [vmem:[#allocation3 + $0x208] ss:$16 sps:$4 sm:$0xff]  }
  0x45   :  { %2047 = vmatprep.subr.bf16.mxu1 %v6999_v54 }
  0x46   :  { %1662 = vmatpush1.bf16.msra.mxu0 %v6994_v55 }
  0x47   :  { %1663 = vmatprep.subr.bf16.mxu0 %v7002_v56  ;;  %v7044_v56 = vld [vmem:[#allocation3 + $0x224] ss:$16 sps:$4 sm:$0xff]  }
  0x48   :  { %2048 = vmatpush1.bf16.msra.mxu1 %v6997_v57  ;;  %v7047_v57 = vld [vmem:[#allocation3 + $0x22c] ss:$16 sps:$4 sm:$0xff]  }
  0x49   :  { %6428 = vmatmul.mubr.msk.bf16.gmra.mrb[20].mxu0 %vm226_vm0, %v6923_v44  ;;  %2049 = vmatprep.subr.bf16.mxu1 %v7005_v58 }
  0x4a   :  { %367 = vmatprep.mubr.bf16.mxu0 %v7184_v1  ;;  %1664 = vmatpush1.bf16.msra.mxu0 %v7000_v59 }
  0x4b   :  { %6444 = vmatmul.mubr.msk.bf16.gmra.mrb[20].mxu1 %vm226_vm0, %v6923_v44  ;;  %1665 = vmatprep.subr.bf16.mxu0 %v7008_v62  ;;  %v7409_v62 = vrot.slane %v84_v32, %v7402_v48 }
  0x4c   :  { %560 = vmatprep.mubr.bf16.mxu1 %v7184_v1  ;;  %2050 = vmatpush1.bf16.msra.mxu1 %v7003_v60 }
  0x4d   :  { %2051 = vmatprep.subr.bf16.mxu1 %v7011_v0  ;;  %v7042_v0 = vld [vmem:[#allocation3 + $0x220] ss:$16 sps:$4 sm:$0xff]  }
  0x4e   :  { %1666 = vmatpush1.bf16.msra.mxu0 %v7006_v63 }
  0x4f   :  { %1667 = vmatprep.subr.bf16.mxu0 %v7014_v2  ;;  %v7045_v2 = vld [vmem:[#allocation3 + $0x228] ss:$16 sps:$4 sm:$0xff]  }
  0x50   :  { %2052 = vmatpush1.bf16.msra.mxu1 %v7009_v3 }
  0x51   :  { %6429 = vmatmul.mubr.msk.bf16.gmra.mrb[24].mxu0 %vm226_vm0, %v6924_v53  ;;  %2053 = vmatprep.subr.bf16.mxu1 %v7017_v4 }
  0x52   :  { %377 = vmatprep.mubr.bf16.mxu0 %v7184_v1  ;;  %1668 = vmatpush1.bf16.msra.mxu0 %v7012_v5 }
  0x53   :  { %6445 = vmatmul.mubr.msk.bf16.gmra.mrb[24].mxu1 %vm226_vm0, %v6924_v53  ;;  %1669 = vmatprep.subr.bf16.mxu0 %v7020_v6  ;;  %v100_v53 = vsub.s32 3, %v7381_v30  ;;  %v7050_v6 = vld [vmem:[#allocation3 + $0x244] ss:$16 sps:$4 sm:$0xff]  }
  0x54   :  { %570 = vmatprep.mubr.bf16.mxu1 %v7184_v1  ;;  %2054 = vmatpush1.bf16.msra.mxu1 %v7015_v7  ;;  %v7053_v7 = vld [vmem:[#allocation3 + $0x24c] ss:$16 sps:$4 sm:$0xff]  }
  0x55   :  { %2055 = vmatprep.subr.bf16.mxu1 %v7023_v9  ;;  %v7414_v3 = vrot.slane %v84_v32, %v100_v53 }
  0x56   :  { %1670 = vmatpush1.bf16.msra.mxu0 %v7018_v10 }
  0x57   :  { %1671 = vmatprep.subr.bf16.mxu0 %v7026_v11 }
  0x58   :  { %2056 = vmatpush1.bf16.msra.mxu1 %v7021_v12  ;;  %v7048_v12 = vld [vmem:[#allocation3 + $0x240] ss:$16 sps:$4 sm:$0xff]  }
  0x59   :  { %6430 = vmatmul.mubr.msk.bf16.gmra.mrb[28].mxu0 %vm226_vm0, %v6925_v61  ;;  %2057 = vmatprep.subr.bf16.mxu1 %v7029_v13 }
  0x5a   :  { %387 = vmatprep.mubr.bf16.mxu0 %v7184_v1  ;;  %1672 = vmatpush1.bf16.msra.mxu0 %v7024_v14 }
  0x5b   :  { %6446 = vmatmul.mubr.msk.bf16.gmra.mrb[28].mxu1 %vm226_vm0, %v6925_v61  ;;  %1673 = vmatprep.subr.bf16.mxu0 %v7032_v19 }
  0x5c   :  { %580 = vmatprep.mubr.bf16.mxu1 %v7184_v1  ;;  %2058 = vmatpush1.bf16.msra.mxu1 %v7027_v15 }
  0x5d   :  { %2059 = vmatprep.subr.bf16.mxu1 %v7035_v20 }
  0x5e   :  { %1674 = vmatpush1.bf16.msra.mxu0 %v7030_v21 }
  0x5f   :  { %1836 = vmatprep.subr.bf16.mxu0 %v7038_v24 }
  0x60   :  { %2060 = vmatpush1.bf16.msra.mxu1 %v7033_v22 }
  0x61   :  { %6431 = vmatmul.mubr.msk.bf16.gmra.mrb[32].mxu0 %vm226_vm0, %v6926_v8  ;;  %2222 = vmatprep.subr.bf16.mxu1 %v7041_v25 }
  0x62   :  { %397 = vmatprep.mubr.bf16.mxu0 %v7184_v1 }
  0x63   :  { %6447 = vmatmul.mubr.msk.bf16.gmra.mrb[32].mxu1 %vm226_vm0, %v6926_v8 }
  0x64   :  { %590 = vmatprep.mubr.bf16.mxu1 %v7184_v1 }
  0x69   :  { %6432 = vmatmul.mubr.msk.bf16.gmra.mrb[36].mxu0 %vm226_vm0, %v6927_v16 }
  0x6a   :  { %407 = vmatprep.mubr.bf16.mxu0 %v7184_v1 }
  0x6b   :  { %6448 = vmatmul.mubr.msk.bf16.gmra.mrb[36].mxu1 %vm226_vm0, %v6927_v16 }
  0x6c   :  { %600 = vmatprep.mubr.bf16.mxu1 %v7184_v1 }
  0x71   :  { %6433 = vmatmul.mubr.msk.bf16.gmra.mrb[40].mxu0 %vm226_vm0, %v6928_v17 }
  0x72   :  { %417 = vmatprep.mubr.bf16.mxu0 %v7184_v1 }
  0x73   :  { %6449 = vmatmul.mubr.msk.bf16.gmra.mrb[40].mxu1 %vm226_vm0, %v6928_v17  ;;  %v7051_v17 = vld [vmem:[#allocation3 + $0x248] ss:$16 sps:$4 sm:$0xff]  }
  0x74   :  { %610 = vmatprep.mubr.bf16.mxu1 %v7184_v1 }
  0x79   :  { %6434 = vmatmul.mubr.msk.bf16.gmra.mrb[44].mxu0 %vm226_vm0, %v6932_v18 }
  0x7a   :  { %427 = vmatprep.mubr.bf16.mxu0 %v7184_v1 }
  0x7b   :  { %6450 = vmatmul.mubr.msk.bf16.gmra.mrb[44].mxu1 %vm226_vm0, %v6932_v18  ;;  %v7056_v18 = vld [vmem:[#allocation3 + $0x264] ss:$16 sps:$4 sm:$0xff]  }
  0x7c   :  { %620 = vmatprep.mubr.bf16.mxu1 %v7184_v1 }
  0x81   :  { %6435 = vmatmul.mubr.msk.bf16.gmra.mrb[48].mxu0 %vm226_vm0, %v6939_v23 }
  0x82   :  { %437 = vmatprep.mubr.bf16.mxu0 %v7184_v1 }
  0x83   :  { %6451 = vmatmul.mubr.msk.bf16.gmra.mrb[48].mxu1 %vm226_vm0, %v6939_v23  ;;  %v7059_v23 = vld [vmem:[#allocation3 + $0x26c] ss:$16 sps:$4 sm:$0xff]  }
  0x84   :  { %630 = vmatprep.mubr.bf16.mxu1 %v7184_v1 }
  0x89   :  { %6436 = vmatmul.mubr.msk.bf16.gmra.mrb[52].mxu0 %vm226_vm0, %v6946_v26 }
  0x8a   :  { %447 = vmatprep.mubr.bf16.mxu0 %v7184_v1 }
  0x8b   :  { %6452 = vmatmul.mubr.msk.bf16.gmra.mrb[52].mxu1 %vm226_vm0, %v6946_v26 }
  0x8c   :  { %640 = vmatprep.mubr.bf16.mxu1 %v7184_v1 }
  0x91   :  { %6437 = vmatmul.mubr.msk.bf16.gmra.mrb[56].mxu0 %vm226_vm0, %v6953_v27 }
  0x92   :  { %457 = vmatprep.mubr.bf16.mxu0 %v7184_v1 }
  0x93   :  { %6453 = vmatmul.mubr.msk.bf16.gmra.mrb[56].mxu1 %vm226_vm0, %v6953_v27 }
  0x94   :  { %650 = vmatprep.mubr.bf16.mxu1 %v7184_v1  ;;  %v7395_v1 = vrot.slane %v84_v32, %v92_v33 }
  0x99   :  { %6438 = vmatmul.mubr.msk.bf16.gmra.mrb[60].mxu0 %vm226_vm0, %v6960_v28 }
  0x9b   :  { %6454 = vmatmul.mubr.msk.bf16.gmra.mrb[60].mxu1 %vm226_vm0, %v6960_v28  ;;  %vm6381_vm0 = vcmp.lt.s32.totalorder %v86_v29, 256 }
  0xf4   :  { %v309_v35 = vpop.f32.mrb[0].mxu0  ;;  %v502_v10 = vpop.f32.mrb[0].mxu1 }
  0xf5   :  { %v310_v36 = vadd.f32 %v309_v35, %v7391_v34  ;;  %v311_v37 = vpop.f32.mrb[1].mxu0  ;;  %v503_v13 = vadd.f32 %v502_v10, %v7409_v62  ;;  %v504_v14 = vpop.f32.mrb[1].mxu1 }
  0xf6   :  { %v312_v38 = vadd.f32 %v311_v37, %v7395_v1  ;;  %v313_v39 = vpop.f32.mrb[2].mxu0  ;;  %v505_v19 = vadd.f32 %v504_v14, %v7414_v3  ;;  %v506_v20 = vpop.f32.mrb[2].mxu1 }
  0xf7   :  { %v314_v40 = vadd.f32 %v313_v39, %v7391_v34  ;;  %v315_v41 = vpop.f32.mrb[3].mxu0  ;;  %v661_v43 = vmax.f32 %v310_v36, 0.0  ;;  %v663_v24 = vmax.f32 %v503_v13, 0.0  ;;  %v507_v25 = vadd.f32 %v506_v20, %v7409_v62  ;;  %v508_v26 = vpop.f32.mrb[3].mxu1 }
  0xf8   :  { %v316_v42 = vadd.f32 %v315_v41, %v7395_v1  ;;  %v662_v45 = vmax.f32 %v312_v38, 0.0  ;;  %v664_v32 = vmax.f32 %v505_v19, 0.0  ;;  %v509_v35 = vadd.f32 %v508_v26, %v7414_v3  ;;  %v7057_v41 = vld [vmem:[#allocation3 + $0x268] ss:$16 sps:$4 sm:$0xff]  }
  0xf9   :  { %v665_v44 = vmax.f32 %v314_v40, 0.0  ;;  %v667_v38 = vmax.f32 %v507_v25, 0.0  ;;  %v7054_v40 = vld [vmem:[#allocation3 + $0x260] ss:$16 sps:$4 sm:$0xff]  }
  0xfa   :  { %v666_v46 = vmax.f32 %v316_v42, 0.0  ;;  %v668_v42 = vmax.f32 %v509_v35, 0.0  ;;  %v7072_v35 = vld [vmem:[#allocation3 + $0x2c0] ss:$16 sps:$4 sm:$0xff]  }
  0xfb   :  { %v789_v47 = vpack.c.bf16 %v665_v44, %v661_v43 }
  0xfc   :  { %v790_v49 = vpack.c.bf16 %v666_v46, %v662_v45  ;;  %v319_v50 = vpop.f32.mrb[4].mxu0  ;;  %v7062_v45 = vld [vmem:[#allocation3 + $0x284] ss:$16 sps:$4 sm:$0xff]   ;;  %v7065_v46 = vld [vmem:[#allocation3 + $0x28c] ss:$16 sps:$4 sm:$0xff]  }
  0xfd   :  { %v320_v54 = vadd.f32 %v319_v50, %v7391_v34  ;;  %v321_v55 = vpop.f32.mrb[5].mxu0 }
  0xfe   :  { %v322_v58 = vadd.f32 %v321_v55, %v7395_v1  ;;  %v323_v59 = vpop.f32.mrb[6].mxu0  ;;  %1675 = vmatprep.mubr.bf16.mxu0 %v790_v49  ;;  %2061 = vmatprep.mubr.bf16.mxu1 %v790_v49  ;;  %v7060_v55 = vld [vmem:[#allocation3 + $0x280] ss:$16 sps:$4 sm:$0xff]  }
  0xff   :  { %v324_v60 = vadd.f32 %v323_v59, %v7391_v34  ;;  %v325_v61 = vpop.f32.mrb[7].mxu0  ;;  %1676 = vmatmul.mubr.bf16.vlgmr.msra.gmra.mrb[64].mxu0 %v789_v47  ;;  %2062 = vmatmul.mubr.bf16.vlgmr.msra.gmra.mrb[64].mxu1 %v789_v47  ;;  %v669_v4 = vmax.f32 %v320_v54, 0.0  ;;  %v7424_v47 = vpack.c.bf16 %v667_v38, %v663_v24 }
 0x100   :  { %v326_v63 = vadd.f32 %v325_v61, %v7395_v1  ;;  %1837 = vmatpush1.bf16.msra.mxu0 %v7036_v51  ;;  %2223 = vmatpush1.bf16.msra.mxu1 %v7039_v52  ;;  %v670_v8 = vmax.f32 %v322_v58, 0.0  ;;  %v7426_v51 = vpack.c.bf16 %v668_v42, %v664_v32  ;;  %v512_v52 = vpop.f32.mrb[4].mxu1  ;;  %v7068_v61 = vld [vmem:[#allocation3 + $0x2a4] ss:$16 sps:$4 sm:$0xff]  }
 0x101   :  { %v673_v5 = vmax.f32 %v324_v60, 0.0  ;;  %1838 = vmatprep.subr.bf16.mxu0 %v7044_v56  ;;  %2224 = vmatprep.subr.bf16.mxu1 %v7047_v57  ;;  %v513_v56 = vadd.f32 %v512_v52, %v7409_v62  ;;  %v514_v57 = vpop.f32.mrb[5].mxu1  ;;  %v7063_v60 = vld [vmem:[#allocation3 + $0x288] ss:$16 sps:$4 sm:$0xff]  }
 0x102   :  { %v674_v9 = vmax.f32 %v326_v63, 0.0  ;;  %v515_v63 = vadd.f32 %v514_v57, %v7414_v3 }
 0x103   :  { %v793_v11 = vpack.c.bf16 %v673_v5, %v669_v4  ;;  %v7071_v5 = vld [vmem:[#allocation3 + $0x2ac] ss:$16 sps:$4 sm:$0xff]  }
 0x104   :  { %v794_v15 = vpack.c.bf16 %v674_v9, %v670_v8  ;;  %v329_v16 = vpop.f32.mrb[8].mxu0  ;;  %1839 = vmatpush1.bf16.msra.mxu0 %v7042_v0  ;;  %2225 = vmatpush1.bf16.msra.mxu1 %v7045_v2  ;;  %v516_v0 = vpop.f32.mrb[6].mxu1 }
 0x105   :  { %v330_v21 = vadd.f32 %v329_v16, %v7391_v34  ;;  %v331_v22 = vpop.f32.mrb[9].mxu0  ;;  %1840 = vmatprep.subr.bf16.mxu0 %v7050_v6  ;;  %2226 = vmatprep.subr.bf16.mxu1 %v7053_v7  ;;  %v671_v6 = vmax.f32 %v513_v56, 0.0  ;;  %v517_v7 = vadd.f32 %v516_v0, %v7409_v62  ;;  %v518_v8 = vpop.f32.mrb[7].mxu1  ;;  %v7081_v0 = vld [vmem:[#allocation3 + $0x2e8] ss:$16 sps:$4 sm:$0xff]  }
 0x106   :  { %v332_v27 = vadd.f32 %v331_v22, %v7395_v1  ;;  %v333_v28 = vpop.f32.mrb[10].mxu0  ;;  %1685 = vmatprep.mubr.bf16.mxu0 %v794_v15  ;;  %2071 = vmatprep.mubr.bf16.mxu1 %v794_v15  ;;  %v7074_v22 = vld [vmem:[#allocation3 + $0x2c4] ss:$16 sps:$4 sm:$0xff]  }
 0x107   :  { %v334_v36 = vadd.f32 %v333_v28, %v7391_v34  ;;  %v335_v37 = vpop.f32.mrb[11].mxu0  ;;  %1686 = vmatmul.mubr.bf16.gmra.mrb[68].mxu0 %v793_v11  ;;  %2072 = vmatmul.mubr.bf16.gmra.mrb[68].mxu1 %v793_v11  ;;  %v677_v43 = vmax.f32 %v330_v21, 0.0  ;;  %v672_v11 = vmax.f32 %v515_v63, 0.0  ;;  %v675_v15 = vmax.f32 %v517_v7, 0.0  ;;  %v522_v28 = vpop.f32.mrb[8].mxu1 }
 0x108   :  { %v336_v39 = vadd.f32 %v335_v37, %v7395_v1  ;;  %1841 = vmatpush1.bf16.msra.mxu0 %v7048_v12  ;;  %2227 = vmatpush1.bf16.msra.mxu1 %v7051_v17  ;;  %v678_v49 = vmax.f32 %v332_v27, 0.0  ;;  %v519_v12 = vadd.f32 %v518_v8, %v7414_v3  ;;  %v7066_v17 = vld [vmem:[#allocation3 + $0x2a0] ss:$16 sps:$4 sm:$0xff]   ;;  %v524_v37 = vpop.f32.mrb[9].mxu1  ;;  %v7089_v7 = vld [vmem:[#allocation3 + $0x30c] ss:$16 sps:$4 sm:$0xff]  }
 0x109   :  { %v681_v44 = vmax.f32 %v334_v36, 0.0  ;;  %1842 = vmatprep.subr.bf16.mxu0 %v7056_v18  ;;  %2228 = vmatprep.subr.bf16.mxu1 %v7059_v23  ;;  %v7069_v18 = vld [vmem:[#allocation3 + $0x2a8] ss:$16 sps:$4 sm:$0xff]   ;;  %v7077_v23 = vld [vmem:[#allocation3 + $0x2cc] ss:$16 sps:$4 sm:$0xff]   ;;  %v7436_v24 = vpack.c.bf16 %v675_v15, %v671_v6  ;;  %v523_v36 = vadd.f32 %v522_v28, %v7409_v62  ;;  %v525_v42 = vadd.f32 %v524_v37, %v7414_v3 }
 0x10a   :  { %v682_v50 = vmax.f32 %v336_v39, 0.0  ;;  %v676_v19 = vmax.f32 %v519_v12, 0.0  ;;  %v7078_v63 = vld [vmem:[#allocation3 + $0x2e0] ss:$16 sps:$4 sm:$0xff]   ;;  %v7086_v6 = vld [vmem:[#allocation3 + $0x304] ss:$16 sps:$4 sm:$0xff]  }
 0x10b   :  { %v797_v54 = vpack.c.bf16 %v681_v44, %v677_v43  ;;  %v526_v43 = vpop.f32.mrb[10].mxu1  ;;  %v680_v56 = vmax.f32 %v525_v42, 0.0 }
 0x10c   :  { %v798_v58 = vpack.c.bf16 %v682_v50, %v678_v49  ;;  %v339_v59 = vpop.f32.mrb[12].mxu0  ;;  %1843 = vmatpush1.bf16.msra.mxu0 %v7054_v40  ;;  %2229 = vmatpush1.bf16.msra.mxu1 %v7057_v41  ;;  %v7438_v27 = vpack.c.bf16 %v676_v19, %v672_v11  ;;  %v7075_v40 = vld [vmem:[#allocation3 + $0x2c8] ss:$16 sps:$4 sm:$0xff]   ;;  %v7080_v41 = vld [vmem:[#allocation3 + $0x2e4] ss:$16 sps:$4 sm:$0xff]   ;;  %v679_v49 = vmax.f32 %v523_v36, 0.0  ;;  %v527_v50 = vadd.f32 %v526_v43, %v7409_v62 }
 0x10d   :  { %v340_v2 = vadd.f32 %v339_v59, %v7391_v34  ;;  %v341_v4 = vpop.f32.mrb[13].mxu0  ;;  %1844 = vmatprep.subr.bf16.mxu0 %v7062_v45  ;;  %2230 = vmatprep.subr.bf16.mxu1 %v7065_v46  ;;  %v7083_v46 = vld [vmem:[#allocation3 + $0x2ec] ss:$16 sps:$4 sm:$0xff]   ;;  %v528_v52 = vpop.f32.mrb[11].mxu1  ;;  %v7087_v19 = vld [vmem:[#allocation3 + $0x308] ss:$16 sps:$4 sm:$0xff]  }
 0x10e   :  { %v342_v9 = vadd.f32 %v341_v4, %v7395_v1  ;;  %v343_v10 = vpop.f32.mrb[14].mxu0  ;;  %1695 = vmatprep.mubr.bf16.mxu0 %v798_v58  ;;  %2081 = vmatprep.mubr.bf16.mxu1 %v798_v58  ;;  %v529_v57 = vadd.f32 %v528_v52, %v7414_v3  ;;  %v532_v12 = vpop.f32.mrb[12].mxu1  ;;  %v7098_v52 = vld [vmem:[#allocation3 + $0x344] ss:$16 sps:$4 sm:$0xff]  }
 0x10f   :  { %v344_v13 = vadd.f32 %v343_v10, %v7391_v34  ;;  %v345_v14 = vpop.f32.mrb[15].mxu0  ;;  %1696 = vmatmul.mubr.bf16.gmra.mrb[72].mxu0 %v797_v54  ;;  %2082 = vmatmul.mubr.bf16.gmra.mrb[72].mxu1 %v797_v54  ;;  %v685_v20 = vmax.f32 %v340_v2, 0.0  ;;  %v533_v15 = vadd.f32 %v532_v12, %v7409_v62 }
 0x110   :  { %v346_v16 = vadd.f32 %v345_v14, %v7395_v1  ;;  %1845 = vmatpush1.bf16.msra.mxu0 %v7060_v55  ;;  %2231 = vmatpush1.bf16.msra.mxu1 %v7063_v60  ;;  %v686_v25 = vmax.f32 %v342_v9, 0.0  ;;  %v683_v60 = vmax.f32 %v527_v50, 0.0  ;;  %v684_v2 = vmax.f32 %v529_v57, 0.0  ;;  %v7084_v14 = vld [vmem:[#allocation3 + $0x300] ss:$16 sps:$4 sm:$0xff]  }
 0x111   :  { %v689_v21 = vmax.f32 %v344_v13, 0.0  ;;  %1846 = vmatprep.subr.bf16.mxu0 %v7068_v61  ;;  %2232 = vmatprep.subr.bf16.mxu1 %v7071_v5  ;;  %v687_v28 = vmax.f32 %v533_v15, 0.0 }
 0x112   :  { %v690_v26 = vmax.f32 %v346_v16, 0.0  ;;  %v7448_v8 = vpack.c.bf16 %v683_v60, %v679_v49  ;;  %v7450_v11 = vpack.c.bf16 %v684_v2, %v680_v56  ;;  %v534_v16 = vpop.f32.mrb[13].mxu1 }
 0x113   :  { %v801_v32 = vpack.c.bf16 %v689_v21, %v685_v20  ;;  %v7092_v20 = vld [vmem:[#allocation3 + $0x324] ss:$16 sps:$4 sm:$0xff]   ;;  %v535_v21 = vadd.f32 %v534_v16, %v7414_v3 }
 0x114   :  { %v802_v38 = vpack.c.bf16 %v690_v26, %v686_v25  ;;  %v349_v39 = vpop.f32.mrb[16].mxu0  ;;  %1847 = vmatpush1.bf16.msra.mxu0 %v7066_v17  ;;  %2233 = vmatpush1.bf16.msra.mxu1 %v7069_v18  ;;  %v7095_v26 = vld [vmem:[#allocation3 + $0x32c] ss:$16 sps:$4 sm:$0xff]  }
 0x115   :  { %v350_v44 = vadd.f32 %v349_v39, %v7391_v34  ;;  %v351_v45 = vpop.f32.mrb[17].mxu0  ;;  %1848 = vmatprep.subr.bf16.mxu0 %v7074_v22  ;;  %2234 = vmatprep.subr.bf16.mxu1 %v7077_v23  ;;  %v536_v22 = vpop.f32.mrb[14].mxu1 }
 0x116   :  { %v352_v54 = vadd.f32 %v351_v45, %v7395_v1  ;;  %v353_v55 = vpop.f32.mrb[18].mxu0  ;;  %1705 = vmatprep.mubr.bf16.mxu0 %v802_v38  ;;  %2091 = vmatprep.mubr.bf16.mxu1 %v802_v38  ;;  %v688_v38 = vmax.f32 %v535_v21, 0.0  ;;  %v7093_v45 = vld [vmem:[#allocation3 + $0x328] ss:$16 sps:$4 sm:$0xff]  }
 0x117   :  { %v354_v58 = vadd.f32 %v353_v55, %v7391_v34  ;;  %v355_v59 = vpop.f32.mrb[19].mxu0  ;;  %1706 = vmatmul.mubr.bf16.gmra.mrb[76].mxu0 %v801_v32  ;;  %2092 = vmatmul.mubr.bf16.gmra.mrb[76].mxu1 %v801_v32  ;;  %v693_v4 = vmax.f32 %v350_v44, 0.0  ;;  %v537_v32 = vadd.f32 %v536_v22, %v7409_v62  ;;  %v7090_v44 = vld [vmem:[#allocation3 + $0x320] ss:$16 sps:$4 sm:$0xff]  }
 0x118   :  { %v356_v61 = vadd.f32 %v355_v59, %v7395_v1  ;;  %1849 = vmatpush1.bf16.msra.mxu0 %v7072_v35  ;;  %2235 = vmatpush1.bf16.msra.mxu1 %v7075_v40  ;;  %v694_v9 = vmax.f32 %v352_v54, 0.0  ;;  %v538_v35 = vpop.f32.mrb[15].mxu1  ;;  %v7101_v54 = vld [vmem:[#allocation3 + $0x34c] ss:$16 sps:$4 sm:$0xff]  }
 0x119   :  { %v697_v5 = vmax.f32 %v354_v58, 0.0  ;;  %1850 = vmatprep.subr.bf16.mxu0 %v7080_v41  ;;  %2236 = vmatprep.subr.bf16.mxu1 %v7083_v46  ;;  %v539_v39 = vadd.f32 %v538_v35, %v7414_v3  ;;  %v691_v42 = vmax.f32 %v537_v32, 0.0  ;;  %v542_v59 = vpop.f32.mrb[16].mxu1 }
 0x11a   :  { %v698_v10 = vmax.f32 %v356_v61, 0.0  ;;  %v7096_v61 = vld [vmem:[#allocation3 + $0x340] ss:$16 sps:$4 sm:$0xff]  }
 0x11b   :  { %v805_v13 = vpack.c.bf16 %v697_v5, %v693_v4  ;;  %v692_v46 = vmax.f32 %v539_v39, 0.0  ;;  %v7460_v55 = vpack.c.bf16 %v691_v42, %v687_v28  ;;  %v7099_v5 = vld [vmem:[#allocation3 + $0x348] ss:$16 sps:$4 sm:$0xff]  }
 0x11c   :  { %v806_v17 = vpack.c.bf16 %v698_v10, %v694_v9  ;;  %v359_v18 = vpop.f32.mrb[20].mxu0  ;;  %1851 = vmatpush1.bf16.msra.mxu0 %v7078_v63  ;;  %2237 = vmatpush1.bf16.msra.mxu1 %v7081_v0  ;;  %v543_v63 = vadd.f32 %v542_v59, %v7409_v62  ;;  %v544_v0 = vpop.f32.mrb[17].mxu1  ;;  %v7105_v28 = vld [vmem:[#allocation3 + $0x368] ss:$16 sps:$4 sm:$0xff]  }
 0x11d   :  { %v360_v23 = vadd.f32 %v359_v18, %v7391_v34  ;;  %v361_v25 = vpop.f32.mrb[21].mxu0  ;;  %1852 = vmatprep.subr.bf16.mxu0 %v7086_v6  ;;  %2238 = vmatprep.subr.bf16.mxu1 %v7089_v7  ;;  %v7462_v58 = vpack.c.bf16 %v692_v46, %v688_v38  ;;  %v7104_v6 = vld [vmem:[#allocation3 + $0x364] ss:$16 sps:$4 sm:$0xff]   ;;  %v545_v7 = vadd.f32 %v544_v0, %v7414_v3  ;;  %v546_v9 = vpop.f32.mrb[18].mxu1  ;;  %v7113_v38 = vld [vmem:[#allocation3 + $0x38c] ss:$16 sps:$4 sm:$0xff]  }
 0x11e   :  { %v362_v36 = vadd.f32 %v361_v25, %v7395_v1  ;;  %v363_v37 = vpop.f32.mrb[22].mxu0  ;;  %1715 = vmatprep.mubr.bf16.mxu0 %v806_v17  ;;  %2101 = vmatprep.mubr.bf16.mxu1 %v806_v17  ;;  %v547_v15 = vadd.f32 %v546_v9, %v7409_v62  ;;  %v548_v16 = vpop.f32.mrb[19].mxu1 }
 0x11f   :  { %v364_v40 = vadd.f32 %v363_v37, %v7391_v34  ;;  %v365_v41 = vpop.f32.mrb[23].mxu0  ;;  %1716 = vmatmul.mubr.bf16.gmra.mrb[80].mxu0 %v805_v13  ;;  %2102 = vmatmul.mubr.bf16.gmra.mrb[80].mxu1 %v805_v13  ;;  %v701_v49 = vmax.f32 %v360_v23, 0.0  ;;  %v7107_v13 = vld [vmem:[#allocation3 + $0x36c] ss:$16 sps:$4 sm:$0xff]   ;;  %v7110_v37 = vld [vmem:[#allocation3 + $0x384] ss:$16 sps:$4 sm:$0xff]  }
 0x120   :  { %v366_v43 = vadd.f32 %v365_v41, %v7395_v1  ;;  %1853 = vmatpush1.bf16.msra.mxu0 %v7084_v14  ;;  %2239 = vmatpush1.bf16.msra.mxu1 %v7087_v19  ;;  %v702_v56 = vmax.f32 %v362_v36, 0.0  ;;  %v695_v14 = vmax.f32 %v543_v63, 0.0  ;;  %v696_v19 = vmax.f32 %v545_v7, 0.0  ;;  %v7119_v63 = vld [vmem:[#allocation3 + $0x3ac] ss:$16 sps:$4 sm:$0xff]  }
 0x121   :  { %v705_v50 = vmax.f32 %v364_v40, 0.0  ;;  %1854 = vmatprep.subr.bf16.mxu0 %v7092_v20  ;;  %2240 = vmatprep.subr.bf16.mxu1 %v7095_v26  ;;  %v549_v20 = vadd.f32 %v548_v16, %v7414_v3  ;;  %v699_v23 = vmax.f32 %v547_v15, 0.0  ;;  %v7102_v26 = vld [vmem:[#allocation3 + $0x360] ss:$16 sps:$4 sm:$0xff]   ;;  %v7117_v16 = vld [vmem:[#allocation3 + $0x3a8] ss:$16 sps:$4 sm:$0xff]  }
 0x122   :  { %v706_v57 = vmax.f32 %v366_v43, 0.0  ;;  %v552_v43 = vpop.f32.mrb[20].mxu1  ;;  %v7114_v15 = vld [vmem:[#allocation3 + $0x3a0] ss:$16 sps:$4 sm:$0xff]  }
 0x123   :  { %v809_v60 = vpack.c.bf16 %v705_v50, %v701_v49  ;;  %v700_v32 = vmax.f32 %v549_v20, 0.0  ;;  %v7472_v39 = vpack.c.bf16 %v699_v23, %v695_v14  ;;  %v553_v46 = vadd.f32 %v552_v43, %v7409_v62  ;;  %v554_v49 = vpop.f32.mrb[21].mxu1  ;;  %v7122_v20 = vld [vmem:[#allocation3 + $0x3c4] ss:$16 sps:$4 sm:$0xff]  }
 0x124   :  { %v810_v2 = vpack.c.bf16 %v706_v57, %v702_v56  ;;  %v369_v4 = vpop.f32.mrb[24].mxu0  ;;  %1855 = vmatpush1.bf16.msra.mxu0 %v7090_v44  ;;  %2241 = vmatpush1.bf16.msra.mxu1 %v7093_v45  ;;  %v7108_v45 = vld [vmem:[#allocation3 + $0x380] ss:$16 sps:$4 sm:$0xff]   ;;  %v7116_v56 = vld [vmem:[#allocation3 + $0x3a4] ss:$16 sps:$4 sm:$0xff]   ;;  %v555_v57 = vadd.f32 %v554_v49, %v7414_v3  ;;  %v556_v59 = vpop.f32.mrb[22].mxu1 }
 0x125   :  { %v370_v10 = vadd.f32 %v369_v4, %v7391_v34  ;;  %v371_v12 = vpop.f32.mrb[25].mxu0  ;;  %1856 = vmatprep.subr.bf16.mxu0 %v7098_v52  ;;  %2242 = vmatprep.subr.bf16.mxu1 %v7101_v54  ;;  %v7474_v42 = vpack.c.bf16 %v700_v32, %v696_v19  ;;  %v7111_v54 = vld [vmem:[#allocation3 + $0x388] ss:$16 sps:$4 sm:$0xff]   ;;  %v703_v0 = vmax.f32 %v553_v46, 0.0  ;;  %v558_v4 = vpop.f32.mrb[23].mxu1 }
 0x126   :  { %v372_v17 = vadd.f32 %v371_v12, %v7395_v1  ;;  %v373_v18 = vpop.f32.mrb[26].mxu0  ;;  %1725 = vmatprep.mubr.bf16.mxu0 %v810_v2  ;;  %2111 = vmatprep.mubr.bf16.mxu1 %v810_v2  ;;  %v557_v2 = vadd.f32 %v556_v59, %v7409_v62  ;;  %v704_v7 = vmax.f32 %v555_v57, 0.0  ;;  %v559_v9 = vadd.f32 %v558_v4, %v7414_v3  ;;  %v7128_v43 = vld [vmem:[#allocation3 + $0x3e4] ss:$16 sps:$4 sm:$0xff]  }
 0x127   :  { %v374_v21 = vadd.f32 %v373_v18, %v7391_v34  ;;  %v375_v22 = vpop.f32.mrb[27].mxu0  ;;  %1726 = vmatmul.mubr.bf16.gmra.mrb[84].mxu0 %v809_v60  ;;  %2112 = vmatmul.mubr.bf16.gmra.mrb[84].mxu1 %v809_v60  ;;  %v709_v35 = vmax.f32 %v370_v10, 0.0 }
 0x128   :  { %v376_v25 = vadd.f32 %v375_v22, %v7395_v1  ;;  %1857 = vmatpush1.bf16.msra.mxu0 %v7096_v61  ;;  %2243 = vmatpush1.bf16.msra.mxu1 %v7099_v5  ;;  %v710_v40 = vmax.f32 %v372_v17, 0.0  ;;  %v708_v17 = vmax.f32 %v559_v9, 0.0 }
 0x129   :  { %v713_v36 = vmax.f32 %v374_v21, 0.0  ;;  %1858 = vmatprep.subr.bf16.mxu0 %v7104_v6  ;;  %2244 = vmatprep.subr.bf16.mxu1 %v7107_v13  ;;  %v707_v13 = vmax.f32 %v557_v2, 0.0  ;;  %v7125_v21 = vld [vmem:[#allocation3 + $0x3cc] ss:$16 sps:$4 sm:$0xff]  }
 0x12a   :  { %v714_v41 = vmax.f32 %v376_v25, 0.0 }
 0x12b   :  { %v813_v44 = vpack.c.bf16 %v713_v36, %v709_v35  ;;  %v7484_v22 = vpack.c.bf16 %v707_v13, %v703_v0  ;;  %v7120_v35 = vld [vmem:[#allocation3 + $0x3c0] ss:$16 sps:$4 sm:$0xff]  }
 0x12c   :  { %v814_v50 = vpack.c.bf16 %v714_v41, %v710_v40  ;;  %v379_v52 = vpop.f32.mrb[28].mxu0  ;;  %1859 = vmatpush1.bf16.msra.mxu0 %v7102_v26  ;;  %2245 = vmatpush1.bf16.msra.mxu1 %v7105_v28  ;;  %v7486_v26 = vpack.c.bf16 %v708_v17, %v704_v7  ;;  %v562_v28 = vpop.f32.mrb[24].mxu1  ;;  %v7123_v41 = vld [vmem:[#allocation3 + $0x3c8] ss:$16 sps:$4 sm:$0xff]  }
 0x12d   :  { %v380_v60 = vadd.f32 %v379_v52, %v7391_v34  ;;  %v381_v61 = vpop.f32.mrb[29].mxu0  ;;  %1860 = vmatprep.subr.bf16.mxu0 %v7110_v37  ;;  %2246 = vmatprep.subr.bf16.mxu1 %v7113_v38  ;;  %v563_v36 = vadd.f32 %v562_v28, %v7409_v62  ;;  %v564_v37 = vpop.f32.mrb[25].mxu1 }
 0x12e   :  { %v382_v5 = vadd.f32 %v381_v61, %v7395_v1  ;;  %v383_v6 = vpop.f32.mrb[30].mxu0  ;;  %1735 = vmatprep.mubr.bf16.mxu0 %v814_v50  ;;  %2121 = vmatprep.mubr.bf16.mxu1 %v814_v50  ;;  %v7131_v50 = vld [vmem:[#allocation3 + $0x3ec] ss:$16 sps:$4 sm:$0xff]  }
 0x12f   :  { %v384_v10 = vadd.f32 %v383_v6, %v7391_v34  ;;  %v385_v12 = vpop.f32.mrb[31].mxu0  ;;  %1736 = vmatmul.mubr.bf16.gmra.mrb[88].mxu0 %v813_v44  ;;  %2122 = vmatmul.mubr.bf16.gmra.mrb[88].mxu1 %v813_v44  ;;  %v717_v18 = vmax.f32 %v380_v60, 0.0  ;;  %v565_v44 = vadd.f32 %v564_v37, %v7414_v3  ;;  %v711_v52 = vmax.f32 %v563_v36, 0.0  ;;  %v7129_v6 = vld [vmem:[#allocation3 + $0x3e8] ss:$16 sps:$4 sm:$0xff]  }
 0x130   :  { %v386_v14 = vadd.f32 %v385_v12, %v7395_v1  ;;  %1861 = vmatpush1.bf16.msra.mxu0 %v7108_v45  ;;  %2247 = vmatpush1.bf16.msra.mxu1 %v7111_v54  ;;  %v718_v23 = vmax.f32 %v382_v5, 0.0  ;;  %v566_v45 = vpop.f32.mrb[26].mxu1  ;;  %v7126_v5 = vld [vmem:[#allocation3 + $0x3e0] ss:$16 sps:$4 sm:$0xff]  }
 0x131   :  { %v721_v19 = vmax.f32 %v384_v10, 0.0  ;;  %1862 = vmatprep.subr.bf16.mxu0 %v7116_v56  ;;  %2248 = vmatprep.subr.bf16.mxu1 %v7119_v63  ;;  %v567_v54 = vadd.f32 %v566_v45, %v7409_v62  ;;  %v568_v56 = vpop.f32.mrb[27].mxu1  ;;  %v712_v60 = vmax.f32 %v565_v44, 0.0 }
 0x132   :  { %v722_v25 = vmax.f32 %v386_v14, 0.0  ;;  %v569_v61 = vadd.f32 %v568_v56, %v7414_v3 }
 0x133   :  { %v817_v32 = vpack.c.bf16 %v721_v19, %v717_v18  ;;  %v715_v2 = vmax.f32 %v567_v54, 0.0 }
 0x134   :  { %v818_v38 = vpack.c.bf16 %v722_v25, %v718_v23  ;;  %v389_v40 = vpop.f32.mrb[32].mxu0  ;;  %1863 = vmatpush1.bf16.msra.mxu0 %v7114_v15  ;;  %2249 = vmatpush1.bf16.msra.mxu1 %v7117_v16  ;;  %v716_v7 = vmax.f32 %v569_v61, 0.0  ;;  %v572_v16 = vpop.f32.mrb[28].mxu1 }
 0x135   :  { %v390_v46 = vadd.f32 %v389_v40, %v7391_v34  ;;  %v391_v49 = vpop.f32.mrb[33].mxu0  ;;  %1864 = vmatprep.subr.bf16.mxu0 %v7122_v20  ;;  %2250 = vmatprep.subr.bf16.mxu1 %v7125_v21  ;;  %v7496_v12 = vpack.c.bf16 %v715_v2, %v711_v52  ;;  %v573_v18 = vadd.f32 %v572_v16, %v7409_v62  ;;  %v574_v19 = vpop.f32.mrb[29].mxu1 }
 0x136   :  { %v392_v57 = vadd.f32 %v391_v49, %v7395_v1  ;;  %v393_v59 = vpop.f32.mrb[34].mxu0  ;;  %1745 = vmatprep.mubr.bf16.mxu0 %v818_v38  ;;  %2131 = vmatprep.mubr.bf16.mxu1 %v818_v38  ;;  %v7498_v15 = vpack.c.bf16 %v716_v7, %v712_v60  ;;  %v575_v23 = vadd.f32 %v574_v19, %v7414_v3  ;;  %v576_v25 = vpop.f32.mrb[30].mxu1 }
 0x137   :  { %v394_v63 = vadd.f32 %v393_v59, %v7391_v34  ;;  %v395_v0 = vpop.f32.mrb[35].mxu0  ;;  %1746 = vmatmul.mubr.bf16.gmra.mrb[92].mxu0 %v817_v32  ;;  %2132 = vmatmul.mubr.bf16.gmra.mrb[92].mxu1 %v817_v32  ;;  %v725_v9 = vmax.f32 %v390_v46, 0.0  ;;  %v577_v36 = vadd.f32 %v576_v25, %v7409_v62  ;;  %v578_v37 = vpop.f32.mrb[31].mxu1 }
 0x138   :  { %v396_v4 = vadd.f32 %v395_v0, %v7395_v1  ;;  %1865 = vmatpush1.bf16.msra.mxu0 %v7120_v35  ;;  %2251 = vmatpush1.bf16.msra.mxu1 %v7123_v41  ;;  %v726_v13 = vmax.f32 %v392_v57, 0.0  ;;  %v719_v35 = vmax.f32 %v573_v18, 0.0  ;;  %v720_v41 = vmax.f32 %v575_v23, 0.0  ;;  %v582_v61 = vpop.f32.mrb[32].mxu1 }
 0x139   :  { %v729_v10 = vmax.f32 %v394_v63, 0.0  ;;  %1866 = vmatprep.subr.bf16.mxu0 %v7128_v43  ;;  %2252 = vmatprep.subr.bf16.mxu1 %v7131_v50  ;;  %v579_v43 = vadd.f32 %v578_v37, %v7414_v3  ;;  %v723_v46 = vmax.f32 %v577_v36, 0.0  ;;  %v583_v0 = vadd.f32 %v582_v61, %v7409_v62  ;;  %v584_v2 = vpop.f32.mrb[33].mxu1 }
 0x13a   :  { %v730_v14 = vmax.f32 %v396_v4, 0.0  ;;  %v586_v7 = vpop.f32.mrb[34].mxu1 }
 0x13b   :  { %v821_v17 = vpack.c.bf16 %v729_v10, %v725_v9  ;;  %v724_v50 = vmax.f32 %v579_v43, 0.0  ;;  %v7508_v56 = vpack.c.bf16 %v723_v46, %v719_v35  ;;  %v588_v16 = vpop.f32.mrb[35].mxu1 }
 0x13c   :  { %v822_v20 = vpack.c.bf16 %v730_v14, %v726_v13  ;;  %v399_v21 = vpop.f32.mrb[36].mxu0  ;;  %1867 = vmatpush1.bf16.msra.mxu0 %v7126_v5  ;;  %2253 = vmatpush1.bf16.msra.mxu1 %v7129_v6  ;;  %v585_v6 = vadd.f32 %v584_v2, %v7414_v3  ;;  %v727_v13 = vmax.f32 %v583_v0, 0.0  ;;  %v587_v14 = vadd.f32 %v586_v7, %v7409_v62 }
 0x13d   :  { %v400_v28 = vadd.f32 %v399_v21, %v7391_v34  ;;  %v401_v32 = vpop.f32.mrb[37].mxu0  ;;  %v7510_v60 = vpack.c.bf16 %v724_v50, %v720_v41 }
 0x13e   :  { %v402_v38 = vadd.f32 %v401_v32, %v7395_v1  ;;  %v403_v40 = vpop.f32.mrb[38].mxu0  ;;  %1755 = vmatprep.mubr.bf16.mxu0 %v822_v20  ;;  %2141 = vmatprep.mubr.bf16.mxu1 %v822_v20  ;;  %v728_v19 = vmax.f32 %v585_v6, 0.0  ;;  %v589_v20 = vadd.f32 %v588_v16, %v7414_v3  ;;  %v731_v25 = vmax.f32 %v587_v14, 0.0  ;;  %v592_v43 = vpop.f32.mrb[36].mxu1 }
 0x13f   :  { %v404_v44 = vadd.f32 %v403_v40, %v7391_v34  ;;  %v405_v45 = vpop.f32.mrb[39].mxu0  ;;  %1756 = vmatmul.mubr.bf16.gmra.mrb[96].mxu0 %v821_v17  ;;  %2142 = vmatmul.mubr.bf16.gmra.mrb[96].mxu1 %v821_v17  ;;  %v733_v52 = vmax.f32 %v400_v28, 0.0  ;;  %v594_v46 = vpop.f32.mrb[37].mxu1 }
 0x140   :  { %v406_v49 = vadd.f32 %v405_v45, %v7395_v1  ;;  %v734_v57 = vmax.f32 %v402_v38, 0.0  ;;  %v732_v32 = vmax.f32 %v589_v20, 0.0  ;;  %v7520_v37 = vpack.c.bf16 %v731_v25, %v727_v13 }
 0x141   :  { %v737_v54 = vmax.f32 %v404_v44, 0.0  ;;  %v593_v45 = vadd.f32 %v592_v43, %v7409_v62 }
 0x142   :  { %v738_v59 = vmax.f32 %v406_v49, 0.0  ;;  %v7522_v41 = vpack.c.bf16 %v732_v32, %v728_v19 }
 0x143   :  { %v825_v63 = vpack.c.bf16 %v737_v54, %v733_v52  ;;  %v595_v52 = vadd.f32 %v594_v46, %v7414_v3  ;;  %v596_v54 = vpop.f32.mrb[38].mxu1  ;;  %v735_v61 = vmax.f32 %v593_v45, 0.0 }
 0x144   :  { %v826_v4 = vpack.c.bf16 %v738_v59, %v734_v57  ;;  %v409_v5 = vpop.f32.mrb[40].mxu0  ;;  %v598_v0 = vpop.f32.mrb[39].mxu1 }
 0x145   :  { %v410_v9 = vadd.f32 %v409_v5, %v7391_v34  ;;  %v411_v10 = vpop.f32.mrb[41].mxu0  ;;  %v736_v5 = vmax.f32 %v595_v52, 0.0  ;;  %v599_v6 = vadd.f32 %v598_v0, %v7414_v3 }
 0x146   :  { %v412_v17 = vadd.f32 %v411_v10, %v7395_v1  ;;  %v413_v18 = vpop.f32.mrb[42].mxu0  ;;  %1765 = vmatprep.mubr.bf16.mxu0 %v826_v4  ;;  %2151 = vmatprep.mubr.bf16.mxu1 %v826_v4 }
 0x147   :  { %v414_v21 = vadd.f32 %v413_v18, %v7391_v34  ;;  %v415_v23 = vpop.f32.mrb[43].mxu0  ;;  %1766 = vmatmul.mubr.bf16.gmra.mrb[100].mxu0 %v825_v63  ;;  %2152 = vmatmul.mubr.bf16.gmra.mrb[100].mxu1 %v825_v63  ;;  %v741_v35 = vmax.f32 %v410_v9, 0.0  ;;  %v597_v63 = vadd.f32 %v596_v54, %v7409_v62  ;;  %v740_v14 = vmax.f32 %v599_v6, 0.0 }
 0x148   :  { %v416_v28 = vadd.f32 %v415_v23, %v7395_v1  ;;  %v742_v38 = vmax.f32 %v412_v17, 0.0  ;;  %v602_v23 = vpop.f32.mrb[40].mxu1 }
 0x149   :  { %v745_v36 = vmax.f32 %v414_v21, 0.0  ;;  %v739_v10 = vmax.f32 %v597_v63, 0.0  ;;  %v7534_v21 = vpack.c.bf16 %v740_v14, %v736_v5  ;;  %v604_v32 = vpop.f32.mrb[41].mxu1 }
 0x14a   :  { %v746_v40 = vmax.f32 %v416_v28, 0.0  ;;  %v603_v28 = vadd.f32 %v602_v23, %v7409_v62 }
 0x14b   :  { %v829_v44 = vpack.c.bf16 %v745_v36, %v741_v35  ;;  %v7532_v18 = vpack.c.bf16 %v739_v10, %v735_v61 }
 0x14c   :  { %v830_v49 = vpack.c.bf16 %v746_v40, %v742_v38  ;;  %v419_v50 = vpop.f32.mrb[44].mxu0  ;;  %v605_v38 = vadd.f32 %v604_v32, %v7414_v3  ;;  %v606_v40 = vpop.f32.mrb[42].mxu1  ;;  %v743_v45 = vmax.f32 %v603_v28, 0.0 }
 0x14d   :  { %v420_v57 = vadd.f32 %v419_v50, %v7391_v34  ;;  %v421_v59 = vpop.f32.mrb[45].mxu0  ;;  %v607_v46 = vadd.f32 %v606_v40, %v7409_v62 }
 0x14e   :  { %v422_v2 = vadd.f32 %v421_v59, %v7395_v1  ;;  %v423_v4 = vpop.f32.mrb[46].mxu0  ;;  %1775 = vmatprep.mubr.bf16.mxu0 %v830_v49  ;;  %2161 = vmatprep.mubr.bf16.mxu1 %v830_v49  ;;  %v608_v49 = vpop.f32.mrb[43].mxu1  ;;  %v744_v54 = vmax.f32 %v605_v38, 0.0 }
 0x14f   :  { %v424_v7 = vadd.f32 %v423_v4, %v7391_v34  ;;  %v425_v9 = vpop.f32.mrb[47].mxu0  ;;  %1776 = vmatmul.mubr.bf16.gmra.mrb[104].mxu0 %v829_v44  ;;  %2162 = vmatmul.mubr.bf16.gmra.mrb[104].mxu1 %v829_v44  ;;  %v749_v16 = vmax.f32 %v420_v57, 0.0  ;;  %v609_v57 = vadd.f32 %v608_v49, %v7414_v3  ;;  %v747_v63 = vmax.f32 %v607_v46, 0.0 }
 0x150   :  { %v426_v13 = vadd.f32 %v425_v9, %v7395_v1  ;;  %v750_v19 = vmax.f32 %v422_v2, 0.0 }
 0x151   :  { %v753_v17 = vmax.f32 %v424_v7, 0.0  ;;  %v748_v2 = vmax.f32 %v609_v57, 0.0  ;;  %v7544_v6 = vpack.c.bf16 %v747_v63, %v743_v45 }
 0x152   :  { %v754_v20 = vmax.f32 %v426_v13, 0.0  ;;  %v612_v13 = vpop.f32.mrb[44].mxu1 }
 0x153   :  { %v833_v25 = vpack.c.bf16 %v753_v17, %v749_v16  ;;  %v7546_v10 = vpack.c.bf16 %v748_v2, %v744_v54  ;;  %v613_v16 = vadd.f32 %v612_v13, %v7409_v62  ;;  %v614_v17 = vpop.f32.mrb[45].mxu1 }
 0x154   :  { %v834_v35 = vpack.c.bf16 %v754_v20, %v750_v19  ;;  %v429_v36 = vpop.f32.mrb[48].mxu0  ;;  %v615_v23 = vadd.f32 %v614_v17, %v7414_v3 }
 0x155   :  { %v430_v43 = vadd.f32 %v429_v36, %v7391_v34  ;;  %v431_v44 = vpop.f32.mrb[49].mxu0 }
 0x156   :  { %v432_v50 = vadd.f32 %v431_v44, %v7395_v1  ;;  %v433_v52 = vpop.f32.mrb[50].mxu0  ;;  %1785 = vmatprep.mubr.bf16.mxu0 %v834_v35  ;;  %2171 = vmatprep.mubr.bf16.mxu1 %v834_v35  ;;  %v751_v35 = vmax.f32 %v613_v16, 0.0  ;;  %v752_v44 = vmax.f32 %v615_v23, 0.0 }
 0x157   :  { %v434_v59 = vadd.f32 %v433_v52, %v7391_v34  ;;  %v435_v61 = vpop.f32.mrb[51].mxu0  ;;  %1786 = vmatmul.mubr.bf16.gmra.mrb[108].mxu0 %v833_v25  ;;  %2172 = vmatmul.mubr.bf16.gmra.mrb[108].mxu1 %v833_v25  ;;  %v757_v4 = vmax.f32 %v430_v43, 0.0  ;;  %v616_v25 = vpop.f32.mrb[46].mxu1 }
 0x158   :  { %v436_v0 = vadd.f32 %v435_v61, %v7395_v1  ;;  %v758_v7 = vmax.f32 %v432_v50, 0.0  ;;  %v617_v36 = vadd.f32 %v616_v25, %v7409_v62  ;;  %v618_v38 = vpop.f32.mrb[47].mxu1 }
 0x159   :  { %v761_v5 = vmax.f32 %v434_v59, 0.0  ;;  %v619_v45 = vadd.f32 %v618_v38, %v7414_v3 }
 0x15a   :  { %v762_v9 = vmax.f32 %v436_v0, 0.0  ;;  %v755_v50 = vmax.f32 %v617_v36, 0.0 }
 0x15b   :  { %v837_v14 = vpack.c.bf16 %v761_v5, %v757_v4  ;;  %v756_v54 = vmax.f32 %v619_v45, 0.0  ;;  %v622_v4 = vpop.f32.mrb[48].mxu1 }
 0x15c   :  { %v838_v19 = vpack.c.bf16 %v762_v9, %v758_v7  ;;  %v439_v20 = vpop.f32.mrb[52].mxu0  ;;  %v7556_v61 = vpack.c.bf16 %v755_v50, %v751_v35  ;;  %v623_v7 = vadd.f32 %v622_v4, %v7409_v62  ;;  %v624_v9 = vpop.f32.mrb[49].mxu1 }
 0x15d   :  { %v440_v28 = vadd.f32 %v439_v20, %v7391_v34  ;;  %v441_v32 = vpop.f32.mrb[53].mxu0  ;;  %v7558_v2 = vpack.c.bf16 %v756_v54, %v752_v44  ;;  %v626_v17 = vpop.f32.mrb[50].mxu1 }
 0x15e   :  { %v442_v40 = vadd.f32 %v441_v32, %v7395_v1  ;;  %v443_v43 = vpop.f32.mrb[54].mxu0  ;;  %1795 = vmatprep.mubr.bf16.mxu0 %v838_v19  ;;  %2181 = vmatprep.mubr.bf16.mxu1 %v838_v19  ;;  %v759_v23 = vmax.f32 %v623_v7, 0.0  ;;  %v627_v25 = vadd.f32 %v626_v17, %v7409_v62 }
 0x15f   :  { %v444_v46 = vadd.f32 %v443_v43, %v7391_v34  ;;  %v445_v49 = vpop.f32.mrb[55].mxu0  ;;  %1796 = vmatmul.mubr.bf16.gmra.mrb[112].mxu0 %v837_v14  ;;  %2182 = vmatmul.mubr.bf16.gmra.mrb[112].mxu1 %v837_v14  ;;  %v765_v57 = vmax.f32 %v440_v28, 0.0  ;;  %v625_v14 = vadd.f32 %v624_v9, %v7414_v3  ;;  %v628_v28 = vpop.f32.mrb[51].mxu1 }
 0x160   :  { %v446_v52 = vadd.f32 %v445_v49, %v7395_v1  ;;  %v766_v63 = vmax.f32 %v442_v40, 0.0  ;;  %v629_v38 = vadd.f32 %v628_v28, %v7414_v3  ;;  %v763_v44 = vmax.f32 %v627_v25, 0.0 }
 0x161   :  { %v769_v59 = vmax.f32 %v444_v46, 0.0  ;;  %v760_v36 = vmax.f32 %v625_v14, 0.0 }
 0x162   :  { %v770_v0 = vmax.f32 %v446_v52, 0.0  ;;  %v764_v46 = vmax.f32 %v629_v38, 0.0  ;;  %v7568_v52 = vpack.c.bf16 %v763_v44, %v759_v23 }
 0x163   :  { %v841_v5 = vpack.c.bf16 %v769_v59, %v765_v57 }
 0x164   :  { %v842_v13 = vpack.c.bf16 %v770_v0, %v766_v63  ;;  %v449_v16 = vpop.f32.mrb[56].mxu0  ;;  %v7570_v59 = vpack.c.bf16 %v764_v46, %v760_v36  ;;  %v632_v63 = vpop.f32.mrb[52].mxu1 }
 0x165   :  { %v450_v19 = vadd.f32 %v449_v16, %v7391_v34  ;;  %v451_v20 = vpop.f32.mrb[57].mxu0  ;;  %v633_v4 = vadd.f32 %v632_v63, %v7409_v62  ;;  %v634_v7 = vpop.f32.mrb[53].mxu1 }
 0x166   :  { %v452_v32 = vadd.f32 %v451_v20, %v7395_v1  ;;  %v453_v35 = vpop.f32.mrb[58].mxu0  ;;  %1805 = vmatprep.mubr.bf16.mxu0 %v842_v13  ;;  %2191 = vmatprep.mubr.bf16.mxu1 %v842_v13  ;;  %v636_v16 = vpop.f32.mrb[54].mxu1 }
 0x167   :  { %v454_v40 = vadd.f32 %v453_v35, %v7391_v34  ;;  %v455_v43 = vpop.f32.mrb[59].mxu0  ;;  %1806 = vmatmul.mubr.bf16.gmra.mrb[116].mxu0 %v841_v5  ;;  %2192 = vmatmul.mubr.bf16.gmra.mrb[116].mxu1 %v841_v5  ;;  %v773_v49 = vmax.f32 %v450_v19, 0.0  ;;  %v635_v5 = vadd.f32 %v634_v7, %v7414_v3  ;;  %v767_v19 = vmax.f32 %v633_v4, 0.0  ;;  %v638_v23 = vpop.f32.mrb[55].mxu1 }
 0x168   :  { %v456_v45 = vadd.f32 %v455_v43, %v7395_v1  ;;  %v774_v54 = vmax.f32 %v452_v32, 0.0  ;;  %v637_v20 = vadd.f32 %v636_v16, %v7409_v62  ;;  %v639_v35 = vadd.f32 %v638_v23, %v7414_v3  ;;  %v642_v63 = vpop.f32.mrb[56].mxu1 }
 0x169   :  { %v777_v50 = vmax.f32 %v454_v40, 0.0  ;;  %v768_v32 = vmax.f32 %v635_v5, 0.0  ;;  %v643_v7 = vadd.f32 %v642_v63, %v7409_v62 }
 0x16a   :  { %v778_v57 = vmax.f32 %v456_v45, 0.0  ;;  %v771_v40 = vmax.f32 %v637_v20, 0.0  ;;  %v772_v44 = vmax.f32 %v639_v35, 0.0 }
 0x16b   :  { %v845_v0 = vpack.c.bf16 %v777_v50, %v773_v49  ;;  %v775_v5 = vmax.f32 %v643_v7, 0.0 }
 0x16c   :  { %v846_v9 = vpack.c.bf16 %v778_v57, %v774_v54  ;;  %v459_v13 = vpop.f32.mrb[60].mxu0  ;;  %v7580_v49 = vpack.c.bf16 %v771_v40, %v767_v19  ;;  %v7582_v57 = vpack.c.bf16 %v772_v44, %v768_v32 }
 0x16d   :  { %v460_v14 = vadd.f32 %v459_v13, %v7391_v34  ;;  %v461_v17 = vpop.f32.mrb[61].mxu0 }
 0x16e   :  { %v462_v25 = vadd.f32 %v461_v17, %v7395_v1  ;;  %v463_v28 = vpop.f32.mrb[62].mxu0  ;;  %1815 = vmatprep.mubr.bf16.mxu0 %v846_v9  ;;  %2201 = vmatprep.mubr.bf16.mxu1 %v846_v9 }
 0x16f   :  { %v464_v36 = vadd.f32 %v463_v28, %v7391_v34  ;;  %v465_v38 = vpop.f32.mrb[63].mxu0  ;;  %1816 = vmatmul.mubr.bf16.gmra.mrb[120].mxu0 %v845_v0  ;;  %2202 = vmatmul.mubr.bf16.gmra.mrb[120].mxu1 %v845_v0  ;;  %v781_v45 = vmax.f32 %v460_v14, 0.0  ;;  %v644_v34 = vpop.f32.mrb[57].mxu1 }
 0x170   :  { %v466_v43 = vadd.f32 %v465_v38, %v7395_v1  ;;  %v782_v50 = vmax.f32 %v462_v25, 0.0  ;;  %v645_v0 = vadd.f32 %v644_v34, %v7414_v3  ;;  %v646_v13 = vpop.f32.mrb[58].mxu1 }
 0x171   :  { %v785_v46 = vmax.f32 %v464_v36, 0.0  ;;  %v647_v1 = vadd.f32 %v646_v13, %v7409_v62  ;;  %v648_v16 = vpop.f32.mrb[59].mxu1 }
 0x172   :  { %v786_v54 = vmax.f32 %v466_v43, 0.0  ;;  %v776_v14 = vmax.f32 %v645_v0, 0.0  ;;  %v649_v17 = vadd.f32 %v648_v16, %v7414_v3  ;;  %v652_v28 = vpop.f32.mrb[60].mxu1 }
 0x173   :  { %v849_v4 = vpack.c.bf16 %v785_v46, %v781_v45  ;;  %v779_v19 = vmax.f32 %v647_v1, 0.0  ;;  %v653_v32 = vadd.f32 %v652_v28, %v7409_v62  ;;  %v654_v35 = vpop.f32.mrb[61].mxu1 }
 0x174   :  { %v850_v9 = vpack.c.bf16 %v786_v54, %v782_v50  ;;  %v780_v20 = vmax.f32 %v649_v17, 0.0  ;;  %v655_v36 = vadd.f32 %v654_v35, %v7414_v3  ;;  %v656_v38 = vpop.f32.mrb[62].mxu1 }
 0x175   :  { %v7590_v23 = vpack.c.bf16 %v779_v19, %v775_v5  ;;  %v783_v40 = vmax.f32 %v653_v32, 0.0  ;;  %v657_v43 = vadd.f32 %v656_v38, %v7409_v62  ;;  %v658_v44 = vpop.f32.mrb[63].mxu1  ;;  %v2543_v62 = vld [vmem:[%s9013_s5] sm:$0xf] }
 0x176   :  { %1825 = vmatprep.mubr.bf16.mxu0 %v850_v9  ;;  %2211 = vmatprep.mubr.bf16.mxu1 %v850_v9  ;;  %v7592_v25 = vpack.c.bf16 %v780_v20, %v776_v14  ;;  %v784_v45 = vmax.f32 %v655_v36, 0.0  ;;  %v659_v46 = vadd.f32 %v658_v44, %v7414_v3  ;;  %v2544_v3 = vunpack.c.l.bf16 %v2543_v62 }
 0x177   :  { %1826 = vmatmul.mubr.bf16.gmra.mrb[124].mxu0 %v849_v4  ;;  %2212 = vmatmul.mubr.bf16.gmra.mrb[124].mxu1 %v849_v4 }
 0x178   :  { %1868 = vmatprep.mubr.bf16.mxu0 %v7426_v51  ;;  %2254 = vmatprep.mubr.bf16.mxu1 %v7426_v51  ;;  %v787_v51 = vmax.f32 %v657_v43, 0.0  ;;  %v788_v50 = vmax.f32 %v659_v46, 0.0 }
 0x17a   :  { %v851_v54 = vpack.c.bf16 %v787_v51, %v783_v40  ;;  %v852_v63 = vpack.c.bf16 %v788_v50, %v784_v45 }
 0x17f   :  { %1869 = vmatmul.mubr.bf16.vlgmr.msra.gmra.mrb[64].mxu0 %v7424_v47  ;;  %2255 = vmatmul.mubr.bf16.vlgmr.msra.gmra.mrb[64].mxu1 %v7424_v47  ;;  %v981_v47 = vld [vmem:[%s9012_s4] sm:$0xf]  ;;  %s7186_s4 = smov [#allocation6]  }
 0x180   :  { %1878 = vmatprep.mubr.bf16.mxu0 %v7438_v27  ;;  %2264 = vmatprep.mubr.bf16.mxu1 %v7438_v27  ;;  %v7664_v27 = vrot.slane %v981_v47, %v7384_v31  ;;  %s6390_s5 = sshll.u32 %s7186_s4, 4  ;;  %s6391_s5 = int_to_ptr.vmem [resolvable:$true] %s6390_s5 }
 0x181   :  { %s7155_s16 = scalar_lea.vmem %s6391_s5, 32  ;;  %p7160_p9 = scmp.lt.s32.totalorder %s6391_s5, %s6391_s5 }
 0x182   :  { %p7156_p8 = scmp.ne.s32.totalorder %s6391_s5, %s7155_s16  ;;  %p7161_p10 = scmp.lt.s32.totalorder %s7155_s16, %s7155_s16 }
 0x184   :  { %p7162_p11 = por %p7161_p10, %p7160_p9 }
 0x186   :  { %p7163_p12 = pnand %p7162_p11, %p7156_p8 }
 0x187   :  { %1879 = vmatmul.mubr.bf16.gmra.mrb[68].mxu0 %v7436_v24  ;;  %2265 = vmatmul.mubr.bf16.gmra.mrb[68].mxu1 %v7436_v24  ;;  %v2556_v24 = vsub.s32 4, %v7381_v30 }
 0x188   :  { %1888 = vmatprep.mubr.bf16.mxu0 %v7450_v11  ;;  %2274 = vmatprep.mubr.bf16.mxu1 %v7450_v11  ;;  %v7668_v11 = vrot.slane %v981_v47, %v7402_v48 }
 0x18f   :  { %1889 = vmatmul.mubr.bf16.gmra.mrb[72].mxu0 %v7448_v8  ;;  %2275 = vmatmul.mubr.bf16.gmra.mrb[72].mxu1 %v7448_v8  ;;  %v2549_v8 = vrot.slane %v2544_v3, %v7384_v31 }
 0x190   :  { %1898 = vmatprep.mubr.bf16.mxu0 %v7462_v58  ;;  %2284 = vmatprep.mubr.bf16.mxu1 %v7462_v58  ;;  %v2553_v58 = vrot.slane %v2544_v3, %v7402_v48 }
 0x197   :  { %1899 = vmatmul.mubr.bf16.gmra.mrb[76].mxu0 %v7460_v55  ;;  %2285 = vmatmul.mubr.bf16.gmra.mrb[76].mxu1 %v7460_v55  ;;  %v7672_v55 = vrot.slane %v981_v47, %v92_v33 }
 0x198   :  { %1908 = vmatprep.mubr.bf16.mxu0 %v7474_v42  ;;  %2294 = vmatprep.mubr.bf16.mxu1 %v7474_v42  ;;  %v2560_v42 = vsub.s32 6, %v7381_v30 }
 0x19f   :  { %1909 = vmatmul.mubr.bf16.gmra.mrb[80].mxu0 %v7472_v39  ;;  %2295 = vmatmul.mubr.bf16.gmra.mrb[80].mxu1 %v7472_v39  ;;  %v2557_v39 = vrot.slane %v2544_v3, %v2556_v24 }
 0x1a0   :  { %1918 = vmatprep.mubr.bf16.mxu0 %v7486_v26  ;;  %2304 = vmatprep.mubr.bf16.mxu1 %v7486_v26 }
 0x1a7   :  { %1919 = vmatmul.mubr.bf16.gmra.mrb[84].mxu0 %v7484_v22  ;;  %2305 = vmatmul.mubr.bf16.gmra.mrb[84].mxu1 %v7484_v22 }
 0x1a8   :  { %1928 = vmatprep.mubr.bf16.mxu0 %v7498_v15  ;;  %2314 = vmatprep.mubr.bf16.mxu1 %v7498_v15 }
 0x1af   :  { %1929 = vmatmul.mubr.bf16.gmra.mrb[88].mxu0 %v7496_v12  ;;  %2315 = vmatmul.mubr.bf16.gmra.mrb[88].mxu1 %v7496_v12  ;;  %v7678_v12 = vrot.slane %v981_v47, %v100_v53  ;;  %v7690_v53 = vrot.slane %v2557_v39, %v7384_v31 }
 0x1b0   :  { %1938 = vmatprep.mubr.bf16.mxu0 %v7510_v60  ;;  %2324 = vmatprep.mubr.bf16.mxu1 %v7510_v60 }
 0x1b7   :  { %1939 = vmatmul.mubr.bf16.gmra.mrb[92].mxu0 %v7508_v56  ;;  %2325 = vmatmul.mubr.bf16.gmra.mrb[92].mxu1 %v7508_v56  ;;  %v7682_v56 = vrot.slane %v2549_v8, %v7384_v31 }
 0x1b8   :  { %1948 = vmatprep.mubr.bf16.mxu0 %v7522_v41  ;;  %2334 = vmatprep.mubr.bf16.mxu1 %v7522_v41  ;;  %v7687_v41 = vrot.slane %v2553_v58, %v7384_v31 }
 0x1bf   :  { %1949 = vmatmul.mubr.bf16.gmra.mrb[96].mxu0 %v7520_v37  ;;  %2335 = vmatmul.mubr.bf16.gmra.mrb[96].mxu1 %v7520_v37 }
 0x1c0   :  { %1958 = vmatprep.mubr.bf16.mxu0 %v7534_v21  ;;  %2344 = vmatprep.mubr.bf16.mxu1 %v7534_v21 }
 0x1c7   :  { %1959 = vmatmul.mubr.bf16.gmra.mrb[100].mxu0 %v7532_v18  ;;  %2345 = vmatmul.mubr.bf16.gmra.mrb[100].mxu1 %v7532_v18 }
 0x1c8   :  { %1968 = vmatprep.mubr.bf16.mxu0 %v7546_v10  ;;  %2354 = vmatprep.mubr.bf16.mxu1 %v7546_v10 }
 0x1cf   :  { %1969 = vmatmul.mubr.bf16.gmra.mrb[104].mxu0 %v7544_v6  ;;  %2355 = vmatmul.mubr.bf16.gmra.mrb[104].mxu1 %v7544_v6 }
 0x1d0   :  { %1978 = vmatprep.mubr.bf16.mxu0 %v7558_v2  ;;  %2364 = vmatprep.mubr.bf16.mxu1 %v7558_v2 }
 0x1d7   :  { %1979 = vmatmul.mubr.bf16.gmra.mrb[108].mxu0 %v7556_v61  ;;  %2365 = vmatmul.mubr.bf16.gmra.mrb[108].mxu1 %v7556_v61 }
 0x1d8   :  { %1988 = vmatprep.mubr.bf16.mxu0 %v7570_v59  ;;  %2374 = vmatprep.mubr.bf16.mxu1 %v7570_v59 }
 0x1df   :  { %1989 = vmatmul.mubr.bf16.gmra.mrb[112].mxu0 %v7568_v52  ;;  %2375 = vmatmul.mubr.bf16.gmra.mrb[112].mxu1 %v7568_v52  ;;  %v2561_v52 = vrot.slane %v2544_v3, %v2560_v42 }
 0x1e0   :  { %1998 = vmatprep.mubr.bf16.mxu0 %v7582_v57  ;;  %2384 = vmatprep.mubr.bf16.mxu1 %v7582_v57 }
 0x1e1   :  { %v7701_v16 = vrot.slane %v2561_v52, %v7384_v31 }
 0x1e7   :  { %1999 = vmatmul.mubr.bf16.gmra.mrb[116].mxu0 %v7580_v49  ;;  %2385 = vmatmul.mubr.bf16.gmra.mrb[116].mxu1 %v7580_v49 }
 0x1e8   :  { %2008 = vmatprep.mubr.bf16.mxu0 %v7592_v25  ;;  %2394 = vmatprep.mubr.bf16.mxu1 %v7592_v25 }
 0x1ef   :  { %2009 = vmatmul.mubr.bf16.gmra.mrb[120].mxu0 %v7590_v23  ;;  %2395 = vmatmul.mubr.bf16.gmra.mrb[120].mxu1 %v7590_v23 }
 0x1f0   :  { %2018 = vmatprep.mubr.bf16.mxu0 %v852_v63  ;;  %2404 = vmatprep.mubr.bf16.mxu1 %v852_v63 }
 0x1f7   :  { %2019 = vmatmul.mubr.bf16.gmra.mrb[124].mxu0 %v851_v54  ;;  %2405 = vmatmul.mubr.bf16.gmra.mrb[124].mxu1 %v851_v54 }
 0x252   :  { %v1870_v22 = vpop.f32.mrb[64].mxu0  ;;  %v2256_v26 = vpop.f32.mrb[64].mxu1 }
 0x253   :  { %v6648_v15 = vadd.f32 %v1870_v22, %v7664_v27  ;;  %v6712_v60 = vadd.f32 %v2256_v26, %v7668_v11  ;;  %v1872_v33 = vpop.f32.mrb[65].mxu0  ;;  %v2258_v37 = vpop.f32.mrb[65].mxu1 }
 0x254   :  { %v6649_v48 = vadd.f32 %v1872_v33, %v7672_v55  ;;  %v1874_v18 = vpop.f32.mrb[66].mxu0  ;;  %v2260_v21 = vpop.f32.mrb[66].mxu1  ;;  %v6713_v57 = vadd.f32 %v2258_v37, %v7678_v12 }
 0x255   :  { %v2415_v6 = vmax.f32 %v6648_v15, 0.0  ;;  %v6650_v10 = vadd.f32 %v1874_v18, %v7664_v27  ;;  %v1876_v61 = vpop.f32.mrb[67].mxu0  ;;  %v2262_v2 = vpop.f32.mrb[67].mxu1  ;;  %v2417_v59 = vmax.f32 %v6712_v60, 0.0  ;;  %v6714_v9 = vadd.f32 %v2260_v21, %v7668_v11 }
 0x256   :  { %v2416_v49 = vmax.f32 %v6649_v48, 0.0  ;;  %v6651_v4 = vadd.f32 %v1876_v61, %v7672_v55  ;;  %v6715_v1 = vadd.f32 %v2262_v2, %v7678_v12  ;;  %v2418_v17 = vmax.f32 %v6713_v57, 0.0 }
 0x257   :  { %v2582_v7 = vmul.f32 %v7682_v56, %v2415_v6  ;;  %v2419_v34 = vmax.f32 %v6650_v10, 0.0  ;;  %v2584_v14 = vmul.f32 %v7690_v53, %v2417_v59  ;;  %v2421_v28 = vmax.f32 %v6714_v9, 0.0 }
 0x258   :  { %v2583_v0 = vmul.f32 %v7687_v41, %v2416_v49  ;;  %v2420_v13 = vmax.f32 %v6651_v4, 0.0  ;;  %v2422_v46 = vmax.f32 %v6715_v1, 0.0  ;;  %v2585_v8 = vmul.f32 %v7701_v16, %v2418_v17 }
 0x259   :  { %v2586_v5 = vmul.f32 %v7682_v56, %v2419_v34  ;;  %v2588_v58 = vmul.f32 %v7690_v53, %v2421_v28 }
 0x25a   :  { %v2587_v19 = vmul.f32 %v7687_v41, %v2420_v13  ;;  %v1880_v20 = vpop.f32.mrb[68].mxu0  ;;  %v2266_v23 = vpop.f32.mrb[68].mxu1  ;;  %v2710_v25 = vadd.f32 %v2583_v0, %v2582_v7  ;;  %v2589_v37 = vmul.f32 %v7701_v16, %v2422_v46 }
 0x25b   :  { %v6652_v32 = vadd.f32 %v1880_v20, %v7664_v27  ;;  %v6716_v35 = vadd.f32 %v2266_v23, %v7668_v11  ;;  %v1882_v36 = vpop.f32.mrb[69].mxu0  ;;  %v2268_v38 = vpop.f32.mrb[69].mxu1 }
 0x25c   :  { %v2715_v40 = vadd.f32 %v2587_v19, %v2586_v5  ;;  %v6653_v43 = vadd.f32 %v1882_v36, %v7672_v55  ;;  %v1884_v31 = vpop.f32.mrb[70].mxu0  ;;  %v2270_v44 = vpop.f32.mrb[70].mxu1  ;;  %v2711_v45 = vadd.f32 %v2710_v25, %v2584_v14  ;;  %v6717_v42 = vadd.f32 %v2268_v38, %v7678_v12 }
 0x25d   :  { %v2423_v51 = vmax.f32 %v6652_v32, 0.0  ;;  %v6654_v50 = vadd.f32 %v1884_v31, %v7664_v27  ;;  %v6718_v54 = vadd.f32 %v2270_v44, %v7668_v11  ;;  %v1886_v63 = vpop.f32.mrb[71].mxu0  ;;  %v2272_v62 = vpop.f32.mrb[71].mxu1  ;;  %v2425_v3 = vmax.f32 %v6716_v35, 0.0 }
 0x25e   :  { %v2424_v47 = vmax.f32 %v6653_v43, 0.0  ;;  %v6655_v24 = vadd.f32 %v1886_v63, %v7672_v55  ;;  %v6719_v60 = vadd.f32 %v2272_v62, %v7678_v12  ;;  %v2712_v33 = vadd.f32 %v2711_v45, %v2585_v8 }
 0x25f   :  { %v2590_v39 = vmul.f32 %v7682_v56, %v2423_v51  ;;  %v2427_v22 = vmax.f32 %v6654_v50, 0.0  ;;  %v2429_v18 = vmax.f32 %v6718_v54, 0.0  ;;  %v2716_v21 = vadd.f32 %v2715_v40, %v2588_v58 }
 0x260   :  { %v2591_v26 = vmul.f32 %v7687_v41, %v2424_v47  ;;  %v2428_v15 = vmax.f32 %v6655_v24, 0.0  ;;  %v2592_v6 = vmul.f32 %v7690_v53, %v2425_v3  ;;  %2713 = vadd.xlane.f32.xlu0 %v2712_v33  ;;  %v2426_v59 = vmax.f32 %v6717_v42, 0.0 }
 0x261   :  { %v2594_v48 = vmul.f32 %v7682_v56, %v2427_v22  ;;  %v2717_v34 = vadd.f32 %v2716_v21, %v2589_v37  ;;  %v2430_v0 = vmax.f32 %v6719_v60, 0.0  ;;  %v2596_v17 = vmul.f32 %v7690_v53, %v2429_v18 }
 0x262   :  { %v2595_v10 = vmul.f32 %v7687_v41, %v2428_v15  ;;  %v1890_v61 = vpop.f32.mrb[72].mxu0  ;;  %v2276_v2 = vpop.f32.mrb[72].mxu1  ;;  %v2720_v52 = vadd.f32 %v2591_v26, %v2590_v39  ;;  %v2593_v44 = vmul.f32 %v7701_v16, %v2426_v59 }
 0x263   :  { %v6656_v49 = vadd.f32 %v1890_v61, %v7664_v27  ;;  %v6720_v57 = vadd.f32 %v2276_v2, %v7668_v11  ;;  %v1892_v4 = vpop.f32.mrb[73].mxu0  ;;  %v2278_v7 = vpop.f32.mrb[73].mxu1  ;;  %v2597_v45 = vmul.f32 %v7701_v16, %v2430_v0 }
 0x264   :  { %v2725_v9 = vadd.f32 %v2595_v10, %v2594_v48  ;;  %v6657_v13 = vadd.f32 %v1892_v4, %v7672_v55  ;;  %v1894_v5 = vpop.f32.mrb[74].mxu0  ;;  %v2280_v1 = vpop.f32.mrb[74].mxu1  ;;  %v2721_v14 = vadd.f32 %v2720_v52, %v2592_v6  ;;  %v6721_v20 = vadd.f32 %v2278_v7, %v7678_v12  ;;  %2718 = vadd.xlane.f32.xlu0 %v2717_v34 }
 0x265   :  { %v2431_v19 = vmax.f32 %v6656_v49, 0.0  ;;  %v6658_v23 = vadd.f32 %v1894_v5, %v7664_v27  ;;  %v1896_v25 = vpop.f32.mrb[75].mxu0  ;;  %v2282_v28 = vpop.f32.mrb[75].mxu1  ;;  %v2433_v32 = vmax.f32 %v6720_v57, 0.0  ;;  %v6722_v36 = vadd.f32 %v2280_v1, %v7668_v11 }
 0x266   :  { %v2432_v35 = vmax.f32 %v6657_v13, 0.0  ;;  %v6659_v38 = vadd.f32 %v1896_v25, %v7672_v55  ;;  %v6723_v31 = vadd.f32 %v2282_v28, %v7678_v12  ;;  %v2434_v50 = vmax.f32 %v6721_v20, 0.0 }
 0x267   :  { %v2598_v40 = vmul.f32 %v7682_v56, %v2431_v19  ;;  %v2435_v43 = vmax.f32 %v6658_v23, 0.0  ;;  %v2722_v63 = vadd.f32 %v2721_v14, %v2593_v44  ;;  %v2726_v62 = vadd.f32 %v2725_v9, %v2596_v17 }
 0x268   :  { %v2599_v46 = vmul.f32 %v7687_v41, %v2432_v35  ;;  %v2436_v51 = vmax.f32 %v6659_v38, 0.0  ;;  %v2600_v3 = vmul.f32 %v7690_v53, %v2433_v32  ;;  %v2437_v24 = vmax.f32 %v6722_v36, 0.0 }
 0x269   :  { %v2602_v54 = vmul.f32 %v7682_v56, %v2435_v43  ;;  %v2438_v42 = vmax.f32 %v6723_v31, 0.0  ;;  %2723 = vadd.xlane.f32.xlu1 %v2722_v63  ;;  %v2727_v33 = vadd.f32 %v2726_v62, %v2597_v45  ;;  %v2601_v49 = vmul.f32 %v7701_v16, %v2434_v50 }
 0x26a   :  { %v2730_v47 = vadd.f32 %v2599_v46, %v2598_v40  ;;  %v2603_v8 = vmul.f32 %v7687_v41, %v2436_v51  ;;  %v1900_v58 = vpop.f32.mrb[76].mxu0  ;;  %v2286_v39 = vpop.f32.mrb[76].mxu1  ;;  %v2604_v34 = vmul.f32 %v7690_v53, %v2437_v24 }
 0x26b   :  { %v6660_v22 = vadd.f32 %v1900_v58, %v7664_v27  ;;  %v6724_v26 = vadd.f32 %v2286_v39, %v7668_v11  ;;  %v1902_v15 = vpop.f32.mrb[77].mxu0  ;;  %v2288_v60 = vpop.f32.mrb[77].mxu1  ;;  %v2605_v5 = vmul.f32 %v7701_v16, %v2438_v42 }
 0x26c   :  { %v2735_v37 = vadd.f32 %v2603_v8, %v2602_v54  ;;  %v6661_v48 = vadd.f32 %v1902_v15, %v7672_v55  ;;  %v6725_v18 = vadd.f32 %v2288_v60, %v7678_v12  ;;  %v1904_v21 = vpop.f32.mrb[78].mxu0  ;;  %v2290_v6 = vpop.f32.mrb[78].mxu1  ;;  %v2731_v10 = vadd.f32 %v2730_v47, %v2600_v3 }
 0x26d   :  { %v2439_v61 = vmax.f32 %v6660_v22, 0.0  ;;  %v6662_v2 = vadd.f32 %v1904_v21, %v7664_v27  ;;  %v1906_v52 = vpop.f32.mrb[79].mxu0  ;;  %v2292_v59 = vpop.f32.mrb[79].mxu1  ;;  %v2441_v57 = vmax.f32 %v6724_v26, 0.0  ;;  %v6726_v13 = vadd.f32 %v2290_v6, %v7668_v11  ;;  %2728 = vadd.xlane.f32.xlu1 %v2727_v33 }
 0x26e   :  { %v2440_v4 = vmax.f32 %v6661_v48, 0.0  ;;  %v6663_v7 = vadd.f32 %v1906_v52, %v7672_v55  ;;  %v2442_v14 = vmax.f32 %v6725_v18, 0.0  ;;  %v6727_v20 = vadd.f32 %v2292_v59, %v7678_v12 }
 0x26f   :  { %v2606_v9 = vmul.f32 %v7682_v56, %v2439_v61  ;;  %v2443_v0 = vmax.f32 %v6662_v2, 0.0  ;;  %v2732_v23 = vadd.f32 %v2731_v10, %v2601_v49  ;;  %v2736_v25 = vadd.f32 %v2735_v37, %v2604_v34 }
 0x270   :  { %v2607_v1 = vmul.f32 %v7687_v41, %v2440_v4  ;;  %v2444_v17 = vmax.f32 %v6663_v7, 0.0  ;;  %v2608_v28 = vmul.f32 %v7690_v53, %v2441_v57  ;;  %v2445_v40 = vmax.f32 %v6726_v13, 0.0 }
 0x271   :  { %v2610_v19 = vmul.f32 %v7682_v56, %v2443_v0  ;;  %2733 = vadd.xlane.f32.xlu0 %v2732_v23  ;;  %v2737_v44 = vadd.f32 %v2736_v25, %v2605_v5  ;;  %v2609_v3 = vmul.f32 %v7701_v16, %v2442_v14  ;;  %v2446_v47 = vmax.f32 %v6727_v20, 0.0 }
 0x272   :  { %v2740_v32 = vadd.f32 %v2607_v1, %v2606_v9  ;;  %v2611_v35 = vmul.f32 %v7687_v41, %v2444_v17  ;;  %v1910_v36 = vpop.f32.mrb[80].mxu0  ;;  %v2296_v38 = vpop.f32.mrb[80].mxu1  ;;  %v2612_v60 = vmul.f32 %v7690_v53, %v2445_v40 }
 0x273   :  { %v6664_v43 = vadd.f32 %v1910_v36, %v7664_v27  ;;  %v6728_v31 = vadd.f32 %v2296_v38, %v7668_v11  ;;  %v1912_v45 = vpop.f32.mrb[81].mxu0  ;;  %v2298_v46 = vpop.f32.mrb[81].mxu1  ;;  %2738 = vadd.xlane.f32.xlu1 %v2737_v44  ;;  %v2613_v10 = vmul.f32 %v7701_v16, %v2446_v47 }
 0x274   :  { %v2745_v51 = vadd.f32 %v2611_v35, %v2610_v19  ;;  %v6665_v50 = vadd.f32 %v1912_v45, %v7672_v55  ;;  %v1914_v54 = vpop.f32.mrb[82].mxu0  ;;  %v2300_v63 = vpop.f32.mrb[82].mxu1  ;;  %v2741_v62 = vadd.f32 %v2740_v32, %v2608_v28  ;;  %v6729_v26 = vadd.f32 %v2298_v46, %v7678_v12 }
 0x275   :  { %v2447_v24 = vmax.f32 %v6664_v43, 0.0  ;;  %v6666_v8 = vadd.f32 %v1914_v54, %v7664_v27  ;;  %v1916_v58 = vpop.f32.mrb[83].mxu0  ;;  %v2302_v39 = vpop.f32.mrb[83].mxu1  ;;  %v2449_v42 = vmax.f32 %v6728_v31, 0.0  ;;  %v6730_v48 = vadd.f32 %v2300_v63, %v7668_v11 }
 0x276   :  { %v2448_v22 = vmax.f32 %v6665_v50, 0.0  ;;  %v6667_v15 = vadd.f32 %v1916_v58, %v7672_v55  ;;  %v6731_v6 = vadd.f32 %v2302_v39, %v7678_v12  ;;  %v2742_v2 = vadd.f32 %v2741_v62, %v2609_v3 }
 0x277   :  { %v2614_v33 = vmul.f32 %v7682_v56, %v2447_v24  ;;  %v2451_v37 = vmax.f32 %v6666_v8, 0.0  ;;  %v2746_v52 = vadd.f32 %v2745_v51, %v2612_v60  ;;  %v2616_v59 = vmul.f32 %v7690_v53, %v2449_v42 }
 0x278   :  { %v2615_v18 = vmul.f32 %v7687_v41, %v2448_v22  ;;  %v2452_v21 = vmax.f32 %v6667_v15, 0.0  ;;  %v2450_v57 = vmax.f32 %v6729_v26, 0.0  ;;  %v2453_v9 = vmax.f32 %v6730_v48, 0.0  ;;  %2743 = vadd.xlane.f32.xlu0 %v2742_v2 }
 0x279   :  { %v2618_v61 = vmul.f32 %v7682_v56, %v2451_v37  ;;  %v2747_v5 = vadd.f32 %v2746_v52, %v2613_v10  ;;  %v2454_v19 = vmax.f32 %v6731_v6, 0.0 }
 0x27a   :  { %v2750_v49 = vadd.f32 %v2615_v18, %v2614_v33  ;;  %v2619_v4 = vmul.f32 %v7687_v41, %v2452_v21  ;;  %v1920_v7 = vpop.f32.mrb[84].mxu0  ;;  %v2306_v34 = vpop.f32.mrb[84].mxu1  ;;  %v2617_v43 = vmul.f32 %v7701_v16, %v2450_v57  ;;  %v2620_v46 = vmul.f32 %v7690_v53, %v2453_v9 }
 0x27b   :  { %v6668_v0 = vadd.f32 %v1920_v7, %v7664_v27  ;;  %v6732_v13 = vadd.f32 %v2306_v34, %v7668_v11  ;;  %v1922_v1 = vpop.f32.mrb[85].mxu0  ;;  %v2308_v14 = vpop.f32.mrb[85].mxu1  ;;  %2748 = vadd.xlane.f32.xlu1 %v2747_v5  ;;  %v2621_v63 = vmul.f32 %v7701_v16, %v2454_v19 }
 0x27c   :  { %v2755_v17 = vadd.f32 %v2619_v4, %v2618_v61  ;;  %v6669_v20 = vadd.f32 %v1922_v1, %v7672_v55  ;;  %v1924_v23 = vpop.f32.mrb[86].mxu0  ;;  %v2310_v25 = vpop.f32.mrb[86].mxu1  ;;  %v2751_v28 = vadd.f32 %v2750_v49, %v2616_v59  ;;  %v6733_v35 = vadd.f32 %v2308_v14, %v7678_v12 }
 0x27d   :  { %v2455_v32 = vmax.f32 %v6668_v0, 0.0  ;;  %v6670_v36 = vadd.f32 %v1924_v23, %v7664_v27  ;;  %v1926_v38 = vpop.f32.mrb[87].mxu0  ;;  %v2312_v40 = vpop.f32.mrb[87].mxu1  ;;  %v2457_v31 = vmax.f32 %v6732_v13, 0.0  ;;  %v6734_v54 = vadd.f32 %v2310_v25, %v7668_v11 }
 0x27e   :  { %v2456_v44 = vmax.f32 %v6669_v20, 0.0  ;;  %v6671_v45 = vadd.f32 %v1926_v38, %v7672_v55  ;;  %v6735_v47 = vadd.f32 %v2312_v40, %v7678_v12  ;;  %v2458_v24 = vmax.f32 %v6733_v35, 0.0 }
 0x27f   :  { %v2622_v51 = vmul.f32 %v7682_v56, %v2455_v32  ;;  %v2459_v50 = vmax.f32 %v6670_v36, 0.0  ;;  %v2752_v58 = vadd.f32 %v2751_v28, %v2617_v43  ;;  %v2756_v39 = vadd.f32 %v2755_v17, %v2620_v46 }
 0x280   :  { %v2623_v62 = vmul.f32 %v7687_v41, %v2456_v44  ;;  %v2460_v3 = vmax.f32 %v6671_v45, 0.0  ;;  %v2624_v42 = vmul.f32 %v7690_v53, %v2457_v31  ;;  %v2461_v33 = vmax.f32 %v6734_v54, 0.0 }
 0x281   :  { %v2626_v8 = vmul.f32 %v7682_v56, %v2459_v50  ;;  %2753 = vadd.xlane.f32.xlu0 %v2752_v58  ;;  %v2757_v18 = vadd.f32 %v2756_v39, %v2621_v63  ;;  %v2462_v61 = vmax.f32 %v6735_v47, 0.0  ;;  %v2625_v57 = vmul.f32 %v7701_v16, %v2458_v24 }
 0x282   :  { %v2760_v22 = vadd.f32 %v2623_v62, %v2622_v51  ;;  %v2627_v26 = vmul.f32 %v7687_v41, %v2460_v3  ;;  %v1930_v15 = vpop.f32.mrb[88].mxu0  ;;  %v2316_v60 = vpop.f32.mrb[88].mxu1  ;;  %v2628_v17 = vmul.f32 %v7690_v53, %v2461_v33 }
 0x283   :  { %v6672_v37 = vadd.f32 %v1930_v15, %v7664_v27  ;;  %v6736_v48 = vadd.f32 %v2316_v60, %v7668_v11  ;;  %v1932_v21 = vpop.f32.mrb[89].mxu0  ;;  %v2318_v6 = vpop.f32.mrb[89].mxu1  ;;  %2758 = vadd.xlane.f32.xlu1 %v2757_v18  ;;  %v2629_v25 = vmul.f32 %v7701_v16, %v2462_v61 }
 0x284   :  { %v2765_v10 = vadd.f32 %v2627_v26, %v2626_v8  ;;  %v6673_v2 = vadd.f32 %v1932_v21, %v7672_v55  ;;  %v1934_v52 = vpop.f32.mrb[90].mxu0  ;;  %v2320_v59 = vpop.f32.mrb[90].mxu1  ;;  %v2761_v49 = vadd.f32 %v2760_v22, %v2624_v42  ;;  %v6737_v7 = vadd.f32 %v2318_v6, %v7678_v12 }
 0x285   :  { %v2463_v4 = vmax.f32 %v6672_v37, 0.0  ;;  %v6674_v34 = vadd.f32 %v1934_v52, %v7664_v27  ;;  %v1936_v9 = vpop.f32.mrb[91].mxu0  ;;  %v2322_v0 = vpop.f32.mrb[91].mxu1  ;;  %v2465_v13 = vmax.f32 %v6736_v48, 0.0  ;;  %v6738_v1 = vadd.f32 %v2320_v59, %v7668_v11 }
 0x286   :  { %v2464_v5 = vmax.f32 %v6673_v2, 0.0  ;;  %v6675_v14 = vadd.f32 %v1936_v9, %v7672_v55  ;;  %v6739_v23 = vadd.f32 %v2322_v0, %v7678_v12  ;;  %v2466_v35 = vmax.f32 %v6737_v7, 0.0 }
 0x287   :  { %v2630_v19 = vmul.f32 %v7682_v56, %v2463_v4  ;;  %v2467_v20 = vmax.f32 %v6674_v34, 0.0  ;;  %v2762_v38 = vadd.f32 %v2761_v49, %v2625_v57  ;;  %v2766_v40 = vadd.f32 %v2765_v10, %v2628_v17 }
 0x288   :  { %v2631_v28 = vmul.f32 %v7687_v41, %v2464_v5  ;;  %v2468_v32 = vmax.f32 %v6675_v14, 0.0  ;;  %v2632_v43 = vmul.f32 %v7690_v53, %v2465_v13  ;;  %v2469_v44 = vmax.f32 %v6738_v1, 0.0 }
 0x289   :  { %v2634_v36 = vmul.f32 %v7682_v56, %v2467_v20  ;;  %v2470_v50 = vmax.f32 %v6739_v23, 0.0  ;;  %2763 = vadd.xlane.f32.xlu0 %v2762_v38  ;;  %v2767_v62 = vadd.f32 %v2766_v40, %v2629_v25  ;;  %v2633_v37 = vmul.f32 %v7701_v16, %v2466_v35 }
 0x28a   :  { %v2770_v31 = vadd.f32 %v2631_v28, %v2630_v19  ;;  %v2635_v45 = vmul.f32 %v7687_v41, %v2468_v32  ;;  %v1940_v46 = vpop.f32.mrb[92].mxu0  ;;  %v2326_v51 = vpop.f32.mrb[92].mxu1  ;;  %v2636_v6 = vmul.f32 %v7690_v53, %v2469_v44 }
 0x28b   :  { %v6676_v54 = vadd.f32 %v1940_v46, %v7664_v27  ;;  %v6740_v63 = vadd.f32 %v2326_v51, %v7668_v11  ;;  %v1942_v3 = vpop.f32.mrb[93].mxu0  ;;  %v2328_v47 = vpop.f32.mrb[93].mxu1  ;;  %2768 = vadd.xlane.f32.xlu1 %v2767_v62  ;;  %v2637_v52 = vmul.f32 %v7701_v16, %v2470_v50 }
 0x28c   :  { %v2775_v24 = vadd.f32 %v2635_v45, %v2634_v36  ;;  %v6677_v8 = vadd.f32 %v1942_v3, %v7672_v55  ;;  %v6741_v58 = vadd.f32 %v2328_v47, %v7678_v12  ;;  %v1944_v39 = vpop.f32.mrb[94].mxu0  ;;  %v2330_v42 = vpop.f32.mrb[94].mxu1  ;;  %v2771_v22 = vadd.f32 %v2770_v31, %v2632_v43 }
 0x28d   :  { %v2471_v26 = vmax.f32 %v6676_v54, 0.0  ;;  %v6678_v15 = vadd.f32 %v1944_v39, %v7664_v27  ;;  %v1946_v60 = vpop.f32.mrb[95].mxu0  ;;  %v2332_v33 = vpop.f32.mrb[95].mxu1  ;;  %v2473_v48 = vmax.f32 %v6740_v63, 0.0  ;;  %v6742_v2 = vadd.f32 %v2330_v42, %v7668_v11 }
 0x28e   :  { %v2472_v18 = vmax.f32 %v6677_v8, 0.0  ;;  %v6679_v21 = vadd.f32 %v1946_v60, %v7672_v55  ;;  %v2474_v49 = vmax.f32 %v6741_v58, 0.0  ;;  %v6743_v7 = vadd.f32 %v2332_v33, %v7678_v12 }
 0x28f   :  { %v2638_v10 = vmul.f32 %v7682_v56, %v2471_v26  ;;  %v2475_v61 = vmax.f32 %v6678_v15, 0.0  ;;  %v2772_v34 = vadd.f32 %v2771_v22, %v2633_v37  ;;  %v2776_v9 = vadd.f32 %v2775_v24, %v2636_v6 }
 0x290   :  { %v2639_v59 = vmul.f32 %v7687_v41, %v2472_v18  ;;  %v2476_v57 = vmax.f32 %v6679_v21, 0.0  ;;  %v2640_v0 = vmul.f32 %v7690_v53, %v2473_v48  ;;  %v2477_v17 = vmax.f32 %v6742_v2, 0.0 }
 0x291   :  { %v2642_v4 = vmul.f32 %v7682_v56, %v2475_v61  ;;  %2773 = vadd.xlane.f32.xlu0 %v2772_v34  ;;  %v2777_v23 = vadd.f32 %v2776_v9, %v2637_v52  ;;  %v2641_v43 = vmul.f32 %v7701_v16, %v2474_v49  ;;  %v2478_v31 = vmax.f32 %v6743_v7, 0.0 }
 0x292   :  { %v2780_v13 = vadd.f32 %v2639_v59, %v2638_v10  ;;  %v2643_v5 = vmul.f32 %v7687_v41, %v2476_v57  ;;  %v1950_v1 = vpop.f32.mrb[96].mxu0  ;;  %v2336_v14 = vpop.f32.mrb[96].mxu1  ;;  %v2644_v3 = vmul.f32 %v7690_v53, %v2477_v17 }
 0x293   :  { %v6680_v19 = vadd.f32 %v1950_v1, %v7664_v27  ;;  %v6744_v20 = vadd.f32 %v2336_v14, %v7668_v11  ;;  %v1952_v25 = vpop.f32.mrb[97].mxu0  ;;  %v2338_v28 = vpop.f32.mrb[97].mxu1  ;;  %2778 = vadd.xlane.f32.xlu1 %v2777_v23  ;;  %v2645_v22 = vmul.f32 %v7701_v16, %v2478_v31 }
 0x294   :  { %v2785_v32 = vadd.f32 %v2643_v5, %v2642_v4  ;;  %v6681_v35 = vadd.f32 %v1952_v25, %v7672_v55  ;;  %v1954_v36 = vpop.f32.mrb[98].mxu0  ;;  %v2340_v38 = vpop.f32.mrb[98].mxu1  ;;  %v2781_v40 = vadd.f32 %v2780_v13, %v2640_v0  ;;  %v6745_v63 = vadd.f32 %v2338_v28, %v7678_v12 }
 0x295   :  { %v2479_v44 = vmax.f32 %v6680_v19, 0.0  ;;  %v6682_v45 = vadd.f32 %v1954_v36, %v7664_v27  ;;  %v1956_v46 = vpop.f32.mrb[99].mxu0  ;;  %v2342_v51 = vpop.f32.mrb[99].mxu1  ;;  %v2481_v50 = vmax.f32 %v6744_v20, 0.0  ;;  %v6746_v8 = vadd.f32 %v2340_v38, %v7668_v11 }
 0x296   :  { %v2480_v54 = vmax.f32 %v6681_v35, 0.0  ;;  %v6683_v62 = vadd.f32 %v1956_v46, %v7672_v55  ;;  %v6747_v42 = vadd.f32 %v2342_v51, %v7678_v12  ;;  %v2782_v15 = vadd.f32 %v2781_v40, %v2641_v43 }
 0x297   :  { %v2646_v47 = vmul.f32 %v7682_v56, %v2479_v44  ;;  %v2483_v24 = vmax.f32 %v6682_v45, 0.0  ;;  %v2786_v60 = vadd.f32 %v2785_v32, %v2644_v3  ;;  %v2648_v33 = vmul.f32 %v7690_v53, %v2481_v50 }
 0x298   :  { %v2647_v58 = vmul.f32 %v7687_v41, %v2480_v54  ;;  %v2484_v39 = vmax.f32 %v6683_v62, 0.0  ;;  %v2482_v48 = vmax.f32 %v6745_v63, 0.0  ;;  %v2485_v10 = vmax.f32 %v6746_v8, 0.0  ;;  %2783 = vadd.xlane.f32.xlu0 %v2782_v15 }
 0x299   :  { %v2650_v26 = vmul.f32 %v7682_v56, %v2483_v24  ;;  %v7835_v49 = vadd.f32 %v2786_v60, %v2645_v22  ;;  %v2486_v4 = vmax.f32 %v6747_v42, 0.0 }
 0x29a   :  { %v2790_v37 = vadd.f32 %v2647_v58, %v2646_v47  ;;  %v2651_v18 = vmul.f32 %v7687_v41, %v2484_v39  ;;  %v1960_v21 = vpop.f32.mrb[100].mxu0  ;;  %v2346_v6 = vpop.f32.mrb[100].mxu1  ;;  %v2649_v19 = vmul.f32 %v7701_v16, %v2482_v48  ;;  %v2652_v28 = vmul.f32 %v7690_v53, %v2485_v10 }
 0x29b   :  { %v6684_v61 = vadd.f32 %v1960_v21, %v7664_v27  ;;  %v6748_v2 = vadd.f32 %v2346_v6, %v7668_v11  ;;  %v1962_v52 = vpop.f32.mrb[101].mxu0  ;;  %v2348_v59 = vpop.f32.mrb[101].mxu1  ;;  %v2653_v38 = vmul.f32 %v7701_v16, %v2486_v4 }
 0x29c   :  { %v2795_v57 = vadd.f32 %v2651_v18, %v2650_v26  ;;  %v6685_v7 = vadd.f32 %v1962_v52, %v7672_v55  ;;  %v1964_v34 = vpop.f32.mrb[102].mxu0  ;;  %v2350_v9 = vpop.f32.mrb[102].mxu1  ;;  %v2791_v0 = vadd.f32 %v2790_v37, %v2648_v33  ;;  %v6749_v5 = vadd.f32 %v2348_v59, %v7678_v12 }
 0x29d   :  { %v2487_v13 = vmax.f32 %v6684_v61, 0.0  ;;  %v6686_v1 = vadd.f32 %v1964_v34, %v7664_v27  ;;  %v1966_v14 = vpop.f32.mrb[103].mxu0  ;;  %v2352_v17 = vpop.f32.mrb[103].mxu1  ;;  %v2489_v20 = vmax.f32 %v6748_v2, 0.0  ;;  %v6750_v36 = vadd.f32 %v2350_v9, %v7668_v11 }
 0x29e   :  { %v2488_v23 = vmax.f32 %v6685_v7, 0.0  ;;  %v6687_v25 = vadd.f32 %v1966_v14, %v7672_v55  ;;  %v6751_v31 = vadd.f32 %v2352_v17, %v7678_v12  ;;  %v2490_v44 = vmax.f32 %v6749_v5, 0.0 }
 0x29f   :  { %v2654_v32 = vmul.f32 %v7682_v56, %v2487_v13  ;;  %v2491_v35 = vmax.f32 %v6686_v1, 0.0  ;;  %v2792_v46 = vadd.f32 %v2791_v0, %v2649_v19  ;;  %v2796_v51 = vadd.f32 %v2795_v57, %v2652_v28 }
 0x2a0   :  { %v2655_v40 = vmul.f32 %v7687_v41, %v2488_v23  ;;  %v2492_v43 = vmax.f32 %v6687_v25, 0.0  ;;  %v2656_v50 = vmul.f32 %v7690_v53, %v2489_v20  ;;  %v2493_v47 = vmax.f32 %v6750_v36, 0.0 }
 0x2a1   :  { %v2658_v45 = vmul.f32 %v7682_v56, %v2491_v35  ;;  %2793 = vadd.xlane.f32.xlu1 %v2792_v46  ;;  %v2797_v58 = vadd.f32 %v2796_v51, %v2653_v38  ;;  %v2494_v26 = vmax.f32 %v6751_v31, 0.0  ;;  %v2657_v48 = vmul.f32 %v7701_v16, %v2490_v44 }
 0x2a2   :  { %v2800_v54 = vadd.f32 %v2655_v40, %v2654_v32  ;;  %v2659_v63 = vmul.f32 %v7687_v41, %v2492_v43  ;;  %v1970_v62 = vpop.f32.mrb[104].mxu0  ;;  %v2356_v3 = vpop.f32.mrb[104].mxu1  ;;  %v2660_v4 = vmul.f32 %v7690_v53, %v2493_v47 }
 0x2a3   :  { %v6688_v24 = vadd.f32 %v1970_v62, %v7664_v27  ;;  %v6752_v8 = vadd.f32 %v2356_v3, %v7668_v11  ;;  %v1972_v39 = vpop.f32.mrb[105].mxu0  ;;  %v2358_v42 = vpop.f32.mrb[105].mxu1  ;;  %2798 = vadd.xlane.f32.xlu0 %v2797_v58  ;;  %v2661_v0 = vmul.f32 %v7701_v16, %v2494_v26 }
 0x2a4   :  { %v2805_v22 = vadd.f32 %v2659_v63, %v2658_v45  ;;  %v6689_v15 = vadd.f32 %v1972_v39, %v7672_v55  ;;  %v1974_v60 = vpop.f32.mrb[106].mxu0  ;;  %v2360_v33 = vpop.f32.mrb[106].mxu1  ;;  %v2801_v37 = vadd.f32 %v2800_v54, %v2656_v50  ;;  %v6753_v21 = vadd.f32 %v2358_v42, %v7678_v12 }
 0x2a5   :  { %v2495_v18 = vmax.f32 %v6688_v24, 0.0  ;;  %v6690_v6 = vadd.f32 %v1974_v60, %v7664_v27  ;;  %v1976_v10 = vpop.f32.mrb[107].mxu0  ;;  %v2362_v61 = vpop.f32.mrb[107].mxu1  ;;  %v2497_v2 = vmax.f32 %v6752_v8, 0.0  ;;  %v6754_v59 = vadd.f32 %v2360_v33, %v7668_v11 }
 0x2a6   :  { %v2496_v52 = vmax.f32 %v6689_v15, 0.0  ;;  %v6691_v57 = vadd.f32 %v1976_v10, %v7672_v55  ;;  %v6755_v9 = vadd.f32 %v2362_v61, %v7678_v12  ;;  %v2498_v1 = vmax.f32 %v6753_v21, 0.0 }
 0x2a7   :  { %v2662_v7 = vmul.f32 %v7682_v56, %v2495_v18  ;;  %v2499_v34 = vmax.f32 %v6690_v6, 0.0  ;;  %v2802_v17 = vadd.f32 %v2801_v37, %v2657_v48  ;;  %v2806_v19 = vadd.f32 %v2805_v22, %v2660_v4 }
 0x2a8   :  { %v2663_v13 = vmul.f32 %v7687_v41, %v2496_v52  ;;  %v2500_v5 = vmax.f32 %v6691_v57, 0.0  ;;  %v2664_v20 = vmul.f32 %v7690_v53, %v2497_v2  ;;  %v2501_v25 = vmax.f32 %v6754_v59, 0.0 }
 0x2a9   :  { %v2666_v14 = vmul.f32 %v7682_v56, %v2499_v34  ;;  %v2502_v36 = vmax.f32 %v6755_v9, 0.0  ;;  %2803 = vadd.xlane.f32.xlu1 %v2802_v17  ;;  %v2807_v43 = vadd.f32 %v2806_v19, %v2661_v0  ;;  %v2665_v8 = vmul.f32 %v7701_v16, %v2498_v1 }
 0x2aa   :  { %v2810_v23 = vadd.f32 %v2663_v13, %v2662_v7  ;;  %v2667_v28 = vmul.f32 %v7687_v41, %v2500_v5  ;;  %v1980_v32 = vpop.f32.mrb[108].mxu0  ;;  %v2366_v35 = vpop.f32.mrb[108].mxu1  ;;  %v2668_v22 = vmul.f32 %v7690_v53, %v2501_v25 }
 0x2ab   :  { %v6692_v38 = vadd.f32 %v1980_v32, %v7664_v27  ;;  %v6756_v40 = vadd.f32 %v2366_v35, %v7668_v11  ;;  %v1982_v31 = vpop.f32.mrb[109].mxu0  ;;  %v2368_v44 = vpop.f32.mrb[109].mxu1  ;;  %2808 = vadd.xlane.f32.xlu0 %v2807_v43  ;;  %v2669_v33 = vmul.f32 %v7701_v16, %v2502_v36 }
 0x2ac   :  { %v2815_v45 = vadd.f32 %v2667_v28, %v2666_v14  ;;  %v6693_v46 = vadd.f32 %v1982_v31, %v7672_v55  ;;  %v6757_v51 = vadd.f32 %v2368_v44, %v7678_v12  ;;  %v1984_v50 = vpop.f32.mrb[110].mxu0  ;;  %v2370_v54 = vpop.f32.mrb[110].mxu1  ;;  %v2811_v63 = vadd.f32 %v2810_v23, %v2664_v20 }
 0x2ad   :  { %v2503_v62 = vmax.f32 %v6692_v38, 0.0  ;;  %v6694_v3 = vadd.f32 %v1984_v50, %v7664_v27  ;;  %v1986_v47 = vpop.f32.mrb[111].mxu0  ;;  %v2372_v24 = vpop.f32.mrb[111].mxu1  ;;  %v2505_v58 = vmax.f32 %v6756_v40, 0.0  ;;  %v6758_v60 = vadd.f32 %v2370_v54, %v7668_v11 }
 0x2ae   :  { %v2504_v39 = vmax.f32 %v6693_v46, 0.0  ;;  %v6695_v42 = vadd.f32 %v1986_v47, %v7672_v55  ;;  %v2506_v48 = vmax.f32 %v6757_v51, 0.0  ;;  %v6759_v6 = vadd.f32 %v2372_v24, %v7678_v12 }
 0x2af   :  { %v2670_v26 = vmul.f32 %v7682_v56, %v2503_v62  ;;  %v2507_v15 = vmax.f32 %v6694_v3, 0.0  ;;  %v2812_v10 = vadd.f32 %v2811_v63, %v2665_v8  ;;  %v2816_v61 = vadd.f32 %v2815_v45, %v2668_v22 }
 0x2b0   :  { %v2671_v37 = vmul.f32 %v7687_v41, %v2504_v39  ;;  %v2508_v18 = vmax.f32 %v6695_v42, 0.0  ;;  %v2672_v2 = vmul.f32 %v7690_v53, %v2505_v58  ;;  %v2509_v7 = vmax.f32 %v6758_v60, 0.0 }
 0x2b1   :  { %v2674_v21 = vmul.f32 %v7682_v56, %v2507_v15  ;;  %2813 = vadd.xlane.f32.xlu1 %v2812_v10  ;;  %v2817_v0 = vadd.f32 %v2816_v61, %v2669_v33  ;;  %v2673_v23 = vmul.f32 %v7701_v16, %v2506_v48  ;;  %v2510_v25 = vmax.f32 %v6759_v6, 0.0 }
 0x2b2   :  { %v2820_v52 = vadd.f32 %v2671_v37, %v2670_v26  ;;  %v2675_v59 = vmul.f32 %v7687_v41, %v2508_v18  ;;  %v1990_v57 = vpop.f32.mrb[112].mxu0  ;;  %v2376_v4 = vpop.f32.mrb[112].mxu1  ;;  %v2676_v44 = vmul.f32 %v7690_v53, %v2509_v7 }
 0x2b3   :  { %v6696_v34 = vadd.f32 %v1990_v57, %v7664_v27  ;;  %v6760_v9 = vadd.f32 %v2376_v4, %v7668_v11  ;;  %v1992_v13 = vpop.f32.mrb[113].mxu0  ;;  %v2378_v5 = vpop.f32.mrb[113].mxu1  ;;  %2818 = vadd.xlane.f32.xlu0 %v2817_v0  ;;  %v2677_v62 = vmul.f32 %v7701_v16, %v2510_v25 }
 0x2b4   :  { %v2825_v1 = vadd.f32 %v2675_v59, %v2674_v21  ;;  %v6697_v14 = vadd.f32 %v1992_v13, %v7672_v55  ;;  %v1994_v17 = vpop.f32.mrb[114].mxu0  ;;  %v2380_v19 = vpop.f32.mrb[114].mxu1  ;;  %v2821_v20 = vadd.f32 %v2820_v52, %v2672_v2  ;;  %v6761_v43 = vadd.f32 %v2378_v5, %v7678_v12 }
 0x2b5   :  { %v2511_v28 = vmax.f32 %v6696_v34, 0.0  ;;  %v6698_v32 = vadd.f32 %v1994_v17, %v7664_v27  ;;  %v1996_v35 = vpop.f32.mrb[115].mxu0  ;;  %v2382_v36 = vpop.f32.mrb[115].mxu1  ;;  %v2513_v38 = vmax.f32 %v6760_v9, 0.0  ;;  %v6762_v51 = vadd.f32 %v2380_v19, %v7668_v11 }
 0x2b6   :  { %v2512_v40 = vmax.f32 %v6697_v14, 0.0  ;;  %v6699_v31 = vadd.f32 %v1996_v35, %v7672_v55  ;;  %v6763_v63 = vadd.f32 %v2382_v36, %v7678_v12  ;;  %v2822_v47 = vadd.f32 %v2821_v20, %v2673_v23 }
 0x2b7   :  { %v2678_v45 = vmul.f32 %v7682_v56, %v2511_v28  ;;  %v2515_v46 = vmax.f32 %v6698_v32, 0.0  ;;  %v2826_v24 = vadd.f32 %v2825_v1, %v2676_v44  ;;  %v2680_v8 = vmul.f32 %v7690_v53, %v2513_v38 }
 0x2b8   :  { %v2679_v50 = vmul.f32 %v7687_v41, %v2512_v40  ;;  %v2516_v54 = vmax.f32 %v6699_v31, 0.0  ;;  %v2514_v39 = vmax.f32 %v6761_v43, 0.0  ;;  %v2517_v15 = vmax.f32 %v6762_v51, 0.0  ;;  %2823 = vadd.xlane.f32.xlu1 %v2822_v47 }
 0x2b9   :  { %v2682_v3 = vmul.f32 %v7682_v56, %v2515_v46  ;;  %v2827_v37 = vadd.f32 %v2826_v24, %v2677_v62  ;;  %v2518_v6 = vmax.f32 %v6763_v63, 0.0 }
 0x2ba   :  { %v2830_v58 = vadd.f32 %v2679_v50, %v2678_v45  ;;  %v2683_v42 = vmul.f32 %v7687_v41, %v2516_v54  ;;  %v2000_v22 = vpop.f32.mrb[116].mxu0  ;;  %v2386_v26 = vpop.f32.mrb[116].mxu1  ;;  %v2681_v9 = vmul.f32 %v7701_v16, %v2514_v39  ;;  %v2684_v1 = vmul.f32 %v7690_v53, %v2517_v15 }
 0x2bb   :  { %v6700_v60 = vadd.f32 %v2000_v22, %v7664_v27  ;;  %v6764_v33 = vadd.f32 %v2386_v26, %v7668_v11  ;;  %v2002_v48 = vpop.f32.mrb[117].mxu0  ;;  %v2388_v18 = vpop.f32.mrb[117].mxu1  ;;  %2828 = vadd.xlane.f32.xlu0 %v2827_v37  ;;  %v2685_v20 = vmul.f32 %v7701_v16, %v2518_v6 }
 0x2bc   :  { %v2835_v21 = vadd.f32 %v2683_v42, %v2682_v3  ;;  %v6701_v10 = vadd.f32 %v2002_v48, %v7672_v55  ;;  %v2004_v61 = vpop.f32.mrb[118].mxu0  ;;  %v2390_v2 = vpop.f32.mrb[118].mxu1  ;;  %v2831_v52 = vadd.f32 %v2830_v58, %v2680_v8  ;;  %v6765_v57 = vadd.f32 %v2388_v18, %v7678_v12 }
 0x2bd   :  { %v2519_v59 = vmax.f32 %v6700_v60, 0.0  ;;  %v6702_v4 = vadd.f32 %v2004_v61, %v7664_v27  ;;  %v2006_v7 = vpop.f32.mrb[119].mxu0  ;;  %v2392_v34 = vpop.f32.mrb[119].mxu1  ;;  %v2521_v0 = vmax.f32 %v6764_v33, 0.0  ;;  %v6766_v19 = vadd.f32 %v2390_v2, %v7668_v11 }
 0x2be   :  { %v2520_v13 = vmax.f32 %v6701_v10, 0.0  ;;  %v6703_v5 = vadd.f32 %v2006_v7, %v7672_v55  ;;  %v6767_v28 = vadd.f32 %v2392_v34, %v7678_v12  ;;  %v2522_v32 = vmax.f32 %v6765_v57, 0.0 }
 0x2bf   :  { %v2686_v14 = vmul.f32 %v7682_v56, %v2519_v59  ;;  %v2523_v17 = vmax.f32 %v6702_v4, 0.0  ;;  %v2832_v36 = vadd.f32 %v2831_v52, %v2681_v9  ;;  %v2836_v38 = vadd.f32 %v2835_v21, %v2684_v1 }
 0x2c0   :  { %v2687_v23 = vmul.f32 %v7687_v41, %v2520_v13  ;;  %v2524_v25 = vmax.f32 %v6703_v5, 0.0  ;;  %v2688_v40 = vmul.f32 %v7690_v53, %v2521_v0  ;;  %v2525_v46 = vmax.f32 %v6766_v19, 0.0 }
 0x2c1   :  { %v2690_v35 = vmul.f32 %v7682_v56, %v2523_v17  ;;  %2833 = vadd.xlane.f32.xlu1 %v2832_v36  ;;  %v2837_v54 = vadd.f32 %v2836_v38, %v2685_v20  ;;  %v2526_v47 = vmax.f32 %v6767_v28, 0.0  ;;  %v2689_v42 = vmul.f32 %v7701_v16, %v2522_v32 }
 0x2c2   :  { %v2840_v43 = vadd.f32 %v2687_v23, %v2686_v14  ;;  %v2691_v31 = vmul.f32 %v7687_v41, %v2524_v25  ;;  %v2010_v44 = vpop.f32.mrb[120].mxu0  ;;  %v2396_v45 = vpop.f32.mrb[120].mxu1  ;;  %v2692_v21 = vmul.f32 %v7690_v53, %v2525_v46 }
 0x2c3   :  { %v6704_v51 = vadd.f32 %v2010_v44, %v7664_v27  ;;  %v6768_v50 = vadd.f32 %v2396_v45, %v7668_v11  ;;  %v2012_v63 = vpop.f32.mrb[121].mxu0  ;;  %v2398_v62 = vpop.f32.mrb[121].mxu1  ;;  %2838 = vadd.xlane.f32.xlu0 %v2837_v54  ;;  %v2693_v2 = vmul.f32 %v7701_v16, %v2526_v47 }
 0x2c4   :  { %v2845_v3 = vadd.f32 %v2691_v31, %v2690_v35  ;;  %v6705_v24 = vadd.f32 %v2012_v63, %v7672_v55  ;;  %v2014_v8 = vpop.f32.mrb[122].mxu0  ;;  %v2400_v58 = vpop.f32.mrb[122].mxu1  ;;  %v2841_v39 = vadd.f32 %v2840_v43, %v2688_v40  ;;  %v6769_v48 = vadd.f32 %v2398_v62, %v7678_v12 }
 0x2c5   :  { %v2527_v22 = vmax.f32 %v6704_v51, 0.0  ;;  %v6706_v26 = vadd.f32 %v2014_v8, %v7664_v27  ;;  %v2016_v15 = vpop.f32.mrb[123].mxu0  ;;  %v2402_v60 = vpop.f32.mrb[123].mxu1  ;;  %v2529_v33 = vmax.f32 %v6768_v50, 0.0  ;;  %v6770_v61 = vadd.f32 %v2400_v58, %v7668_v11 }
 0x2c6   :  { %v2528_v37 = vmax.f32 %v6705_v24, 0.0  ;;  %v6707_v18 = vadd.f32 %v2016_v15, %v7672_v55  ;;  %v6771_v4 = vadd.f32 %v2402_v60, %v7678_v12  ;;  %v2842_v7 = vadd.f32 %v2841_v39, %v2689_v42 }
 0x2c7   :  { %v2694_v6 = vmul.f32 %v7682_v56, %v2527_v22  ;;  %v2531_v10 = vmax.f32 %v6706_v26, 0.0  ;;  %v2846_v34 = vadd.f32 %v2845_v3, %v2692_v21  ;;  %v2696_v9 = vmul.f32 %v7690_v53, %v2529_v33 }
 0x2c8   :  { %v2695_v52 = vmul.f32 %v7687_v41, %v2528_v37  ;;  %v2532_v59 = vmax.f32 %v6707_v18, 0.0  ;;  %v2530_v13 = vmax.f32 %v6769_v48, 0.0  ;;  %v2533_v17 = vmax.f32 %v6770_v61, 0.0  ;;  %2843 = vadd.xlane.f32.xlu1 %v2842_v7 }
 0x2c9   :  { %v2698_v57 = vmul.f32 %v7682_v56, %v2531_v10  ;;  %v2847_v23 = vadd.f32 %v2846_v34, %v2693_v2  ;;  %v2534_v31 = vmax.f32 %v6771_v4, 0.0  ;;  %v7951_v4 = vld [vmem:[#allocation2] ss:$0 sm:$0xff] }
 0x2ca   :  { %v2850_v0 = vadd.f32 %v2695_v52, %v2694_v6  ;;  %v2699_v5 = vmul.f32 %v7687_v41, %v2532_v59  ;;  %v2020_v1 = vpop.f32.mrb[124].mxu0  ;;  %v2406_v14 = vpop.f32.mrb[124].mxu1  ;;  %v2697_v47 = vmul.f32 %v7701_v16, %v2530_v13  ;;  %v2700_v24 = vmul.f32 %v7690_v53, %v2533_v17 }
 0x2cb   :  { %v6708_v19 = vadd.f32 %v2020_v1, %v7664_v27  ;;  %v6772_v20 = vadd.f32 %v2406_v14, %v7668_v11  ;;  %v2022_v25 = vpop.f32.mrb[125].mxu0  ;;  %v2408_v28 = vpop.f32.mrb[125].mxu1  ;;  %2848 = vadd.xlane.f32.xlu0 %v2847_v23  ;;  %v2701_v22 = vmul.f32 %v7701_v16, %v2534_v31 }
 0x2cc   :  { %v2855_v32 = vadd.f32 %v2699_v5, %v2698_v57  ;;  %v6709_v35 = vadd.f32 %v2022_v25, %v7672_v55  ;;  %v6773_v36 = vadd.f32 %v2408_v28, %v7678_v12  ;;  %v2024_v38 = vpop.f32.mrb[126].mxu0  ;;  %v2410_v40 = vpop.f32.mrb[126].mxu1  ;;  %v2851_v43 = vadd.f32 %v2850_v0, %v2696_v9 }
 0x2cd   :  { %v2535_v44 = vmax.f32 %v6708_v19, 0.0  ;;  %v6710_v45 = vadd.f32 %v2024_v38, %v7664_v27  ;;  %v6774_v46 = vadd.f32 %v2410_v40, %v7668_v11  ;;  %v2026_v51 = vpop.f32.mrb[127].mxu0  ;;  %v2412_v50 = vpop.f32.mrb[127].mxu1  ;;  %v2537_v54 = vmax.f32 %v6772_v20, 0.0 }
 0x2ce   :  { %v2536_v63 = vmax.f32 %v6709_v35, 0.0  ;;  %v6711_v62 = vadd.f32 %v2026_v51, %v7672_v55  ;;  %v6775_v3 = vadd.f32 %v2412_v50, %v7678_v12  ;;  %v2538_v27 = vmax.f32 %v6773_v36, 0.0 }
 0x2cf   :  { %v2702_v8 = vmul.f32 %v7682_v56, %v2535_v44  ;;  %v2539_v58 = vmax.f32 %v6710_v45, 0.0  ;;  %v2541_v42 = vmax.f32 %v6774_v46, 0.0  ;;  %v2852_v15 = vadd.f32 %v2851_v43, %v2697_v47 }
 0x2d0   :  { %v2703_v39 = vmul.f32 %v7687_v41, %v2536_v63  ;;  %v2540_v11 = vmax.f32 %v6711_v62, 0.0  ;;  %v2856_v55 = vadd.f32 %v2855_v32, %v2700_v24  ;;  %v2704_v12 = vmul.f32 %v7690_v53, %v2537_v54 }
 0x2d1   :  { %v2706_v26 = vmul.f32 %v7682_v56, %v2539_v58  ;;  %v2542_v37 = vmax.f32 %v6775_v3, 0.0  ;;  %2853 = vadd.xlane.f32.xlu1 %v2852_v15  ;;  %v2705_v18 = vmul.f32 %v7701_v16, %v2538_v27  ;;  %v2708_v21 = vmul.f32 %v7690_v53, %v2541_v42 }
 0x2d2   :  { %v2860_v60 = vadd.f32 %v2703_v39, %v2702_v8  ;;  %v2707_v33 = vmul.f32 %v7687_v41, %v2540_v11  ;;  %v2857_v48 = vadd.f32 %v2856_v55, %v2701_v22  ;;  %v7185_v41 = vmov 1966171168  }
 0x2d3   :  { %v2709_v61 = vmul.f32 %v7701_v16, %v2542_v37  ;;  %v2943_v59 = vunpack.c.l.s4 %v7185_v41 }
 0x2d4   :  { %v2865_v6 = vadd.f32 %v2707_v33, %v2706_v26  ;;  %v2861_v10 = vadd.f32 %v2860_v60, %v2704_v12  ;;  %2858 = vadd.xlane.f32.xlu0 %v2857_v48 }
 0x2d5   :  { %v2944_v57 = vunpack.c.0.s8 %v2943_v59 }
 0x2d6   :  { %v2862_v56 = vadd.f32 %v2861_v10, %v2705_v18  ;;  %v2866_v2 = vadd.f32 %v2865_v6, %v2708_v21 }
 0x2d7   :  { %v7954_v7 = vsub.s32 %v2944_v57, %v7381_v30 }
 0x2d8   :  { %2863 = vadd.xlane.f32.xlu1 %v2862_v56  ;;  %v2867_v52 = vadd.f32 %v2866_v2, %v2709_v61  ;;  %2788 = vadd.xlane.f32.xlu0 %v7835_v49 }
 0x2dc   :  { %2868 = vadd.xlane.f32.xlu1 %v2867_v52 }
 0x2ed   :  { %v2714_v53 = vpop.xlane.xlu0 %2713 }
 0x2ee   :  { %v2877_v34 = vadd.f32 %v7951_v4, %v2714_v53 }
 0x2f0   :  { %v2941_v9 = vcombine.high %v2877_v34, %v2877_v34  ;;  %v2948_v16 = vrot.slane %v2877_v34, %v7954_v7 }
 0x2f1   :  { %v2719_v0 = vpop.xlane.xlu0 %2718 }
 0x2f2   :  { %v2955_v13 = vrot.slane %v2941_v9, %v7954_v7  ;;  %v2956_v5 = vcombine.high %v2948_v16, %v2948_v16  ;;  %v2878_v49 = vadd.f32 %v7951_v4, %v2719_v0  ;;  %v2964_v14 = vrot.slane %v2948_v16, %v7954_v7 }
 0x2f4   :  { %v2957_v1 = vcombine.high %v2955_v13, %v2955_v13  ;;  %v2978_v17 = vrot.slane %v2956_v5, %v7954_v7  ;;  %v2990_v19 = vcombine.high %v2878_v49, %v2878_v49  ;;  %v2971_v20 = vrot.slane %v2955_v13, %v7954_v7 }
 0x2f5   :  { %v2997_v23 = vrot.slane %v2878_v49, %v7954_v7 }
 0x2f6   :  { %v2985_v25 = vrot.slane %v2957_v1, %v7954_v7  ;;  %v4509_v28 = vcombine.low %v2964_v14, %v2978_v17  ;;  %v6584_v32 = vcombine.high %v2964_v14, %v2978_v17  ;;  %v3004_v35 = vrot.slane %v2990_v19, %v7954_v7  ;;  %v2724_v36 = vpop.xlane.xlu1 %2723 }
 0x2f7   :  { %v3005_v38 = vcombine.high %v2997_v23, %v2997_v23  ;;  %v2879_v40 = vadd.f32 %v7951_v4, %v2724_v36  ;;  %v3013_v45 = vrot.slane %v2997_v23, %v7954_v7 }
 0x2f8   :  { %v4511_v43 = vcombine.low %v2971_v20, %v2985_v25  ;;  %v6585_v31 = vcombine.high %v2971_v20, %v2985_v25  ;;  %v4519_v44 = vrot.slane %v4509_v28, %v7954_v7  ;;  %v4526_v46 = vrot.slane %v6584_v32, %v7954_v7 }
 0x2f9   :  { %v3006_v51 = vcombine.high %v3004_v35, %v3004_v35  ;;  %v3027_v50 = vrot.slane %v3005_v38, %v7954_v7  ;;  %v3039_v54 = vcombine.high %v2879_v40, %v2879_v40  ;;  %v7972_v63 = vrot.slane %v3004_v35, %v7954_v7 }
 0x2fa   :  { %v3046_v62 = vrot.slane %v2879_v40, %v7954_v7  ;;  %v2729_v3 = vpop.xlane.xlu1 %2728  ;;  %v4533_v47 = vrot.slane %v4511_v43, %v7954_v7  ;;  %v4540_v24 = vrot.slane %v6585_v31, %v7954_v7  ;;  %v4541_v55 = vcombine.low %v4519_v44, %v4526_v46 }
 0x2fb   :  { %v7978_v8 = vrot.slane %v3006_v51, %v7954_v7  ;;  %v4558_v58 = vcombine.low %v3013_v45, %v3027_v50  ;;  %v6586_v39 = vcombine.high %v3013_v45, %v3027_v50  ;;  %v3053_v27 = vrot.slane %v3039_v54, %v7954_v7 }
 0x2fc   :  { %v3054_v42 = vcombine.high %v3046_v62, %v3046_v62  ;;  %v2880_v11 = vadd.f32 %v7951_v4, %v2729_v3  ;;  %v4542_v22 = vcombine.low %v4533_v47, %v4540_v24  ;;  %v3062_v15 = vrot.slane %v3046_v62, %v7954_v7 }
 0x2fd   :  { %v4560_v26 = vcombine.low %v7972_v63, %v7978_v8  ;;  %v6587_v12 = vcombine.high %v7972_v63, %v7978_v8  ;;  %v3055_v60 = vcombine.high %v3053_v27, %v3053_v27  ;;  %v7989_v18 = vrot.slane %v4558_v58, %v7954_v7 }
 0x2fe   :  { %v3076_v33 = vrot.slane %v3054_v42, %v7954_v7  ;;  %v3088_v37 = vcombine.high %v2880_v11, %v2880_v11  ;;  %v2734_v48 = vpop.xlane.xlu0 %2733  ;;  %v7992_v21 = vrot.slane %v6586_v39, %v7954_v7  ;;  %v3095_v6 = vrot.slane %v2880_v11, %v7954_v7 }
 0x2ff   :  { %v2881_v10 = vadd.f32 %v7951_v4, %v2734_v48  ;;  %v7997_v61 = vrot.slane %v3053_v27, %v7954_v7  ;;  %v8000_v56 = vrot.slane %v3055_v60, %v7954_v7  ;;  %v4556_v52 = vrot.slane %v4542_v22, %v7954_v7 }
 0x300   :  { %v3102_v2 = vrot.slane %v3088_v37, %v7954_v7  ;;  %v3103_v41 = vcombine.high %v3095_v6, %v3095_v6  ;;  %v2739_v53 = vpop.xlane.xlu1 %2738  ;;  %v4549_v34 = vrot.slane %v4541_v55, %v7954_v7  ;;  %v4607_v9 = vcombine.low %v3062_v15, %v3076_v33 }
 0x301   :  { %v3137_v59 = vcombine.high %v2881_v10, %v2881_v10  ;;  %v3144_v57 = vrot.slane %v2881_v10, %v7954_v7  ;;  %v6588_v16 = vcombine.high %v3062_v15, %v3076_v33  ;;  %v4609_v0 = vcombine.low %v7997_v61, %v8000_v56 }
 0x302   :  { %v3111_v13 = vrot.slane %v3095_v6, %v7954_v7  ;;  %v6589_v5 = vcombine.high %v7997_v61, %v8000_v56  ;;  %v3104_v49 = vcombine.high %v3102_v2, %v3102_v2  ;;  %v3125_v1 = vrot.slane %v3103_v41, %v7954_v7 }
 0x303   :  { %v3151_v14 = vrot.slane %v3137_v59, %v7954_v7  ;;  %v8014_v17 = vrot.slane %v3102_v2, %v7954_v7  ;;  %v3152_v19 = vcombine.high %v3144_v57, %v3144_v57  ;;  %v2882_v20 = vadd.f32 %v7951_v4, %v2739_v53 }
 0x304   :  { %v4557_v23 = vcombine.low %v4549_v34, %v4556_v52  ;;  %v8018_v25 = vrot.slane %v3104_v49, %v7954_v7  ;;  %v4656_v28 = vcombine.low %v3111_v13, %v3125_v1  ;;  %v6590_v32 = vcombine.high %v3111_v13, %v3125_v1 }
 0x305   :  { %v3153_v35 = vcombine.high %v3151_v14, %v3151_v14  ;;  %v3160_v36 = vrot.slane %v3144_v57, %v7954_v7  ;;  %v3174_v38 = vrot.slane %v3152_v19, %v7954_v7  ;;  %v3186_v40 = vcombine.high %v2882_v20, %v2882_v20  ;;  %v2744_v31 = vpop.xlane.xlu0 %2743 }
 0x306   :  { %v3193_v43 = vrot.slane %v2882_v20, %v7954_v7  ;;  %6078 = vperm.xlu0 %6910, %v4557_v23   ;;  %v8024_v44 = vrot.slane %v4607_v9, %v7954_v7  ;;  %v8027_v45 = vrot.slane %v6588_v16, %v7954_v7  ;;  %v4658_v46 = vcombine.low %v8014_v17, %v8018_v25 }
 0x307   :  { %v8032_v51 = vrot.slane %v3151_v14, %v7954_v7  ;;  %v6591_v50 = vcombine.high %v8014_v17, %v8018_v25  ;;  %v8037_v54 = vrot.slane %v3153_v35, %v7954_v7  ;;  %v4705_v62 = vcombine.low %v3160_v36, %v3174_v38 }
 0x308   :  { %v3200_v3 = vrot.slane %v3186_v40, %v7954_v7  ;;  %v8041_v47 = vrot.slane %v4656_v28, %v7954_v7  ;;  %v8044_v24 = vrot.slane %v6590_v32, %v7954_v7  ;;  %v3201_v58 = vcombine.high %v3193_v43, %v3193_v43  ;;  %v2749_v15 = vpop.xlane.xlu1 %2748 }
 0x309   :  { %v2883_v39 = vadd.f32 %v7951_v4, %v2744_v31  ;;  %v6592_v27 = vcombine.high %v3160_v36, %v3174_v38  ;;  %v4707_v42 = vcombine.low %v8032_v51, %v8037_v54  ;;  %v3209_v11 = vrot.slane %v3193_v43, %v7954_v7 }
 0x30a   :  { %v4582_v22 = vrot.slane %v4560_v26, %v7954_v7  ;;  %v6593_v55 = vcombine.high %v8032_v51, %v8037_v54  ;;  %v3202_v60 = vcombine.high %v3200_v3, %v3200_v3  ;;  %v3223_v33 = vrot.slane %v3201_v58, %v7954_v7 }
 0x30b   :  { %v3235_v37 = vcombine.high %v2883_v39, %v2883_v39  ;;  %v8055_v48 = vrot.slane %v4705_v62, %v7954_v7  ;;  %v3242_v6 = vrot.slane %v2883_v39, %v7954_v7  ;;  %v4589_v10 = vrot.slane %v6587_v12, %v7954_v7 }
 0x30c   :  { %v4590_v26 = vcombine.low %v7989_v18, %v7992_v21  ;;  %v8065_v2 = vrot.slane %v3200_v3, %v7954_v7  ;;  %v8068_v52 = vrot.slane %v3202_v60, %v7954_v7  ;;  %v2884_v59 = vadd.f32 %v7951_v4, %v2749_v15 }
 0x30d   :  { %v3249_v41 = vrot.slane %v3235_v37, %v7954_v7  ;;  %v8073_v57 = vrot.slane %v6592_v27, %v7954_v7  ;;  %v4754_v53 = vcombine.low %v3209_v11, %v3223_v33  ;;  %v3250_v34 = vcombine.high %v3242_v6, %v3242_v6 }
 0x30e   :  { %v4591_v63 = vcombine.low %v4582_v22, %v4589_v10  ;;  %v6594_v8 = vcombine.high %v3209_v11, %v3223_v33  ;;  %v4756_v12 = vcombine.low %v8065_v2, %v8068_v52  ;;  %v3258_v18 = vrot.slane %v3242_v6, %v7954_v7  ;;  %v2754_v56 = vpop.xlane.xlu0 %2753 }
 0x30f   :  { %v4598_v21 = vrot.slane %v4590_v26, %v7954_v7  ;;  %v6595_v9 = vcombine.high %v8065_v2, %v8068_v52  ;;  %v3251_v16 = vcombine.high %v3249_v41, %v3249_v41  ;;  %v3272_v13 = vrot.slane %v3250_v34, %v7954_v7 }
 0x310   :  { %v4605_v49 = vrot.slane %v4591_v63, %v7954_v7  ;;  %v3284_v1 = vcombine.high %v2884_v59, %v2884_v59  ;;  %v3291_v14 = vrot.slane %v2884_v59, %v7954_v7  ;;  %v4631_v19 = vrot.slane %v4609_v0, %v7954_v7  ;;  %v2759_v25 = vpop.xlane.xlu1 %2758 }
 0x311   :  { %v4638_v20 = vrot.slane %v6589_v5, %v7954_v7  ;;  %v8090_v23 = vrot.slane %v3249_v41, %v7954_v7  ;;  %v8093_v28 = vrot.slane %v3251_v16, %v7954_v7  ;;  %v4803_v32 = vcombine.low %v3258_v18, %v3272_v13 }
 0x312   :  { %v4606_v35 = vcombine.low %v4598_v21, %v4605_v49  ;;  %v8096_v36 = vrot.slane %v4754_v53, %v7954_v7  ;;  %v3298_v38 = vrot.slane %v3284_v1, %v7954_v7  ;;  %v3299_v40 = vcombine.high %v3291_v14, %v3291_v14 }
 0x313   :  { %v4639_v61 = vcombine.low %v8024_v44, %v8027_v45  ;;  %v8102_v0 = vrot.slane %v6594_v8, %v7954_v7  ;;  %v6596_v5 = vcombine.high %v3258_v18, %v3272_v13  ;;  %v4805_v43 = vcombine.low %v8090_v23, %v8093_v28 }
 0x314   :  { %6081 = vperm.xlu1 %6911, %v4606_v35   ;;  %v3307_v31 = vrot.slane %v3291_v14, %v7954_v7  ;;  %v6597_v62 = vcombine.high %v8090_v23, %v8093_v28  ;;  %v3300_v3 = vcombine.high %v3298_v38, %v3298_v38  ;;  %v3321_v58 = vrot.slane %v3299_v40, %v7954_v7 }
 0x315   :  { %v4640_v39 = vcombine.low %v4631_v19, %v4638_v20  ;;  %v8111_v44 = vrot.slane %v4803_v32, %v7954_v7  ;;  %v2885_v45 = vadd.f32 %v7951_v4, %v2754_v56  ;;  %v4680_v27 = vrot.slane %v4658_v46, %v7954_v7 }
 0x316   :  { %v4687_v11 = vrot.slane %v6591_v50, %v7954_v7  ;;  %v8120_v22 = vrot.slane %v3298_v38, %v7954_v7  ;;  %v8123_v15 = vrot.slane %v3300_v3, %v7954_v7  ;;  %v4647_v60 = vrot.slane %v4639_v61, %v7954_v7  ;;  %v2764_v61 = vpop.xlane.xlu0 %2763 }
 0x317   :  { %v4654_v33 = vrot.slane %v4640_v39, %v7954_v7  ;;  %v3333_v37 = vcombine.high %v2885_v45, %v2885_v45  ;;  %v3340_v6 = vrot.slane %v2885_v45, %v7954_v7  ;;  %v4688_v10 = vcombine.low %v8041_v47, %v8044_v24 }
 0x318   :  { %v4689_v17 = vcombine.low %v4680_v27, %v4687_v11  ;;  %v8131_v46 = vrot.slane %v6596_v5, %v7954_v7  ;;  %v4852_v50 = vcombine.low %v3307_v31, %v3321_v58  ;;  %v6598_v26 = vcombine.high %v3307_v31, %v3321_v58  ;;  %v2769_v2 = vpop.xlane.xlu1 %2768 }
 0x319   :  { %v4854_v41 = vcombine.low %v8120_v22, %v8123_v15  ;;  %v6599_v59 = vcombine.high %v8120_v22, %v8123_v15  ;;  %v4655_v53 = vcombine.low %v4647_v60, %v4654_v33  ;;  %v3347_v34 = vrot.slane %v3333_v37, %v7954_v7 }
 0x31a   :  { %v3348_v63 = vcombine.high %v3340_v6, %v3340_v6  ;;  %v4696_v8 = vrot.slane %v4688_v10, %v7954_v7  ;;  %v4703_v47 = vrot.slane %v4689_v17, %v7954_v7  ;;  %v2886_v24 = vadd.f32 %v7951_v4, %v2759_v25 }
 0x31b   :  { %v4729_v18 = vrot.slane %v4707_v42, %v7954_v7  ;;  %6084 = vperm.xlu1 %6911, %v4655_v53   ;;  %v3349_v21 = vcombine.high %v3347_v34, %v3347_v34  ;;  %v3356_v16 = vrot.slane %v3340_v6, %v7954_v7  ;;  %v4736_v49 = vrot.slane %v6593_v55, %v7954_v7 }
 0x31c   :  { %v3370_v13 = vrot.slane %v3348_v63, %v7954_v7  ;;  %v4704_v1 = vcombine.low %v4696_v8, %v4703_v47  ;;  %v3382_v14 = vcombine.high %v2886_v24, %v2886_v24  ;;  %v3389_v19 = vrot.slane %v2886_v24, %v7954_v7 }
 0x31d   :  { %v4737_v20 = vcombine.low %v8055_v48, %v8073_v57  ;;  %v8155_v42 = vrot.slane %v4852_v50, %v7954_v7  ;;  %v8158_v32 = vrot.slane %v3347_v34, %v7954_v7  ;;  %v8161_v35 = vrot.slane %v3349_v21, %v7954_v7 }
 0x31e   :  { %v4738_v38 = vcombine.low %v4729_v18, %v4736_v49  ;;  %v8164_v51 = vrot.slane %v6598_v26, %v7954_v7  ;;  %v4901_v54 = vcombine.low %v3356_v16, %v3370_v13  ;;  %v3396_v55 = vrot.slane %v3382_v14, %v7954_v7  ;;  %v2774_v21 = vpop.xlane.xlu0 %2773 }
 0x31f   :  { %v3397_v40 = vcombine.high %v3389_v19, %v3389_v19  ;;  %v6600_v56 = vcombine.high %v3356_v16, %v3370_v13  ;;  %v4903_v48 = vcombine.low %v8158_v32, %v8161_v35  ;;  %6087 = vperm.xlu1 %6911, %v4704_v1   ;;  %v3405_v57 = vrot.slane %v3389_v19, %v7954_v7 }
 0x320   :  { %v4745_v5 = vrot.slane %v4737_v20, %v7954_v7  ;;  %v6601_v31 = vcombine.high %v8158_v32, %v8161_v35  ;;  %v3398_v3 = vcombine.high %v3396_v55, %v3396_v55  ;;  %v4752_v39 = vrot.slane %v4738_v38, %v7954_v7 }
 0x321   :  { %v3419_v58 = vrot.slane %v3397_v40, %v7954_v7  ;;  %v2887_v45 = vadd.f32 %v7951_v4, %v2764_v61  ;;  %v4778_v27 = vrot.slane %v4756_v12, %v7954_v7  ;;  %v4785_v11 = vrot.slane %v6595_v9, %v7954_v7 }
 0x322   :  { %v4786_v60 = vcombine.low %v8096_v36, %v8102_v0  ;;  %v8187_v33 = vrot.slane %v4901_v54, %v7954_v7  ;;  %v8190_v37 = vrot.slane %v3396_v55, %v7954_v7  ;;  %v8193_v6 = vrot.slane %v3398_v3, %v7954_v7 }
 0x323   :  { %v4753_v10 = vcombine.low %v4745_v5, %v4752_v39  ;;  %v4950_v17 = vcombine.low %v3405_v57, %v3419_v58  ;;  %v3431_v12 = vcombine.high %v2887_v45, %v2887_v45  ;;  %v3438_v25 = vrot.slane %v2887_v45, %v7954_v7 }
 0x324   :  { %v4787_v50 = vcombine.low %v4778_v27, %v4785_v11  ;;  %v8197_v52 = vrot.slane %v6600_v56, %v7954_v7  ;;  %v6602_v9 = vcombine.high %v3405_v57, %v3419_v58  ;;  %v4952_v36 = vcombine.low %v8190_v37, %v8193_v6 }
 0x325   :  { %6090 = vperm.xlu1 %6911, %v4753_v10   ;;  %v4794_v0 = vrot.slane %v4786_v60, %v7954_v7  ;;  %v6603_v26 = vcombine.high %v8190_v37, %v8193_v6  ;;  %v3445_v53 = vrot.slane %v3431_v12, %v7954_v7  ;;  %v3446_v34 = vcombine.high %v3438_v25, %v3438_v25 }
 0x326   :  { %v4801_v63 = vrot.slane %v4787_v50, %v7954_v7  ;;  %v2888_v8 = vadd.f32 %v7951_v4, %v2769_v2  ;;  %v4827_v47 = vrot.slane %v4805_v43, %v7954_v7  ;;  %v4834_v24 = vrot.slane %v6597_v62, %v7954_v7 }
 0x327   :  { %v4835_v18 = vcombine.low %v8111_v44, %v8131_v46  ;;  %v8218_v16 = vrot.slane %v4950_v17, %v7954_v7  ;;  %v3447_v13 = vcombine.high %v3445_v53, %v3445_v53  ;;  %v3468_v49 = vrot.slane %v3446_v34, %v7954_v7 }
 0x328   :  { %v4802_v1 = vcombine.low %v4794_v0, %v4801_v63  ;;  %v3454_v14 = vrot.slane %v3438_v25, %v7954_v7  ;;  %v3480_v19 = vcombine.high %v2888_v8, %v2888_v8  ;;  %v3487_v43 = vrot.slane %v2888_v8, %v7954_v7 }
 0x329   :  { %v4836_v20 = vcombine.low %v4827_v47, %v4834_v24  ;;  %v8224_v23 = vrot.slane %v3445_v53, %v7954_v7  ;;  %v8227_v28 = vrot.slane %v3447_v13, %v7954_v7  ;;  %v4843_v62 = vrot.slane %v4835_v18, %v7954_v7 }
 0x32a   :  { %6093 = vperm.xlu1 %6911, %v4802_v1   ;;  %v2889_v44 = vadd.f32 %v7951_v4, %v2774_v21  ;;  %v4999_v46 = vcombine.low %v3454_v14, %v3468_v49  ;;  %v3494_v38 = vrot.slane %v3480_v19, %v7954_v7  ;;  %v3495_v54 = vcombine.high %v3487_v43, %v3487_v43 }
 0x32b   :  { %v4850_v55 = vrot.slane %v4836_v20, %v7954_v7  ;;  %v8234_v40 = vrot.slane %v6602_v9, %v7954_v7  ;;  %v6604_v61 = vcombine.high %v3454_v14, %v3468_v49  ;;  %v5001_v56 = vcombine.low %v8224_v23, %v8227_v28 }
 0x32c   :  { %v3503_v57 = vrot.slane %v3487_v43, %v7954_v7  ;;  %v6605_v5 = vcombine.high %v8224_v23, %v8227_v28  ;;  %v3496_v3 = vcombine.high %v3494_v38, %v3494_v38  ;;  %v3517_v58 = vrot.slane %v3495_v54, %v7954_v7 }
 0x32d   :  { %v4851_v39 = vcombine.low %v4843_v62, %v4850_v55  ;;  %v3529_v45 = vcombine.high %v2889_v44, %v2889_v44  ;;  %v3536_v27 = vrot.slane %v2889_v44, %v7954_v7  ;;  %v4876_v11 = vrot.slane %v4854_v41, %v7954_v7  ;;  %v2784_v62 = vpop.xlane.xlu0 %2783 }
 0x32e   :  { %v4883_v60 = vrot.slane %v6599_v59, %v7954_v7  ;;  %v8252_v10 = vrot.slane %v4999_v46, %v7954_v7  ;;  %v8255_v17 = vrot.slane %v3494_v38, %v7954_v7  ;;  %v8258_v12 = vrot.slane %v3496_v3, %v7954_v7  ;;  %v2779_v59 = vpop.xlane.xlu1 %2778 }
 0x32f   :  { %6096 = vperm.xlu1 %6911, %v4851_v39   ;;  %v4884_v25 = vcombine.low %v8155_v42, %v8164_v51  ;;  %v8263_v41 = vrot.slane %v6604_v61, %v7954_v7  ;;  %v3543_v50 = vrot.slane %v3529_v45, %v7954_v7  ;;  %v3544_v22 = vcombine.high %v3536_v27, %v3536_v27 }
 0x330   :  { %v4885_v15 = vcombine.low %v4876_v11, %v4883_v60  ;;  %v5048_v2 = vcombine.low %v3503_v57, %v3517_v58  ;;  %v6606_v9 = vcombine.high %v3503_v57, %v3517_v58  ;;  %v5050_v0 = vcombine.low %v8255_v17, %v8258_v12 }
 0x331   :  { %v3552_v53 = vrot.slane %v3536_v27, %v7954_v7  ;;  %v6607_v34 = vcombine.high %v8255_v17, %v8258_v12  ;;  %v3545_v63 = vcombine.high %v3543_v50, %v3543_v50  ;;  %v3566_v42 = vrot.slane %v3544_v22, %v7954_v7 }
 0x332   :  { %v4892_v51 = vrot.slane %v4884_v25, %v7954_v7  ;;  %v4899_v8 = vrot.slane %v4885_v15, %v7954_v7  ;;  %v2890_v47 = vadd.f32 %v7951_v4, %v2779_v59  ;;  %v4925_v24 = vrot.slane %v4903_v48, %v7954_v7  ;;  %v2794_v22 = vpop.xlane.xlu1 %2793 }
 0x333   :  { %v4932_v18 = vrot.slane %v6601_v31, %v7954_v7  ;;  %v8284_v21 = vrot.slane %v3543_v50, %v7954_v7  ;;  %v8287_v13 = vrot.slane %v3545_v63, %v7954_v7  ;;  %v5097_v49 = vcombine.low %v3552_v53, %v3566_v42 }
 0x334   :  { %v4933_v1 = vcombine.low %v8187_v33, %v8197_v52  ;;  %v4900_v14 = vcombine.low %v4892_v51, %v4899_v8  ;;  %v3578_v19 = vcombine.high %v2890_v47, %v2890_v47  ;;  %v3585_v43 = vrot.slane %v2890_v47, %v7954_v7 }
 0x335   :  { %v4934_v48 = vcombine.low %v4925_v24, %v4932_v18  ;;  %v8293_v20 = vrot.slane %v5048_v2, %v7954_v7  ;;  %v8296_v32 = vrot.slane %v6606_v9, %v7954_v7  ;;  %v6608_v35 = vcombine.high %v3552_v53, %v3566_v42 }
 0x336   :  { %v5099_v31 = vcombine.low %v8284_v21, %v8287_v13  ;;  %v6609_v44 = vcombine.high %v8284_v21, %v8287_v13  ;;  %6099 = vperm.xlu1 %6911, %v4900_v14   ;;  %v3592_v33 = vrot.slane %v3578_v19, %v7954_v7  ;;  %v3593_v52 = vcombine.high %v3585_v43, %v3585_v43 }
 0x337   :  { %v4941_v46 = vrot.slane %v4933_v1, %v7954_v7  ;;  %v4948_v38 = vrot.slane %v4934_v48, %v7954_v7  ;;  %v4974_v54 = vrot.slane %v4952_v36, %v7954_v7  ;;  %v4981_v55 = vrot.slane %v6603_v26, %v7954_v7 }
 0x338   :  { %v4982_v61 = vcombine.low %v8218_v16, %v8234_v40  ;;  %v8316_v57 = vrot.slane %v5097_v49, %v7954_v7  ;;  %v3594_v3 = vcombine.high %v3592_v33, %v3592_v33  ;;  %v3615_v58 = vrot.slane %v3593_v52, %v7954_v7 }
 0x339   :  { %v2891_v39 = vadd.f32 %v7951_v4, %v2784_v62  ;;  %v3601_v45 = vrot.slane %v3585_v43, %v7954_v7  ;;  %v8322_v36 = vrot.slane %v3592_v33, %v7954_v7  ;;  %v4949_v27 = vcombine.low %v4941_v46, %v4948_v38 }
 0x33a   :  { %v4983_v11 = vcombine.low %v4974_v54, %v4981_v55  ;;  %v8325_v37 = vrot.slane %v3594_v3, %v7954_v7  ;;  %v4990_v6 = vrot.slane %v4982_v61, %v7954_v7  ;;  %v5023_v16 = vrot.slane %v5001_v56, %v7954_v7 }
 0x33b   :  { %v3627_v26 = vcombine.high %v2891_v39, %v2891_v39  ;;  %6102 = vperm.xlu1 %6911, %v4949_v27   ;;  %v3634_v60 = vrot.slane %v2891_v39, %v7954_v7  ;;  %v5030_v25 = vrot.slane %v6605_v5, %v7954_v7  ;;  %v5031_v50 = vcombine.low %v8252_v10, %v8263_v41 }
 0x33c   :  { %v4997_v40 = vrot.slane %v4983_v11, %v7954_v7  ;;  %v5114_v15 = vrot.slane %v6608_v35, %v7954_v7  ;;  %v5146_v59 = vcombine.low %v3601_v45, %v3615_v58  ;;  %v6610_v2 = vcombine.high %v3601_v45, %v3615_v58  ;;  %v2799_v35 = vpop.xlane.xlu0 %2798 }
 0x33d   :  { %v5148_v56 = vcombine.low %v8322_v36, %v8325_v37  ;;  %v6611_v9 = vcombine.high %v8322_v36, %v8325_v37  ;;  %v3641_v63 = vrot.slane %v3627_v26, %v7954_v7  ;;  %v3642_v42 = vcombine.high %v3634_v60, %v3634_v60  ;;  %v2804_v26 = vpop.xlane.xlu1 %2803 }
 0x33e   :  { %v4998_v53 = vcombine.low %v4990_v6, %v4997_v40  ;;  %v3650_v23 = vrot.slane %v3634_v60, %v7954_v7  ;;  %v5032_v28 = vcombine.low %v5023_v16, %v5030_v25  ;;  %v2893_v5 = vadd.f32 %v7951_v4, %v2794_v22 }
 0x33f   :  { %v5072_v10 = vrot.slane %v5050_v0, %v7954_v7  ;;  %v3643_v41 = vcombine.high %v3641_v63, %v3641_v63  ;;  %v3664_v51 = vrot.slane %v3642_v42, %v7954_v7  ;;  %v5039_v8 = vrot.slane %v5031_v50, %v7954_v7 }
 0x340   :  { %6105 = vperm.xlu0 %6910, %v4998_v53   ;;  %v5079_v47 = vrot.slane %v6607_v34, %v7954_v7  ;;  %v5046_v24 = vrot.slane %v5032_v28, %v7954_v7  ;;  %v3725_v18 = vcombine.high %v2893_v5, %v2893_v5  ;;  %v3732_v49 = vrot.slane %v2893_v5, %v7954_v7 }
 0x341   :  { %v5080_v1 = vcombine.low %v8293_v20, %v8296_v32  ;;  %v5156_v0 = vrot.slane %v5146_v59, %v7954_v7  ;;  %v8361_v14 = vrot.slane %v3641_v63, %v7954_v7  ;;  %v8364_v19 = vrot.slane %v3643_v41, %v7954_v7 }
 0x342   :  { %v5081_v43 = vcombine.low %v5072_v10, %v5079_v47  ;;  %v5195_v48 = vcombine.low %v3650_v23, %v3664_v51  ;;  %v5047_v17 = vcombine.low %v5039_v8, %v5046_v24  ;;  %v3739_v12 = vrot.slane %v3725_v18, %v7954_v7 }
 0x343   :  { %v3740_v34 = vcombine.high %v3732_v49, %v3732_v49  ;;  %v5163_v62 = vrot.slane %v6610_v2, %v7954_v7  ;;  %v6612_v33 = vcombine.high %v3650_v23, %v3664_v51  ;;  %v5197_v20 = vcombine.low %v8361_v14, %v8364_v19  ;;  %v2809_v23 = vpop.xlane.xlu0 %2808 }
 0x344   :  { %v3748_v32 = vrot.slane %v3732_v49, %v7954_v7  ;;  %v6613_v52 = vcombine.high %v8361_v14, %v8364_v19  ;;  %6108 = vperm.xlu1 %6911, %v5047_v17   ;;  %v3741_v46 = vcombine.high %v3739_v12, %v3739_v12  ;;  %v5088_v54 = vrot.slane %v5080_v1, %v7954_v7  ;;  %v2814_v1 = vpop.xlane.xlu1 %2813 }
 0x345   :  { %v3762_v38 = vrot.slane %v3740_v34, %v7954_v7  ;;  %v5095_v55 = vrot.slane %v5081_v43, %v7954_v7  ;;  %v2894_v61 = vadd.f32 %v7951_v4, %v2799_v35  ;;  %v5121_v3 = vrot.slane %v5099_v31, %v7954_v7 }
 0x346   :  { %v5128_v58 = vrot.slane %v6609_v44, %v7954_v7  ;;  %v8386_v39 = vrot.slane %v5195_v48, %v7954_v7  ;;  %v8389_v45 = vrot.slane %v3739_v12, %v7954_v7  ;;  %v8392_v36 = vrot.slane %v3741_v46, %v7954_v7 }
 0x347   :  { %v5129_v27 = vcombine.low %v8316_v57, %v5114_v15  ;;  %v5096_v11 = vcombine.low %v5088_v54, %v5095_v55  ;;  %v3774_v37 = vcombine.high %v2894_v61, %v2894_v61  ;;  %v3781_v31 = vrot.slane %v2894_v61, %v7954_v7  ;;  %v2819_v12 = vpop.xlane.xlu0 %2818 }
 0x348   :  { %v5130_v6 = vcombine.low %v5121_v3, %v5128_v58  ;;  %v8397_v21 = vrot.slane %v6612_v33, %v7954_v7  ;;  %v5293_v13 = vcombine.low %v3748_v32, %v3762_v38  ;;  %v6616_v44 = vcombine.high %v3748_v32, %v3762_v38 }
 0x349   :  { %v5295_v16 = vcombine.low %v8389_v45, %v8392_v36  ;;  %v6617_v40 = vcombine.high %v8389_v45, %v8392_v36  ;;  %6111 = vperm.xlu1 %6911, %v5096_v11   ;;  %v3788_v57 = vrot.slane %v3774_v37, %v7954_v7  ;;  %v3789_v60 = vcombine.high %v3781_v31, %v3781_v31 }
 0x34a   :  { %v5137_v25 = vrot.slane %v5129_v27, %v7954_v7  ;;  %v5144_v50 = vrot.slane %v5130_v6, %v7954_v7  ;;  %v2895_v22 = vadd.f32 %v7951_v4, %v2804_v26  ;;  %v5170_v15 = vrot.slane %v5148_v56, %v7954_v7 }
 0x34b   :  { %v5177_v59 = vrot.slane %v6611_v9, %v7954_v7  ;;  %v3790_v2 = vcombine.high %v3788_v57, %v3788_v57  ;;  %v3797_v53 = vrot.slane %v3781_v31, %v7954_v7  ;;  %v3811_v63 = vrot.slane %v3789_v60, %v7954_v7 }
 0x34c   :  { %v5178_v42 = vcombine.low %v5156_v0, %v5163_v62  ;;  %v5145_v28 = vcombine.low %v5137_v25, %v5144_v50  ;;  %v3823_v5 = vcombine.high %v2895_v22, %v2895_v22  ;;  %v3830_v10 = vrot.slane %v2895_v22, %v7954_v7 }
 0x34d   :  { %v5179_v41 = vcombine.low %v5170_v15, %v5177_v59  ;;  %v8413_v51 = vrot.slane %v3788_v57, %v7954_v7  ;;  %v8416_v8 = vrot.slane %v3790_v2, %v7954_v7  ;;  %v5342_v56 = vcombine.low %v3797_v53, %v3811_v63 }
 0x34e   :  { %v6618_v9 = vcombine.high %v3797_v53, %v3811_v63  ;;  %6114 = vperm.xlu1 %6911, %v5145_v28   ;;  %v3837_v47 = vrot.slane %v3823_v5, %v7954_v7  ;;  %v3838_v24 = vcombine.high %v3830_v10, %v3830_v10  ;;  %v5186_v18 = vrot.slane %v5178_v42, %v7954_v7 }
 0x34f   :  { %v5193_v49 = vrot.slane %v5179_v41, %v7954_v7  ;;  %v8422_v0 = vrot.slane %v5293_v13, %v7954_v7  ;;  %v8425_v43 = vrot.slane %v6616_v44, %v7954_v7  ;;  %v5344_v48 = vcombine.low %v8413_v51, %v8416_v8 }
 0x350   :  { %v3846_v17 = vrot.slane %v3830_v10, %v7954_v7  ;;  %v6619_v34 = vcombine.high %v8413_v51, %v8416_v8  ;;  %v3839_v35 = vcombine.high %v3837_v47, %v3837_v47  ;;  %v3860_v62 = vrot.slane %v3838_v24, %v7954_v7 }
 0x351   :  { %v5194_v33 = vcombine.low %v5186_v18, %v5193_v49  ;;  %v8434_v32 = vrot.slane %v5342_v56, %v7954_v7  ;;  %v8437_v46 = vrot.slane %v6618_v9, %v7954_v7  ;;  %v2896_v38 = vadd.f32 %v7951_v4, %v2809_v23 }
 0x352   :  { %v2897_v54 = vadd.f32 %v7951_v4, %v2814_v1  ;;  %v8442_v55 = vrot.slane %v3837_v47, %v7954_v7  ;;  %v8445_v61 = vrot.slane %v3839_v35, %v7954_v7  ;;  %v2898_v3 = vadd.f32 %v7951_v4, %v2819_v12 }
 0x353   :  { %6117 = vperm.xlu1 %6911, %v5194_v33   ;;  %v5317_v58 = vrot.slane %v5295_v16, %v7954_v7  ;;  %v3872_v45 = vcombine.high %v2896_v38, %v2896_v38  ;;  %v3879_v36 = vrot.slane %v2896_v38, %v7954_v7  ;;  %v5391_v37 = vcombine.low %v3846_v17, %v3860_v62 }
 0x354   :  { %v3921_v27 = vcombine.high %v2897_v54, %v2897_v54  ;;  %v3928_v11 = vrot.slane %v2897_v54, %v7954_v7  ;;  %v6620_v31 = vcombine.high %v3846_v17, %v3860_v62  ;;  %v5393_v6 = vcombine.low %v8442_v55, %v8445_v61 }
 0x355   :  { %v5324_v26 = vrot.slane %v6617_v40, %v7954_v7  ;;  %v6621_v13 = vcombine.high %v8442_v55, %v8445_v61  ;;  %v3886_v44 = vrot.slane %v3872_v45, %v7954_v7  ;;  %v3887_v57 = vcombine.high %v3879_v36, %v3879_v36 }
 0x356   :  { %v3935_v16 = vrot.slane %v3921_v27, %v7954_v7  ;;  %v3895_v60 = vrot.slane %v3879_v36, %v7954_v7  ;;  %v3936_v25 = vcombine.high %v3928_v11, %v3928_v11  ;;  %v3970_v50 = vcombine.high %v2898_v3, %v2898_v3  ;;  %v2824_v36 = vpop.xlane.xlu1 %2823  ;;  %v2829_v27 = vpop.xlane.xlu0 %2828 }
 0x357   :  { %v3977_v22 = vrot.slane %v2898_v3, %v7954_v7  ;;  %v3888_v15 = vcombine.high %v3886_v44, %v3886_v44  ;;  %v3909_v59 = vrot.slane %v3887_v57, %v7954_v7  ;;  %v3944_v40 = vrot.slane %v3928_v11, %v7954_v7 }
 0x358   :  { %v3937_v2 = vcombine.high %v3935_v16, %v3935_v16  ;;  %v8463_v53 = vrot.slane %v3886_v44, %v7954_v7  ;;  %v3958_v63 = vrot.slane %v3936_v25, %v7954_v7  ;;  %v3984_v42 = vrot.slane %v3970_v50, %v7954_v7 }
 0x359   :  { %v3985_v23 = vcombine.high %v3977_v22, %v3977_v22  ;;  %v8468_v28 = vrot.slane %v3888_v15, %v7954_v7  ;;  %v5440_v5 = vcombine.low %v3895_v60, %v3909_v59  ;;  %v6622_v10 = vcombine.high %v3895_v60, %v3909_v59 }
 0x35a   :  { %v8471_v41 = vrot.slane %v3937_v2, %v7954_v7  ;;  %v5401_v51 = vrot.slane %v5391_v37, %v7954_v7  ;;  %v5408_v8 = vrot.slane %v6620_v31, %v7954_v7  ;;  %v8476_v56 = vrot.slane %v3935_v16, %v7954_v7 }
 0x35b   :  { %v3986_v9 = vcombine.high %v3984_v42, %v3984_v42  ;;  %v5442_v47 = vcombine.low %v8463_v53, %v8468_v28  ;;  %v5489_v24 = vcombine.low %v3944_v40, %v3958_v63  ;;  %v6624_v18 = vcombine.high %v3944_v40, %v3958_v63 }
 0x35c   :  { %v8481_v49 = vrot.slane %v3977_v22, %v7954_v7  ;;  %v6623_v1 = vcombine.high %v8463_v53, %v8468_v28  ;;  %v8486_v17 = vrot.slane %v5440_v5, %v7954_v7  ;;  %v8489_v12 = vrot.slane %v6622_v10, %v7954_v7 }
 0x35d   :  { %v5491_v35 = vcombine.low %v8476_v56, %v8471_v41  ;;  %v6625_v62 = vcombine.high %v8476_v56, %v8471_v41  ;;  %v8496_v33 = vrot.slane %v3985_v23, %v7954_v7  ;;  %v8499_v38 = vrot.slane %v3986_v9, %v7954_v7 }
 0x35e   :  { %v5325_v54 = vcombine.low %v8422_v0, %v8425_v43  ;;  %v5326_v55 = vcombine.low %v5317_v58, %v5324_v26  ;;  %v5366_v61 = vrot.slane %v5344_v48, %v7954_v7  ;;  %v5373_v3 = vrot.slane %v6619_v34, %v7954_v7 }
 0x35f   :  { %v5374_v45 = vcombine.low %v8434_v32, %v8437_v46  ;;  %v8508_v11 = vrot.slane %v5489_v24, %v7954_v7  ;;  %v8511_v37 = vrot.slane %v6624_v18, %v7954_v7  ;;  %v8514_v31 = vrot.slane %v3984_v42, %v7954_v7 }
 0x360   :  { %v5538_v0 = vcombine.low %v8481_v49, %v8496_v33  ;;  %v6626_v43 = vcombine.high %v8481_v49, %v8496_v33  ;;  %v5333_v48 = vrot.slane %v5325_v54, %v7954_v7  ;;  %v5340_v34 = vrot.slane %v5326_v55, %v7954_v7 }
 0x361   :  { %v5375_v32 = vcombine.low %v5366_v61, %v5373_v3  ;;  %v5540_v46 = vcombine.low %v8514_v31, %v8499_v38  ;;  %v5382_v58 = vrot.slane %v5374_v45, %v7954_v7  ;;  %v2899_v26 = vadd.f32 %v7951_v4, %v2824_v36 }
 0x362   :  { %v2900_v44 = vadd.f32 %v7951_v4, %v2829_v27  ;;  %v5341_v57 = vcombine.low %v5333_v48, %v5340_v34  ;;  %v5415_v60 = vrot.slane %v5393_v6, %v7954_v7  ;;  %v5422_v25 = vrot.slane %v6621_v13, %v7954_v7  ;;  %v2839_v34 = vpop.xlane.xlu0 %2838 }
 0x363   :  { %v5389_v16 = vrot.slane %v5375_v32, %v7954_v7  ;;  %v4019_v50 = vcombine.high %v2899_v26, %v2899_v26  ;;  %v4026_v22 = vrot.slane %v2899_v26, %v7954_v7  ;;  %v6627_v2 = vcombine.high %v8514_v31, %v8499_v38 }
 0x364   :  { %v4068_v15 = vcombine.high %v2900_v44, %v2900_v44  ;;  %v4075_v59 = vrot.slane %v2900_v44, %v7954_v7  ;;  %6126 = vperm.xlu1 %6911, %v5341_v57   ;;  %v5423_v53 = vcombine.low %v5401_v51, %v5408_v8  ;;  %v5424_v4 = vcombine.low %v5415_v60, %v5422_v25  ;;  %v8580_v60 = vld [vmem:[#allocation2] ss:$0 sm:$0xff] }
 0x365   :  { %v5390_v40 = vcombine.low %v5382_v58, %v5389_v16  ;;  %v4033_v63 = vrot.slane %v4019_v50, %v7954_v7  ;;  %v4034_v42 = vcombine.high %v4026_v22, %v4026_v22  ;;  %v5464_v13 = vrot.slane %v5442_v47, %v7954_v7 }
 0x366   :  { %v4082_v6 = vrot.slane %v4068_v15, %v7954_v7  ;;  %v4042_v23 = vrot.slane %v4026_v22, %v7954_v7  ;;  %v4083_v28 = vcombine.high %v4075_v59, %v4075_v59  ;;  %v5431_v5 = vrot.slane %v5423_v53, %v7954_v7 }
 0x367   :  { %6129 = vperm.xlu0 %6910, %v5390_v40   ;;  %v5438_v10 = vrot.slane %v5424_v4, %v7954_v7  ;;  %v4035_v9 = vcombine.high %v4033_v63, %v4033_v63  ;;  %v4056_v24 = vrot.slane %v4034_v42, %v7954_v7  ;;  %v8542_v8 = vrot.slane %v4075_v59, %v7954_v7 }
 0x368   :  { %v4084_v51 = vcombine.high %v4082_v6, %v4082_v6  ;;  %v8545_v18 = vrot.slane %v4033_v63, %v7954_v7  ;;  %v4105_v47 = vrot.slane %v4083_v28, %v7954_v7  ;;  %v5471_v33 = vrot.slane %v6623_v1, %v7954_v7  ;;  %v2834_v1 = vpop.xlane.xlu1 %2833 }
 0x369   :  { %v5439_v49 = vcombine.low %v5431_v5, %v5438_v10  ;;  %v8550_v54 = vrot.slane %v4035_v9, %v7954_v7  ;;  %v5587_v55 = vcombine.low %v4042_v23, %v4056_v24  ;;  %v6628_v61 = vcombine.high %v4042_v23, %v4056_v24 }
 0x36a   :  { %v8553_v3 = vrot.slane %v4084_v51, %v7954_v7  ;;  %v8556_v45 = vrot.slane %v5538_v0, %v7954_v7  ;;  %v8559_v36 = vrot.slane %v4082_v6, %v7954_v7  ;;  %v5472_v27 = vcombine.low %v8486_v17, %v8489_v12 }
 0x36b   :  { %6132 = vperm.xlu1 %6911, %v5439_v49   ;;  %v5473_v48 = vcombine.low %v5464_v13, %v5471_v33  ;;  %v5555_v32 = vrot.slane %v6626_v43, %v7954_v7  ;;  %v5589_v58 = vcombine.low %v8545_v18, %v8550_v54  ;;  %v5636_v26 = vcombine.low %v8542_v8, %v4105_v47 }
 0x36c   :  { %v6630_v0 = vcombine.high %v8542_v8, %v4105_v47  ;;  %v6629_v44 = vcombine.high %v8545_v18, %v8550_v54  ;;  %v8571_v57 = vrot.slane %v5587_v55, %v7954_v7  ;;  %v8574_v17 = vrot.slane %v6628_v61, %v7954_v7 }
 0x36d   :  { %v5638_v12 = vcombine.low %v8559_v36, %v8553_v3  ;;  %v5480_v43 = vrot.slane %v5472_v27, %v7954_v7  ;;  %v5487_v16 = vrot.slane %v5473_v48, %v7954_v7  ;;  %v2901_v25 = vadd.f32 %v8580_v60, %v2834_v1  ;;  %v2844_v27 = vpop.xlane.xlu1 %2843  ;;  %v2849_v48 = vpop.xlane.xlu0 %2848 }
 0x36e   :  { %v2902_v50 = vadd.f32 %v8580_v60, %v2839_v34  ;;  %v6631_v22 = vcombine.high %v8559_v36, %v8553_v3  ;;  %v5513_v15 = vrot.slane %v5491_v35, %v7954_v7  ;;  %v5520_v59 = vrot.slane %v6625_v62, %v7954_v7 }
 0x36f   :  { %v5521_v40 = vcombine.low %v8508_v11, %v8511_v37  ;;  %v5488_v53 = vcombine.low %v5480_v43, %v5487_v16  ;;  %v4117_v4 = vcombine.high %v2901_v25, %v2901_v25  ;;  %v4124_v63 = vrot.slane %v2901_v25, %v7954_v7 }
 0x370   :  { %v4166_v42 = vcombine.high %v2902_v50, %v2902_v50  ;;  %v4173_v6 = vrot.slane %v2902_v50, %v7954_v7  ;;  %v5522_v13 = vcombine.low %v5513_v15, %v5520_v59  ;;  %v5562_v35 = vrot.slane %v5540_v46, %v7954_v7 }
 0x371   :  { %v5569_v23 = vrot.slane %v6627_v2, %v7954_v7  ;;  %6135 = vperm.xlu0 %6910, %v5488_v53   ;;  %v4131_v41 = vrot.slane %v4117_v4, %v7954_v7  ;;  %v4132_v56 = vcombine.high %v4124_v63, %v4124_v63  ;;  %v5529_v11 = vrot.slane %v5521_v40, %v7954_v7 }
 0x372   :  { %v4180_v62 = vrot.slane %v4166_v42, %v7954_v7  ;;  %v4140_v37 = vrot.slane %v4124_v63, %v7954_v7  ;;  %v4181_v28 = vcombine.high %v4173_v6, %v4173_v6  ;;  %v8608_v5 = vrot.slane %v4173_v6, %v7954_v7 }
 0x373   :  { %v5536_v10 = vrot.slane %v5522_v13, %v7954_v7  ;;  %v4133_v38 = vcombine.high %v4131_v41, %v4131_v41  ;;  %v4154_v31 = vrot.slane %v4132_v56, %v7954_v7  ;;  %v5570_v2 = vcombine.low %v8556_v45, %v5555_v32 }
 0x374   :  { %v4182_v46 = vcombine.high %v4180_v62, %v4180_v62  ;;  %v8614_v9 = vrot.slane %v4131_v41, %v7954_v7  ;;  %v8617_v24 = vrot.slane %v4181_v28, %v7954_v7  ;;  %v5571_v8 = vcombine.low %v5562_v35, %v5569_v23 }
 0x375   :  { %v5537_v51 = vcombine.low %v5529_v11, %v5536_v10  ;;  %v8620_v47 = vrot.slane %v4133_v38, %v7954_v7  ;;  %v5685_v49 = vcombine.low %v4140_v37, %v4154_v31  ;;  %v6632_v33 = vcombine.high %v4140_v37, %v4154_v31  ;;  %v2854_v31 = vpop.xlane.xlu1 %2853 }
 0x376   :  { %v8623_v55 = vrot.slane %v4182_v46, %v7954_v7  ;;  %v5646_v61 = vrot.slane %v5636_v26, %v7954_v7  ;;  %v5653_v3 = vrot.slane %v6630_v0, %v7954_v7  ;;  %v8628_v45 = vrot.slane %v4180_v62, %v7954_v7 }
 0x377   :  { %6138 = vperm.xlu1 %6911, %v5537_v51   ;;  %v5585_v36 = vrot.slane %v5571_v8, %v7954_v7  ;;  %v5687_v1 = vcombine.low %v8614_v9, %v8620_v47  ;;  %v5734_v34 = vcombine.low %v8608_v5, %v8617_v24  ;;  %v6634_v32 = vcombine.high %v8608_v5, %v8617_v24 }
 0x378   :  { %v5578_v26 = vrot.slane %v5570_v2, %v7954_v7  ;;  %v6633_v0 = vcombine.high %v8614_v9, %v8620_v47  ;;  %v8641_v43 = vrot.slane %v5685_v49, %v7954_v7  ;;  %v8644_v16 = vrot.slane %v6632_v33, %v7954_v7 }
 0x379   :  { %v5736_v25 = vcombine.low %v8628_v45, %v8623_v55  ;;  %v2903_v15 = vadd.f32 %v8580_v60, %v2844_v27  ;;  %v2904_v59 = vadd.f32 %v8580_v60, %v2849_v48  ;;  %v5611_v40 = vrot.slane %v5589_v58, %v7954_v7 }
 0x37a   :  { %v5586_v50 = vcombine.low %v5578_v26, %v5585_v36  ;;  %v5618_v53 = vrot.slane %v6629_v44, %v7954_v7  ;;  %v5619_v4 = vcombine.low %v8571_v57, %v8574_v17  ;;  %v5660_v63 = vrot.slane %v5638_v12, %v7954_v7 }
 0x37b   :  { %v5667_v42 = vrot.slane %v6631_v22, %v7954_v7  ;;  %v4215_v6 = vcombine.high %v2903_v15, %v2903_v15  ;;  %v4222_v13 = vrot.slane %v2903_v15, %v7954_v7  ;;  %v4264_v35 = vcombine.high %v2904_v59, %v2904_v59  ;;  %v2859_v22 = vpop.xlane.xlu0 %2858 }
 0x37c   :  { %6141 = vperm.xlu0 %6910, %v5586_v50   ;;  %v4271_v23 = vrot.slane %v2904_v59, %v7954_v7  ;;  %v6635_v18 = vcombine.high %v8628_v45, %v8623_v55  ;;  %v5620_v54 = vcombine.low %v5611_v40, %v5618_v53  ;;  %v5668_v58 = vcombine.low %v5646_v61, %v5653_v3 }
 0x37d   :  { %v5669_v44 = vcombine.low %v5660_v63, %v5667_v42  ;;  %v4229_v41 = vrot.slane %v4215_v6, %v7954_v7  ;;  %v4230_v57 = vcombine.high %v4222_v13, %v4222_v13  ;;  %v4278_v17 = vrot.slane %v4264_v35, %v7954_v7 }
 0x37e   :  { %v5627_v12 = vrot.slane %v5619_v4, %v7954_v7  ;;  %v4238_v56 = vrot.slane %v4222_v13, %v7954_v7  ;;  %v4279_v62 = vcombine.high %v4271_v23, %v4271_v23  ;;  %v4287_v11 = vrot.slane %v4271_v23, %v7954_v7 }
 0x37f   :  { %v5634_v37 = vrot.slane %v5620_v54, %v7954_v7  ;;  %v4231_v28 = vcombine.high %v4229_v41, %v4229_v41  ;;  %v4252_v5 = vrot.slane %v4230_v57, %v7954_v7  ;;  %v4280_v10 = vcombine.high %v4278_v17, %v4278_v17  ;;  %v2789_v40 = vpop.xlane.xlu0 %2788 }
 0x380   :  { %v5676_v38 = vrot.slane %v5668_v58, %v7954_v7  ;;  %v8672_v46 = vrot.slane %v4229_v41, %v7954_v7  ;;  %v4301_v2 = vrot.slane %v4279_v62, %v7954_v7  ;;  %v5683_v51 = vrot.slane %v5669_v44, %v7954_v7 }
 0x381   :  { %v5635_v24 = vcombine.low %v5627_v12, %v5634_v37  ;;  %v8677_v8 = vrot.slane %v4231_v28, %v7954_v7  ;;  %v5783_v49 = vcombine.low %v4238_v56, %v4252_v5  ;;  %v6636_v33 = vcombine.high %v4238_v56, %v4252_v5 }
 0x382   :  { %v8680_v61 = vrot.slane %v4280_v10, %v7954_v7  ;;  %v8683_v3 = vrot.slane %v5734_v34, %v7954_v7  ;;  %v8686_v36 = vrot.slane %v4278_v17, %v7954_v7  ;;  %v5684_v27 = vcombine.low %v5676_v38, %v5683_v51 }
 0x383   :  { %6144 = vperm.xlu1 %6911, %v5635_v24   ;;  %v2905_v48 = vadd.f32 %v8580_v60, %v2854_v31  ;;  %v8690_v26 = vrot.slane %v6634_v32, %v7954_v7  ;;  %v5785_v50 = vcombine.low %v8672_v46, %v8677_v8  ;;  %v5832_v15 = vcombine.low %v4287_v11, %v4301_v2 }
 0x384   :  { %v6638_v59 = vcombine.high %v4287_v11, %v4301_v2  ;;  %v6637_v34 = vcombine.high %v8672_v46, %v8677_v8  ;;  %v8697_v53 = vrot.slane %v5783_v49, %v7954_v7  ;;  %v8700_v4 = vrot.slane %v6636_v33, %v7954_v7  ;;  %6147 = vperm.xlu0 %6910, %v5684_v27  }
 0x385   :  { %v5834_v63 = vcombine.low %v8686_v36, %v8680_v61  ;;  %v4313_v32 = vcombine.high %v2905_v48, %v2905_v48  ;;  %v4320_v42 = vrot.slane %v2905_v48, %v7954_v7  ;;  %v2906_v6 = vadd.f32 %v8580_v60, %v2859_v22 }
 0x386   :  { %v5709_v13 = vrot.slane %v5687_v1, %v7954_v7  ;;  %v6639_v35 = vcombine.high %v8686_v36, %v8680_v61  ;;  %v5716_v23 = vrot.slane %v6633_v0, %v7954_v7  ;;  %v5717_v54 = vcombine.low %v8641_v43, %v8644_v16 }
 0x387   :  { %v2892_v58 = vadd.f32 %v8580_v60, %v2789_v40  ;;  %v8720_v44 = vrot.slane %v5832_v15, %v7954_v7  ;;  %v4327_v41 = vrot.slane %v4313_v32, %v7954_v7  ;;  %v4328_v57 = vcombine.high %v4320_v42, %v4320_v42 }
 0x388   :  { %v4362_v1 = vcombine.high %v2906_v6, %v2906_v6  ;;  %v8724_v17 = vrot.slane %v6638_v59, %v7954_v7  ;;  %v4369_v12 = vrot.slane %v2906_v6, %v7954_v7  ;;  %v5718_v22 = vcombine.low %v5709_v13, %v5716_v23 }
 0x389   :  { %v3676_v9 = vcombine.high %v2892_v58, %v2892_v58  ;;  %v4329_v47 = vcombine.high %v4327_v41, %v4327_v41  ;;  %v4336_v0 = vrot.slane %v4320_v42, %v7954_v7  ;;  %v4350_v43 = vrot.slane %v4328_v57, %v7954_v7  ;;  %v2864_v42 = vpop.xlane.xlu1 %2863 }
 0x38a   :  { %v4376_v16 = vrot.slane %v4362_v1, %v7954_v7  ;;  %v4377_v56 = vcombine.high %v4369_v12, %v4369_v12  ;;  %v5725_v62 = vrot.slane %v5717_v54, %v7954_v7  ;;  %v5732_v11 = vrot.slane %v5718_v22, %v7954_v7 }
 0x38b   :  { %v3683_v37 = vrot.slane %v2892_v58, %v7954_v7  ;;  %v8734_v28 = vrot.slane %v4327_v41, %v7954_v7  ;;  %v8737_v5 = vrot.slane %v4329_v47, %v7954_v7  ;;  %v5881_v10 = vcombine.low %v4336_v0, %v4350_v43 }
 0x38c   :  { %v4378_v38 = vcombine.high %v4376_v16, %v4376_v16  ;;  %v6640_v31 = vcombine.high %v4336_v0, %v4350_v43  ;;  %v4399_v2 = vrot.slane %v4377_v56, %v7954_v7  ;;  %v5733_v24 = vcombine.low %v5725_v62, %v5732_v11 }
 0x38d   :  { %v3690_v51 = vrot.slane %v3676_v9, %v7954_v7  ;;  %v5883_v49 = vcombine.low %v8734_v28, %v8737_v5  ;;  %v4385_v33 = vrot.slane %v4369_v12, %v7954_v7  ;;  %v8745_v27 = vrot.slane %v4376_v16, %v7954_v7  ;;  %v2869_v19 = vpop.xlane.xlu1 %2868 }
 0x38e   :  { %v5758_v48 = vrot.slane %v5736_v25, %v7954_v7  ;;  %v6641_v15 = vcombine.high %v8734_v28, %v8737_v5  ;;  %v8754_v59 = vrot.slane %v5881_v10, %v7954_v7  ;;  %v8757_v40 = vrot.slane %v4378_v38, %v7954_v7  ;;  %6150 = vperm.xlu1 %6911, %v5733_v24  }
 0x38f   :  { %v3691_v32 = vcombine.high %v3683_v37, %v3683_v37  ;;  %v5930_v6 = vcombine.low %v4385_v33, %v4399_v2  ;;  %v6642_v13 = vcombine.high %v4385_v33, %v4399_v2  ;;  %v3692_v23 = vcombine.high %v3690_v51, %v3690_v51 }
 0x390   :  { %v5765_v25 = vrot.slane %v6635_v18, %v7954_v7  ;;  %v8764_v54 = vrot.slane %v6640_v31, %v7954_v7  ;;  %v5932_v58 = vcombine.low %v8745_v27, %v8757_v40  ;;  %v3699_v41 = vrot.slane %v3683_v37, %v7954_v7 }
 0x391   :  { %v8770_v57 = vrot.slane %v3690_v51, %v7954_v7  ;;  %v3713_v1 = vrot.slane %v3691_v32, %v7954_v7  ;;  %v8774_v12 = vrot.slane %v3692_v23, %v7954_v7  ;;  %v5766_v55 = vcombine.low %v8683_v3, %v8690_v26 }
 0x392   :  { %v5767_v45 = vcombine.low %v5758_v48, %v5765_v25  ;;  %v2907_v18 = vadd.f32 %v8580_v60, %v2864_v42  ;;  %v5219_v22 = vrot.slane %v5197_v20, %v7954_v7  ;;  %v5226_v9 = vrot.slane %v6613_v52, %v7954_v7 }
 0x393   :  { %v5227_v47 = vcombine.low %v8386_v39, %v8397_v21  ;;  %v6643_v0 = vcombine.high %v8745_v27, %v8757_v40  ;;  %v8792_v3 = vrot.slane %v5930_v6, %v7954_v7  ;;  %v8795_v26 = vrot.slane %v6642_v13, %v7954_v7 }
 0x394   :  { %v5244_v43 = vcombine.low %v3699_v41, %v3713_v1  ;;  %v5774_v20 = vrot.slane %v5766_v55, %v7954_v7  ;;  %v5781_v16 = vrot.slane %v5767_v45, %v7954_v7  ;;  %v4411_v56 = vcombine.high %v2907_v18, %v2907_v18 }
 0x395   :  { %v4418_v14 = vrot.slane %v2907_v18, %v7954_v7  ;;  %v6614_v52 = vcombine.high %v3699_v41, %v3713_v1  ;;  %v5246_v39 = vcombine.low %v8770_v57, %v8774_v12  ;;  %v6615_v21 = vcombine.high %v8770_v57, %v8774_v12 }
 0x396   :  { %v5228_v62 = vcombine.low %v5219_v22, %v5226_v9  ;;  %v5782_v11 = vcombine.low %v5774_v20, %v5781_v16  ;;  %v4425_v37 = vrot.slane %v4411_v56, %v7954_v7  ;;  %v5235_v38 = vrot.slane %v5227_v47, %v7954_v7 }
 0x397   :  { %v4426_v10 = vcombine.high %v4418_v14, %v4418_v14  ;;  %v2908_v2 = vadd.f32 %v8580_v60, %v2869_v19  ;;  %v5807_v24 = vrot.slane %v5785_v50, %v7954_v7  ;;  %v5814_v51 = vrot.slane %v6637_v34, %v7954_v7 }
 0x398   :  { %v5242_v31 = vrot.slane %v5228_v62, %v7954_v7  ;;  %6153 = vperm.xlu0 %6910, %v5782_v11   ;;  %v4427_v33 = vcombine.high %v4425_v37, %v4425_v37  ;;  %v4434_v48 = vrot.slane %v4418_v14, %v7954_v7  ;;  %v5815_v42 = vcombine.low %v8697_v53, %v8700_v4 }
 0x399   :  { %v4448_v32 = vrot.slane %v4426_v10, %v7954_v7  ;;  %v4460_v6 = vcombine.high %v2908_v2, %v2908_v2  ;;  %v4467_v13 = vrot.slane %v2908_v2, %v7954_v7  ;;  %v5816_v23 = vcombine.low %v5807_v24, %v5814_v51 }
 0x39a   :  { %v5243_v60 = vcombine.low %v5235_v38, %v5242_v31  ;;  %v5254_v50 = vrot.slane %v5244_v43, %v7954_v7  ;;  %v4441_v25 = vrot.slane %v4425_v37, %v7954_v7  ;;  %v4455_v46 = vrot.slane %v4427_v33, %v7954_v7 }
 0x39b   :  { %v5979_v8 = vcombine.low %v4434_v48, %v4448_v32  ;;  %v4474_v34 = vrot.slane %v4460_v6, %v7954_v7  ;;  %v4475_v41 = vcombine.high %v4467_v13, %v4467_v13  ;;  %v5823_v57 = vrot.slane %v5815_v42, %v7954_v7 }
 0x39c   :  { %6120 = vperm.xlu1 %6911, %v5243_v60   ;;  %v5830_v53 = vrot.slane %v5816_v23, %v7954_v7  ;;  %v5261_v4 = vrot.slane %v6614_v52, %v7954_v7  ;;  %v6644_v1 = vcombine.high %v4434_v48, %v4448_v32  ;;  %v5981_v12 = vcombine.low %v4441_v25, %v4455_v46 }
 0x39d   :  { %v4483_v55 = vrot.slane %v4467_v13, %v7954_v7  ;;  %v6645_v45 = vcombine.high %v4441_v25, %v4455_v46  ;;  %v4476_v18 = vcombine.high %v4474_v34, %v4474_v34  ;;  %v4497_v22 = vrot.slane %v4475_v41, %v7954_v7 }
 0x39e   :  { %v5831_v9 = vcombine.low %v5823_v57, %v5830_v53  ;;  %v5856_v47 = vrot.slane %v5834_v63, %v7954_v7  ;;  %v5863_v43 = vrot.slane %v6639_v35, %v7954_v7  ;;  %v5864_v20 = vcombine.low %v8720_v44, %v8724_v17  ;;  %v6082_v53 = vpop.permute.xlu1 %6081 }
 0x39f   :  { %v5905_v16 = vrot.slane %v5883_v49, %v7954_v7  ;;  %v5989_v56 = vrot.slane %v5979_v8, %v7954_v7  ;;  %v4490_v14 = vrot.slane %v4474_v34, %v7954_v7  ;;  %v4504_v19 = vrot.slane %v4476_v18, %v7954_v7 }
 0x3a0   :  { %6156 = vperm.xlu0 %6910, %v5831_v9   ;;  %v5912_v61 = vrot.slane %v6641_v15, %v7954_v7  ;;  %v5996_v36 = vrot.slane %v6644_v1, %v7954_v7  ;;  %v5865_v63 = vcombine.low %v5856_v47, %v5863_v43  ;;  %v5913_v35 = vcombine.low %v8754_v59, %v8764_v54  ;;  %v6079_v47 = vpop.permute.xlu0 %6078 }
 0x3a1   :  { %v5954_v44 = vrot.slane %v5932_v58, %v7954_v7  ;;  %v6028_v17 = vcombine.low %v4483_v55, %v4497_v22  ;;  %v6646_v49 = vcombine.high %v4483_v55, %v4497_v22  ;;  %v6030_v52 = vcombine.low %v4490_v14, %v4504_v19 }
 0x3a2   :  { %v5872_v62 = vrot.slane %v5864_v20, %v7954_v7  ;;  %v6647_v11 = vcombine.high %v4490_v14, %v4504_v19  ;;  %v5879_v28 = vrot.slane %v5865_v63, %v7954_v7  ;;  %v5914_v5 = vcombine.low %v5905_v16, %v5912_v61 }
 0x3a3   :  { %v5961_v15 = vrot.slane %v6643_v0, %v7954_v7  ;;  %v5921_v59 = vrot.slane %v5913_v35, %v7954_v7  ;;  %v5268_v54 = vrot.slane %v5246_v39, %v7954_v7  ;;  %v5275_v58 = vrot.slane %v6615_v21, %v7954_v7 }
 0x3a4   :  { %v5276_v37 = vcombine.low %v5254_v50, %v5261_v4  ;;  %v5880_v10 = vcombine.low %v5872_v62, %v5879_v28  ;;  %v5928_v38 = vrot.slane %v5914_v5, %v7954_v7  ;;  %v6003_v2 = vrot.slane %v5981_v12, %v7954_v7  ;;  %v6085_v4 = vpop.permute.xlu1 %6084 }
 0x3a5   :  { %v5963_v31 = vcombine.low %v5954_v44, %v5961_v15  ;;  %v5277_v24 = vcombine.low %v5268_v54, %v5275_v58  ;;  %v6010_v51 = vrot.slane %v6645_v45, %v7954_v7  ;;  %v5962_v27 = vcombine.low %v8792_v3, %v8795_v26 }
 0x3a6   :  { %6159 = vperm.xlu0 %6910, %v5880_v10   ;;  %v5929_v33 = vcombine.low %v5921_v59, %v5928_v38  ;;  %v6052_v40 = vrot.slane %v6030_v52, %v7954_v7  ;;  %v5284_v0 = vrot.slane %v5276_v37, %v7954_v7  ;;  %v6059_v48 = vrot.slane %v6647_v11, %v7954_v7 }
 0x3a7   :  { %v5291_v39 = vrot.slane %v5277_v24, %v7954_v7  ;;  %v6012_v21 = vcombine.low %v6003_v2, %v6010_v51  ;;  %v6038_v32 = vrot.slane %v6028_v17, %v7954_v7  ;;  %v6045_v42 = vrot.slane %v6646_v49, %v7954_v7 }
 0x3a8   :  { %v5977_v60 = vrot.slane %v5963_v31, %v7954_v7  ;;  %v6011_v6 = vcombine.low %v5989_v56, %v5996_v36  ;;  %v5970_v3 = vrot.slane %v5962_v27, %v7954_v7  ;;  %v6061_v23 = vcombine.low %v6052_v40, %v6059_v48  ;;  %v8884_v1 = vpop.permute.xlu1 %6087 }
 0x3a9   :  { %v5292_v13 = vcombine.low %v5284_v0, %v5291_v39  ;;  %v6026_v26 = vrot.slane %v6012_v21, %v7954_v7  ;;  %v6060_v46 = vcombine.low %v6038_v32, %v6045_v42  ;;  %v8909_v36 = vand.u32 127, %v86_v29 }
 0x3aa   :  { %6162 = vperm.xlu0 %6910, %v5929_v33   ;;  %v5978_v50 = vcombine.low %v5970_v3, %v5977_v60  ;;  %v6019_v25 = vrot.slane %v6011_v6, %v7954_v7  ;;  %v6075_v34 = vrot.slane %v6061_v23, %v7954_v7 }
 0x3ab   :  { %6123 = vperm.xlu1 %6911, %v5292_v13   ;;  %v6068_v41 = vrot.slane %v6060_v46, %v7954_v7  ;;  %v6179_v44 = vadd.s32 4294967288, %v8909_v36  ;;  %v6186_v17 = vadd.s32 4294967280, %v8909_v36  ;;  %v6193_v49 = vadd.s32 4294967272, %v8909_v36 }
 0x3ac   :  { %v6027_v8 = vcombine.low %v6019_v25, %v6026_v26  ;;  %v8886_v12 = vpop.permute.xlu1 %6090  ;;  %v6200_v28 = vadd.s32 4294967264, %v8909_v36  ;;  %v6177_v5 = vsub.s32 %v8909_v36, %v7381_v30  ;;  %v6207_v59 = vadd.s32 4294967256, %v8909_v36 }
 0x3ad   :  { %v6076_v57 = vcombine.low %v6068_v41, %v6075_v34  ;;  %v6182_v11 = vsub.s32 %v6179_v44, %v7381_v30  ;;  %v6189_v15 = vsub.s32 %v6186_v17, %v7381_v30  ;;  %v6196_v54 = vsub.s32 %v6193_v49, %v7381_v30 }
 0x3ae   :  { %6165 = vperm.xlu0 %6910, %v5978_v50   ;;  %v6203_v2 = vsub.s32 %v6200_v28, %v7381_v30  ;;  %v6214_v24 = vadd.s32 4294967248, %v8909_v36  ;;  %v6178_v33 = vrot.slane %v6079_v47, %v6177_v5  ;;  %v6210_v40 = vsub.s32 %v6207_v59, %v7381_v30 }
 0x3af   :  { %v6183_v31 = vrot.slane %v6082_v53, %v6182_v11  ;;  %v6190_v27 = vrot.slane %v6085_v4, %v6189_v15  ;;  %v6221_v0 = vadd.s32 4294967240, %v8909_v36  ;;  %v6197_v39 = vrot.slane %v8884_v1, %v6196_v54 }
 0x3b0   :  { %v8888_v55 = vpop.permute.xlu1 %6093  ;;  %v6228_v32 = vadd.s32 4294967232, %v8909_v36  ;;  %v6204_v3 = vrot.slane %v8886_v12, %v6203_v2  ;;  %v6217_v26 = vsub.s32 %v6214_v24, %v7381_v30  ;;  %v6235_v34 = vadd.s32 4294967224, %v8909_v36 }
 0x3b1   :  { %v6185_v13 = vsel %vm6184_vm1, %v6183_v31, %v6178_v33  ;;  %v6211_v50 = vrot.slane %v8888_v55, %v6210_v40  ;;  %v6224_v25 = vsub.s32 %v6221_v0, %v7381_v30  ;;  %v6242_v4 = vadd.s32 4294967216, %v8909_v36 }
 0x3b2   :  { %6168 = vperm.xlu0 %6910, %v6027_v8   ;;  %v6192_v23 = vsel %vm6191_vm2, %v6190_v27, %v6185_v13  ;;  %v6231_v53 = vsub.s32 %v6228_v32, %v7381_v30  ;;  %v6263_v17 = vadd.s32 4294967192, %v8909_v36 }
 0x3b3   :  { %v6199_v8 = vsel %vm6198_vm3, %v6197_v39, %v6192_v23 }
 0x3b4   :  { %v8890_v45 = vpop.permute.xlu1 %6096  ;;  %v6206_v47 = vsel %vm6205_vm4, %v6204_v3, %v6199_v8  ;;  %v6266_v31 = vsub.s32 %v6263_v17, %v7381_v30 }
 0x3b6   :  { %6171 = vperm.xlu0 %6910, %v6076_v57  }
 0x3b8   :  { %v8892_v18 = vpop.permute.xlu1 %6099 }
 0x3b9   :  { %v6225_v44 = vrot.slane %v8892_v18, %v6224_v25 }
 0x3bc   :  { %v8894_v22 = vpop.permute.xlu1 %6102 }
 0x3bf   :  { %v8898_v43 = vpop.permute.xlu0 %6105 }
 0x3c3   :  { %v8896_v9 = vpop.permute.xlu1 %6108 }
 0x3c8   :  { %v8900_v20 = vpop.permute.xlu1 %6111 }
 0x3cd   :  { %v8902_v56 = vpop.permute.xlu1 %6114 }
 0x3d2   :  { %v8904_v19 = vpop.permute.xlu1 %6117 }
 0x3e3   :  { %v6127_v63 = vpop.permute.xlu1 %6126 }
 0x3e4   :  { %v6287_v51 = vrot.slane %v6127_v63, %v6177_v5  ;;  %v6213_v63 = vsel %vm6212_vm5, %v6211_v50, %v6206_v47  ;;  %v6232_v5 = vrot.slane %v8894_v22, %v6231_v53 }
 0x3e6   :  { %v6130_v16 = vpop.permute.xlu0 %6129 }
 0x3e7   :  { %v6291_v58 = vrot.slane %v6130_v16, %v6182_v11  ;;  %v6218_v16 = vrot.slane %v8890_v45, %v6217_v26  ;;  %v6270_v45 = vadd.s32 4294967184, %v8909_v36 }
 0x3e9   :  { %v6292_v21 = vsel %vm6184_vm1, %v6291_v58, %v6287_v51  ;;  %v6273_v27 = vsub.s32 %v6270_v45, %v7381_v30 }
 0x3ea   :  { %v6133_v52 = vpop.permute.xlu1 %6132 }
 0x3eb   :  { %v6296_v37 = vrot.slane %v6133_v52, %v6189_v15  ;;  %v6238_v52 = vsub.s32 %v6235_v34, %v7381_v30  ;;  %v6245_v15 = vsub.s32 %v6242_v4, %v7381_v30 }
 0x3ed   :  { %v6297_v42 = vsel %vm6191_vm2, %v6296_v37, %v6292_v21  ;;  %v6277_v37 = vadd.s32 4294967176, %v8909_v36  ;;  %v6239_v24 = vrot.slane %v8898_v43, %v6238_v52 }
 0x3ef   :  { %v6280_v43 = vsub.s32 %v6277_v37, %v7381_v30 }
 0x3f0   :  { %v6136_v14 = vpop.permute.xlu0 %6135 }
 0x3f1   :  { %v6301_v48 = vrot.slane %v6136_v14, %v6196_v54  ;;  %v6249_v14 = vadd.s32 4294967208, %v8909_v36  ;;  %v6220_v54 = vsel %vm6219_vm6, %v6218_v16, %v6213_v63 }
 0x3f3   :  { %v6302_v41 = vsel %vm6198_vm3, %v6301_v48, %v6297_v42  ;;  %v6252_v58 = vsub.s32 %v6249_v14, %v7381_v30 }
 0x3f5   :  { %v6253_v21 = vrot.slane %v8900_v20, %v6252_v58 }
 0x3f6   :  { %v6139_v10 = vpop.permute.xlu1 %6138 }
 0x3f7   :  { %v6306_v60 = vrot.slane %v6139_v10, %v6203_v2  ;;  %v6227_v10 = vsel %vm6226_vm7, %v6225_v44, %v6220_v54 }
 0x3f9   :  { %v6307_v1 = vsel %vm6205_vm4, %v6306_v60, %v6302_v41 }
 0x3fb   :  { %v8906_v61 = vpop.permute.xlu0 %6141 }
 0x3fc   :  { %v6311_v57 = vrot.slane %v8906_v61, %v6210_v40  ;;  %v6256_v61 = vadd.s32 4294967200, %v8909_v36  ;;  %v6234_v40 = vsel %vm6233_vm8, %v6232_v5, %v6227_v10  ;;  %v6246_v36 = vrot.slane %v8896_v9, %v6245_v15 }
 0x3fd   :  { %v6241_v9 = vsel %vm6240_vm9, %v6239_v24, %v6234_v40 }
 0x3fe   :  { %v6312_v11 = vsel %vm6212_vm5, %v6311_v57, %v6307_v1  ;;  %v6248_v20 = vsel %vm6247_vm10, %v6246_v36, %v6241_v9 }
 0x3ff   :  { %v6255_v23 = vsel %vm6254_vm11, %v6253_v21, %v6248_v20 }
 0x402   :  { %v6145_v6 = vpop.permute.xlu1 %6144 }
 0x403   :  { %v8911_v35 = vpop.permute.xlu0 %6147  ;;  %v6316_v12 = vrot.slane %v6145_v6, %v6217_v26  ;;  %v6267_v6 = vrot.slane %v8904_v19, %v6266_v31 }
 0x404   :  { %v6321_v28 = vrot.slane %v8911_v35, %v6224_v25  ;;  %v6259_v35 = vsub.s32 %v6256_v61, %v7381_v30 }
 0x405   :  { %v6317_v59 = vsel %vm6219_vm6, %v6316_v12, %v6312_v11 }
 0x406   :  { %v6322_v51 = vsel %vm6226_vm7, %v6321_v28, %v6317_v59 }
 0x40d   :  { %v6151_v55 = vpop.permute.xlu1 %6150 }
 0x40e   :  { %v6326_v18 = vrot.slane %v6151_v55, %v6231_v53 }
 0x410   :  { %v6327_v0 = vsel %vm6233_vm8, %v6326_v18, %v6322_v51 }
 0x417   :  { %v8916_v62 = vpop.permute.xlu0 %6153 }
 0x418   :  { %v6331_v33 = vrot.slane %v8916_v62, %v6238_v52  ;;  %v6260_v62 = vrot.slane %v8902_v56, %v6259_v35 }
 0x41a   :  { %v6262_v25 = vsel %vm6261_vm12, %v6260_v62, %v6255_v23 }
 0x41b   :  { %v6121_v22 = vpop.permute.xlu1 %6120  ;;  %v6269_v8 = vsel %vm6268_vm13, %v6267_v6, %v6262_v25 }
 0x41c   :  { %v6274_v3 = vrot.slane %v6121_v22, %v6273_v27 }
 0x41e   :  { %v6276_v57 = vsel %vm6275_vm14, %v6274_v3, %v6269_v8 }
 0x41f   :  { %v8925_v38 = vpop.permute.xlu0 %6156 }
 0x420   :  { %v6336_v39 = vrot.slane %v8925_v38, %v6245_v15  ;;  %v6332_v38 = vsel %vm6240_vm9, %v6331_v33, %v6327_v0 }
 0x422   :  { %v6337_v26 = vsel %vm6247_vm10, %v6336_v39, %v6332_v38 }
 0x425   :  { %v8941_v46 = vpop.permute.xlu0 %6159 }
 0x426   :  { %v6341_v48 = vrot.slane %v8941_v46, %v6252_v58 }
 0x428   :  { %v6342_v56 = vsel %vm6254_vm11, %v6341_v48, %v6337_v26 }
 0x429   :  { %v6163_v49 = vpop.permute.xlu0 %6162 }
 0x42a   :  { %v6346_v32 = vrot.slane %v6163_v49, %v6259_v35  ;;  %v6124_v42 = vpop.permute.xlu1 %6123 }
 0x42b   :  { %v6281_v50 = vrot.slane %v6124_v42, %v6280_v43 }
 0x42c   :  { %v6347_v46 = vsel %vm6261_vm12, %v6346_v32, %v6342_v56 }
 0x42d   :  { %v6166_v2 = vpop.permute.xlu0 %6165  ;;  %v6283_v4 = vsel %vm6282_vm15, %v6281_v50, %v6276_v57 }
 0x42e   :  { %v6351_v13 = vrot.slane %v6166_v2, %v6266_v31 }
 0x430   :  { %v6352_v34 = vsel %vm6268_vm13, %v6351_v13, %v6347_v46 }
 0x431   :  { %v6169_v60 = vpop.permute.xlu0 %6168 }
 0x432   :  { %v6356_v30 = vrot.slane %v6169_v60, %v6273_v27 }
 0x434   :  { %v6357_v53 = vsel %vm6275_vm14, %v6356_v30, %v6352_v34 }
 0x435   :  { %v6172_v19 = vpop.permute.xlu0 %6171 }
 0x436   :  { %v6361_v41 = vrot.slane %v6172_v19, %v6280_v43 }
 0x438   :  { %v6362_v1 = vsel %vm6282_vm15, %v6361_v41, %v6357_v53 }
 0x439   :  { %v6363_v12 = vcombine.low %v6283_v4, %v6362_v1 }
 0x43b   :  { %v6370_v55 = vrot.slane %v6363_v12, %v7954_v7 }
 0x43d   :  { %v6377_v47 = vrot.slane %v6370_v55, %v7954_v7 }
 0x43f   :  { %6383 = vst.msk [vmem:[#allocation6] sm:$0x3] %vm6381_vm0, %v6377_v47 }
 0x440   :  { %7166 = shalt.err (!%p7163_p12)
}
 0x441   :  { %s7167_s19 = scalar_lea.hbm %s9015_s7, 32 }
 0x442   :  { %p7168_p13 = scmp.ne.s32.totalorder %s9015_s7, %s7167_s19  ;;  %p7171_p0 = scmp.lt.u32.totalorder %s7167_s19, %s9015_s7 }
 0x444   :  { %p7173_p1 = pnand %p7171_p0, %p7168_p13 }
 0x446   :  { %7176 = shalt.err (!%p7173_p1)
}
 0x447   :  { %6393 = dma.vmem_to_hbm [thread:$0]  %s6391_s5, 32, %s9015_s7, [#allocation5]  }
 0x448   :  { %7179 = dma.done.wait [#allocation5], 32  }
 0x449   :  { %7180 = vsyncadd [#allocation5], 4294967264 }
 0x44a   :  { %6397 = vsyncpa [#allocation4], 1 }
 0x44b   :  { %6398 = vsyncpa [#allocation5], 1 }

</bundles_post_ra>
